<compile_context>
chip_gen: v5e
topology: v5e:2x2
jax: 0.10.0
libtpu: 0.0.40
codegen_flags: <defaults>
</compile_context>

<pallas_src>
import functools

import numpy as np
import jax
import jax.numpy as jnp
from jax import lax
from jax.experimental import pallas as pl
from jax.experimental.pallas import tpu as pltpu

# 8-neighbourhood directions (row delta, col delta); order shared by the kernel
# (flat offsets) and the wrapper (validity penalty table).
_DIRS = ((-1, -1), (-1, 0), (-1, 1), (0, -1), (0, 1), (1, -1), (1, 0), (1, 1))


def _bb_shortest_path_kernel(d_ref, w1_ref, b1_ref, w2_ref, b2_ref, pen_ref,
                             out_ref, *, m, n):
    # ---- MLP hot path: bf16 MXU matmuls (f32 accumulate) + VPU leaky-relu ----
    d = d_ref[...]                                                    # (TB, C)
    h = jnp.dot(d.astype(jnp.bfloat16), w1_ref[...].astype(jnp.bfloat16),
                preferred_element_type=jnp.float32) + b1_ref[...]
    h = jnp.where(h >= 0.0, h, 0.1 * h)                               # LeakyReLU(0.1)
    w = jnp.dot(h.astype(jnp.bfloat16), w2_ref[...].astype(jnp.bfloat16),
                preferred_element_type=jnp.float32) + b2_ref[...]     # (TB, Np)

    TB, Np = w.shape
    R = 2 * TB
    BIG = jnp.float32(1e9)

    # ---- fused bidirectional Bellman-Ford on the m x m grid ------------------
    # rows [0, TB)   : distances from the source (0, 0)
    # rows [TB, 2TB) : distances from the target (m-1, m-1)  (graph undirected)
    ws = jnp.concatenate([w, w], axis=0)                              # (R, Np)
    row = lax.broadcasted_iota(jnp.int32, (R, Np), 0)
    col = lax.broadcasted_iota(jnp.int32, (R, Np), 1)
    is_fwd = row < TB
    start_mask = (is_fwd & (col == 0)) | ((~is_fwd) & (col == (n - 1)))
    # start distance includes the start vertex's own weight (bb.ShortestPath).
    w_start = jnp.sum(jnp.where(start_mask, ws, 0.0), axis=1, keepdims=True)
    dist0 = jnp.where(start_mask, w_start, BIG)

    # flat-index offsets of the 8 neighbours; validity comes from pen_ref.
    offsets = tuple(dr * m + dc for dr, dc in _DIRS)
    pads = {wd: jnp.full((R, wd), BIG, jnp.float32)          # hoisted constants
            for wd in sorted({abs(o) for o in offsets})}
    pen = pen_ref[...]                                        # (8, Np)
    pens = [pen[k:k + 1, :] for k in range(len(offsets))]     # (1, Np) rows

    def shifted(x, off):
        # shifted[:, u] = x[:, u + off]; out-of-range lanes become BIG.
        if off > 0:
            return jnp.concatenate([x[:, off:], pads[off]], axis=1)
        return jnp.concatenate([pads[-off], x[:, :off]], axis=1)

    def body(_, dist):
        # best[:, u] = min over valid neighbours v of dist[:, v]
        best = shifted(dist, offsets[0]) + pens[0]
        for k in range(1, len(offsets)):
            best = jnp.minimum(best, shifted(dist, offsets[k]) + pens[k])
        new = jnp.minimum(dist, ws + best)
        return jnp.where(start_mask, dist0, new)   # re-pin the start distance

    n_iter = n                                # any shortest path has <= n-1 edges
    unroll = n_iter if n_iter <= 64 else 8
    dist = lax.fori_loop(0, n_iter, body, dist0, unroll=unroll)

    dist_f = dist[:TB, :]                     # d(source, v)
    dist_b = dist[TB:, :]                     # d(v, target)
    col_f = lax.broadcasted_iota(jnp.int32, (TB, Np), 1)
    total = jnp.sum(jnp.where(col_f == (n - 1), dist_f, 0.0),
                    axis=1, keepdims=True)    # d(source, target), (TB, 1)
    # Node v lies on a shortest path iff d(s,v) + d(v,t) - w[v] == d(s,t).
    on_path = (dist_f + dist_b - w) <= (total + jnp.float32(1e-3))
    out_ref[...] = on_path.astype(jnp.float32)


def bb_shortest_path_net(d, params, m, *, batch_tile=None):
    """Forward pass of BB_ShortestPathNet. d: (B, context_size) f32 -> (B, m, m) f32."""
    w1, b1, w2, b2 = params
    B, C = d.shape
    H = w1.shape[1]
    N = m * m
    Np = ((N + 127) // 128) * 128                 # lane-dense last dimension

    # Batch tile: >= 8 f32 sublanes; larger tiles amortize the resident weights
    # (use ~2x on v6e/v5e, smaller on v7x if VMEM-tight).
    if batch_tile is None:
        batch_tile = min(64, max(8, ((B + 7) // 8) * 8))
    TB = batch_tile
    Bp = ((B + TB - 1) // TB) * TB
    grid = (Bp // TB,)

    d_p = jnp.pad(d, ((0, Bp - B), (0, 0)))
    w2_p = jnp.pad(w2, ((0, 0), (0, Np - N)))
    b2_p = jnp.pad(b2, ((0, 0), (0, Np - N)))

    # Neighbour-validity penalties: pen[k, u] = 0 if the k-th 8-neighbour of
    # flat node u exists on the m x m grid, else 1e9.  (8, Np) replaces the old
    # dense (N, N) no-edge matrix.  (Plain host-side setup glue.)
    u = np.arange(Np)
    gr, gc = u // m, u % m
    valid = u < N
    pen_np = np.full((len(_DIRS), Np), 1e9, np.float32)
    for k, (dr, dc) in enumerate(_DIRS):
        nr, nc = gr + dr, gc + dc
        ok = valid & (nr >= 0) & (nr < m) & (nc >= 0) & (nc < m)
        pen_np[k, ok] = 0.0
    pen = jnp.asarray(pen_np)

    kernel = functools.partial(_bb_shortest_path_kernel, m=m, n=N)
    out_p = pl.pallas_call(
        kernel,
        out_shape=jax.ShapeDtypeStruct((Bp, Np), jnp.float32),
        grid=grid,
        in_specs=[
            pl.BlockSpec((TB, C), lambda i: (i, 0)),            # d (batch-tiled)
            pl.BlockSpec((C, H), lambda i: (0, 0)),             # fc1 weight (in, out)
            pl.BlockSpec((1, H), lambda i: (0, 0)),             # fc1 bias
            pl.BlockSpec((H, Np), lambda i: (0, 0)),            # fc2 weight (padded)
            pl.BlockSpec((1, Np), lambda i: (0, 0)),            # fc2 bias (padded)
            pl.BlockSpec((len(_DIRS), Np), lambda i: (0, 0)),   # neighbour penalties
        ],
        out_specs=pl.BlockSpec((TB, Np), lambda i: (i, 0)),     # lane-dense output
        compiler_params=pltpu.CompilerParams(
            dimension_semantics=("parallel",)),
    )(d_p, w1, b1, w2_p, b2_p, pen)
    return out_p[:B, :N].reshape(B, m, m)


def init_params(key, m, context_size):
    """Deterministic init matching nn.Linear default: U(-1/sqrt(fan_in), 1/sqrt(fan_in))."""
    hidden = 2 * context_size
    n_out = m * m
    k1 = 1.0 / (context_size ** 0.5)
    k2 = 1.0 / (hidden ** 0.5)
    ks = jax.random.split(key, 4)
    w1 = jax.random.uniform(ks[0], (context_size, hidden), jnp.float32, -k1, k1)
    b1 = jax.random.uniform(ks[1], (1, hidden), jnp.float32, -k1, k1)
    w2 = jax.random.uniform(ks[2], (hidden, n_out), jnp.float32, -k2, k2)
    b2 = jax.random.uniform(ks[3], (1, n_out), jnp.float32, -k2, k2)
    return w1, b1, w2, b2


if __name__ == "__main__":
    m, context_size, batch = 4, 8, 2
    key = jax.random.PRNGKey(0)
    pkey, dkey = jax.random.split(key)
    params = init_params(pkey, m, context_size)
    d = jax.random.normal(dkey, (batch, context_size), jnp.float32)

    paths = bb_shortest_path_net(d, params, m)   # (B, m, m) 0/1 path indicator
    jax.block_until_ready(paths)
    assert paths.shape == (batch, m, m)
    print("KERNEL_OK")
</pallas_src>

<mosaic_0001>
module attributes {stable_mosaic.version = 11 : i64} {
  func.func @_bb_shortest_path_kernel(%arg0: i32, %arg1: memref<8x8xf32, #tpu.memory_space<vmem>>, %arg2: memref<8x16xf32, #tpu.memory_space<vmem>>, %arg3: memref<1x16xf32, #tpu.memory_space<vmem>>, %arg4: memref<16x128xf32, #tpu.memory_space<vmem>>, %arg5: memref<1x128xf32, #tpu.memory_space<vmem>>, %arg6: memref<8x128xf32, #tpu.memory_space<vmem>>, %arg7: memref<8x128xf32, #tpu.memory_space<vmem>>) attributes {dimension_semantics = [#tpu.dimension_semantics<parallel>], iteration_bounds = array<i64: 1>, scalar_prefetch = 0 : i64, scratch_operands = 0 : i64, tpu.core_type = #tpu.core_type<tc>, window_params = [{transform_indices = @transform_0, window_bounds = array<i64: 8, 8>}, {pipeline_mode = #tpu.pipeline_mode<synchronous>, transform_indices = @transform_1, window_bounds = array<i64: 8, 16>}, {pipeline_mode = #tpu.pipeline_mode<synchronous>, transform_indices = @transform_2, window_bounds = array<i64: 1, 16>}, {pipeline_mode = #tpu.pipeline_mode<synchronous>, transform_indices = @transform_3, window_bounds = array<i64: 16, 128>}, {pipeline_mode = #tpu.pipeline_mode<synchronous>, transform_indices = @transform_4, window_bounds = array<i64: 1, 128>}, {pipeline_mode = #tpu.pipeline_mode<synchronous>, transform_indices = @transform_5, window_bounds = array<i64: 8, 128>}, {transform_indices = @transform_6, window_bounds = array<i64: 8, 128>}]} {
    %c0 = arith.constant 0 : index
    %c0_0 = arith.constant 0 : index
    %0 = vector.load %arg1[%c0, %c0_0] : memref<8x8xf32, #tpu.memory_space<vmem>>, vector<8x8xf32>
    %1 = arith.truncf %0 : vector<8x8xf32> to vector<8x8xbf16>
    %c0_1 = arith.constant 0 : index
    %c0_2 = arith.constant 0 : index
    %2 = vector.load %arg2[%c0_1, %c0_2] : memref<8x16xf32, #tpu.memory_space<vmem>>, vector<8x16xf32>
    %3 = arith.truncf %2 : vector<8x16xf32> to vector<8x16xbf16>
    %cst = arith.constant dense<0.000000e+00> : vector<8x16xf32>
    %4 = tpu.matmul %1, %3, %cst {dimension_numbers = #tpu.dot_dimension_numbers<[1], [0], [0], [1], [0, 0, 1, 1], [], []>} : vector<8x8xbf16>, vector<8x16xbf16>, vector<8x16xf32> -> vector<8x16xf32>
    %c0_3 = arith.constant 0 : index
    %c0_4 = arith.constant 0 : index
    %5 = vector.load %arg3[%c0_3, %c0_4] : memref<1x16xf32, #tpu.memory_space<vmem>>, vector<1x16xf32>
    %6 = vector.broadcast %5 : vector<1x16xf32> to vector<8x16xf32>
    %7 = arith.addf %4, %6 : vector<8x16xf32>
    %cst_5 = arith.constant 0.000000e+00 : f32
    %8 = vector.broadcast %cst_5 : f32 to vector<8x16xf32>
    %9 = arith.cmpf oge, %7, %8 : vector<8x16xf32>
    %cst_6 = arith.constant 1.000000e-01 : f32
    %10 = vector.broadcast %cst_6 : f32 to vector<8x16xf32>
    %11 = arith.mulf %10, %7 : vector<8x16xf32>
    %12 = arith.select %9, %7, %11 : vector<8x16xi1>, vector<8x16xf32>
    %13 = arith.truncf %12 : vector<8x16xf32> to vector<8x16xbf16>
    %c0_7 = arith.constant 0 : index
    %c0_8 = arith.constant 0 : index
    %14 = vector.load %arg4[%c0_7, %c0_8] : memref<16x128xf32, #tpu.memory_space<vmem>>, vector<16x128xf32>
    %15 = arith.truncf %14 : vector<16x128xf32> to vector<16x128xbf16>
    %cst_9 = arith.constant dense<0.000000e+00> : vector<8x128xf32>
    %16 = tpu.matmul %13, %15, %cst_9 {dimension_numbers = #tpu.dot_dimension_numbers<[1], [0], [0], [1], [0, 0, 1, 1], [], []>} : vector<8x16xbf16>, vector<16x128xbf16>, vector<8x128xf32> -> vector<8x128xf32>
    %c0_10 = arith.constant 0 : index
    %c0_11 = arith.constant 0 : index
    %17 = vector.load %arg5[%c0_10, %c0_11] : memref<1x128xf32, #tpu.memory_space<vmem>>, vector<1x128xf32>
    %18 = vector.broadcast %17 : vector<1x128xf32> to vector<8x128xf32>
    %19 = arith.addf %16, %18 : vector<8x128xf32>
    %20 = tpu.concatenate %19, %19 in 0 : vector<8x128xf32>, vector<8x128xf32> -> vector<16x128xf32>
    %21 = tpu.iota {dimensions = array<i32: 0>} : vector<16x128xi32>
    %22 = tpu.iota {dimensions = array<i32: 1>} : vector<16x128xi32>
    %c8_i32 = arith.constant 8 : i32
    %23 = vector.broadcast %c8_i32 : i32 to vector<16x128xi32>
    %24 = arith.cmpi slt, %21, %23 : vector<16x128xi32>
    %c0_i32 = arith.constant 0 : i32
    %25 = vector.broadcast %c0_i32 : i32 to vector<16x128xi32>
    %26 = arith.cmpi eq, %22, %25 : vector<16x128xi32>
    %27 = arith.andi %24, %26 : vector<16x128xi1>
    %cst_12 = arith.constant dense<true> : vector<16x128xi1>
    %28 = arith.xori %24, %cst_12 : vector<16x128xi1>
    %c15_i32 = arith.constant 15 : i32
    %29 = vector.broadcast %c15_i32 : i32 to vector<16x128xi32>
    %30 = arith.cmpi eq, %22, %29 : vector<16x128xi32>
    %31 = arith.andi %28, %30 : vector<16x128xi1>
    %32 = arith.ori %27, %31 : vector<16x128xi1>
    %cst_13 = arith.constant 0.000000e+00 : f32
    %33 = vector.broadcast %cst_13 : f32 to vector<16x128xf32>
    %34 = arith.select %32, %20, %33 : vector<16x128xi1>, vector<16x128xf32>
    %cst_14 = arith.constant dense<0.000000e+00> : vector<16xf32>
    %35 = vector.multi_reduction <add>, %34, %cst_14 [1] : vector<16x128xf32> to vector<16xf32>
    %36 = vector.shape_cast %35 : vector<16xf32> to vector<16x1xf32>
    %cst_15 = arith.constant 1.000000e+09 : f32
    %37 = vector.shape_cast %36 : vector<16x1xf32> to vector<16x1xf32>
    %38 = vector.broadcast %37 : vector<16x1xf32> to vector<16x128xf32>
    %39 = vector.broadcast %cst_15 : f32 to vector<16x128xf32>
    %40 = arith.select %32, %38, %39 : vector<16x128xi1>, vector<16x128xf32>
    %cst_16 = arith.constant 1.000000e+09 : f32
    %41 = vector.broadcast %cst_16 : f32 to vector<16x1xf32>
    %cst_17 = arith.constant 1.000000e+09 : f32
    %42 = vector.broadcast %cst_17 : f32 to vector<16x3xf32>
    %cst_18 = arith.constant 1.000000e+09 : f32
    %43 = vector.broadcast %cst_18 : f32 to vector<16x4xf32>
    %cst_19 = arith.constant 1.000000e+09 : f32
    %44 = vector.broadcast %cst_19 : f32 to vector<16x5xf32>
    %c0_20 = arith.constant 0 : index
    %c0_21 = arith.constant 0 : index
    %45 = vector.load %arg6[%c0_20, %c0_21] : memref<8x128xf32, #tpu.memory_space<vmem>>, vector<8x128xf32>
    %46 = vector.extract_strided_slice %45 {offsets = [0, 0], sizes = [1, 128], strides = [1, 1]} : vector<8x128xf32> to vector<1x128xf32>
    %47 = vector.extract_strided_slice %45 {offsets = [1, 0], sizes = [1, 128], strides = [1, 1]} : vector<8x128xf32> to vector<1x128xf32>
    %48 = vector.extract_strided_slice %45 {offsets = [2, 0], sizes = [1, 128], strides = [1, 1]} : vector<8x128xf32> to vector<1x128xf32>
    %49 = vector.extract_strided_slice %45 {offsets = [3, 0], sizes = [1, 128], strides = [1, 1]} : vector<8x128xf32> to vector<1x128xf32>
    %50 = vector.extract_strided_slice %45 {offsets = [4, 0], sizes = [1, 128], strides = [1, 1]} : vector<8x128xf32> to vector<1x128xf32>
    %51 = vector.extract_strided_slice %45 {offsets = [5, 0], sizes = [1, 128], strides = [1, 1]} : vector<8x128xf32> to vector<1x128xf32>
    %52 = vector.extract_strided_slice %45 {offsets = [6, 0], sizes = [1, 128], strides = [1, 1]} : vector<8x128xf32> to vector<1x128xf32>
    %53 = vector.extract_strided_slice %45 {offsets = [7, 0], sizes = [1, 128], strides = [1, 1]} : vector<8x128xf32> to vector<1x128xf32>
    %c0_i32_22 = arith.constant 0 : i32
    %54 = vector.extract_strided_slice %40 {offsets = [0, 0], sizes = [16, 123], strides = [1, 1]} : vector<16x128xf32> to vector<16x123xf32>
    %55 = tpu.concatenate %44, %54 in 1 : vector<16x5xf32>, vector<16x123xf32> -> vector<16x128xf32>
    %56 = vector.broadcast %46 : vector<1x128xf32> to vector<16x128xf32>
    %57 = arith.addf %55, %56 : vector<16x128xf32>
    %58 = vector.extract_strided_slice %40 {offsets = [0, 0], sizes = [16, 124], strides = [1, 1]} : vector<16x128xf32> to vector<16x124xf32>
    %59 = tpu.concatenate %43, %58 in 1 : vector<16x4xf32>, vector<16x124xf32> -> vector<16x128xf32>
    %60 = vector.broadcast %47 : vector<1x128xf32> to vector<16x128xf32>
    %61 = arith.addf %59, %60 : vector<16x128xf32>
    %62 = arith.minimumf %57, %61 : vector<16x128xf32>
    %63 = vector.extract_strided_slice %40 {offsets = [0, 0], sizes = [16, 125], strides = [1, 1]} : vector<16x128xf32> to vector<16x125xf32>
    %64 = tpu.concatenate %42, %63 in 1 : vector<16x3xf32>, vector<16x125xf32> -> vector<16x128xf32>
    %65 = vector.broadcast %48 : vector<1x128xf32> to vector<16x128xf32>
    %66 = arith.addf %64, %65 : vector<16x128xf32>
    %67 = arith.minimumf %62, %66 : vector<16x128xf32>
    %68 = vector.extract_strided_slice %40 {offsets = [0, 0], sizes = [16, 127], strides = [1, 1]} : vector<16x128xf32> to vector<16x127xf32>
    %69 = tpu.concatenate %41, %68 in 1 : vector<16x1xf32>, vector<16x127xf32> -> vector<16x128xf32>
    %70 = vector.broadcast %49 : vector<1x128xf32> to vector<16x128xf32>
    %71 = arith.addf %69, %70 : vector<16x128xf32>
    %72 = arith.minimumf %67, %71 : vector<16x128xf32>
    %73 = vector.extract_strided_slice %40 {offsets = [0, 1], sizes = [16, 127], strides = [1, 1]} : vector<16x128xf32> to vector<16x127xf32>
    %74 = tpu.concatenate %73, %41 in 1 : vector<16x127xf32>, vector<16x1xf32> -> vector<16x128xf32>
    %75 = vector.broadcast %50 : vector<1x128xf32> to vector<16x128xf32>
    %76 = arith.addf %74, %75 : vector<16x128xf32>
    %77 = arith.minimumf %72, %76 : vector<16x128xf32>
    %78 = vector.extract_strided_slice %40 {offsets = [0, 3], sizes = [16, 125], strides = [1, 1]} : vector<16x128xf32> to vector<16x125xf32>
    %79 = tpu.concatenate %78, %42 in 1 : vector<16x125xf32>, vector<16x3xf32> -> vector<16x128xf32>
    %80 = vector.broadcast %51 : vector<1x128xf32> to vector<16x128xf32>
    %81 = arith.addf %79, %80 : vector<16x128xf32>
    %82 = arith.minimumf %77, %81 : vector<16x128xf32>
    %83 = vector.extract_strided_slice %40 {offsets = [0, 4], sizes = [16, 124], strides = [1, 1]} : vector<16x128xf32> to vector<16x124xf32>
    %84 = tpu.concatenate %83, %43 in 1 : vector<16x124xf32>, vector<16x4xf32> -> vector<16x128xf32>
    %85 = vector.broadcast %52 : vector<1x128xf32> to vector<16x128xf32>
    %86 = arith.addf %84, %85 : vector<16x128xf32>
    %87 = arith.minimumf %82, %86 : vector<16x128xf32>
    %88 = vector.extract_strided_slice %40 {offsets = [0, 5], sizes = [16, 123], strides = [1, 1]} : vector<16x128xf32> to vector<16x123xf32>
    %89 = tpu.concatenate %88, %44 in 1 : vector<16x123xf32>, vector<16x5xf32> -> vector<16x128xf32>
    %90 = vector.broadcast %53 : vector<1x128xf32> to vector<16x128xf32>
    %91 = arith.addf %89, %90 : vector<16x128xf32>
    %92 = arith.minimumf %87, %91 : vector<16x128xf32>
    %93 = arith.addf %20, %92 : vector<16x128xf32>
    %94 = arith.minimumf %40, %93 : vector<16x128xf32>
    %95 = arith.select %32, %40, %94 : vector<16x128xi1>, vector<16x128xf32>
    %c1_i32 = arith.constant 1 : i32
    %96 = vector.extract_strided_slice %95 {offsets = [0, 0], sizes = [16, 123], strides = [1, 1]} : vector<16x128xf32> to vector<16x123xf32>
    %97 = tpu.concatenate %44, %96 in 1 : vector<16x5xf32>, vector<16x123xf32> -> vector<16x128xf32>
    %98 = vector.broadcast %46 : vector<1x128xf32> to vector<16x128xf32>
    %99 = arith.addf %97, %98 : vector<16x128xf32>
    %100 = vector.extract_strided_slice %95 {offsets = [0, 0], sizes = [16, 124], strides = [1, 1]} : vector<16x128xf32> to vector<16x124xf32>
    %101 = tpu.concatenate %43, %100 in 1 : vector<16x4xf32>, vector<16x124xf32> -> vector<16x128xf32>
    %102 = vector.broadcast %47 : vector<1x128xf32> to vector<16x128xf32>
    %103 = arith.addf %101, %102 : vector<16x128xf32>
    %104 = arith.minimumf %99, %103 : vector<16x128xf32>
    %105 = vector.extract_strided_slice %95 {offsets = [0, 0], sizes = [16, 125], strides = [1, 1]} : vector<16x128xf32> to vector<16x125xf32>
    %106 = tpu.concatenate %42, %105 in 1 : vector<16x3xf32>, vector<16x125xf32> -> vector<16x128xf32>
    %107 = vector.broadcast %48 : vector<1x128xf32> to vector<16x128xf32>
    %108 = arith.addf %106, %107 : vector<16x128xf32>
    %109 = arith.minimumf %104, %108 : vector<16x128xf32>
    %110 = vector.extract_strided_slice %95 {offsets = [0, 0], sizes = [16, 127], strides = [1, 1]} : vector<16x128xf32> to vector<16x127xf32>
    %111 = tpu.concatenate %41, %110 in 1 : vector<16x1xf32>, vector<16x127xf32> -> vector<16x128xf32>
    %112 = vector.broadcast %49 : vector<1x128xf32> to vector<16x128xf32>
    %113 = arith.addf %111, %112 : vector<16x128xf32>
    %114 = arith.minimumf %109, %113 : vector<16x128xf32>
    %115 = vector.extract_strided_slice %95 {offsets = [0, 1], sizes = [16, 127], strides = [1, 1]} : vector<16x128xf32> to vector<16x127xf32>
    %116 = tpu.concatenate %115, %41 in 1 : vector<16x127xf32>, vector<16x1xf32> -> vector<16x128xf32>
    %117 = vector.broadcast %50 : vector<1x128xf32> to vector<16x128xf32>
    %118 = arith.addf %116, %117 : vector<16x128xf32>
    %119 = arith.minimumf %114, %118 : vector<16x128xf32>
    %120 = vector.extract_strided_slice %95 {offsets = [0, 3], sizes = [16, 125], strides = [1, 1]} : vector<16x128xf32> to vector<16x125xf32>
    %121 = tpu.concatenate %120, %42 in 1 : vector<16x125xf32>, vector<16x3xf32> -> vector<16x128xf32>
    %122 = vector.broadcast %51 : vector<1x128xf32> to vector<16x128xf32>
    %123 = arith.addf %121, %122 : vector<16x128xf32>
    %124 = arith.minimumf %119, %123 : vector<16x128xf32>
    %125 = vector.extract_strided_slice %95 {offsets = [0, 4], sizes = [16, 124], strides = [1, 1]} : vector<16x128xf32> to vector<16x124xf32>
    %126 = tpu.concatenate %125, %43 in 1 : vector<16x124xf32>, vector<16x4xf32> -> vector<16x128xf32>
    %127 = vector.broadcast %52 : vector<1x128xf32> to vector<16x128xf32>
    %128 = arith.addf %126, %127 : vector<16x128xf32>
    %129 = arith.minimumf %124, %128 : vector<16x128xf32>
    %130 = vector.extract_strided_slice %95 {offsets = [0, 5], sizes = [16, 123], strides = [1, 1]} : vector<16x128xf32> to vector<16x123xf32>
    %131 = tpu.concatenate %130, %44 in 1 : vector<16x123xf32>, vector<16x5xf32> -> vector<16x128xf32>
    %132 = vector.broadcast %53 : vector<1x128xf32> to vector<16x128xf32>
    %133 = arith.addf %131, %132 : vector<16x128xf32>
    %134 = arith.minimumf %129, %133 : vector<16x128xf32>
    %135 = arith.addf %20, %134 : vector<16x128xf32>
    %136 = arith.minimumf %95, %135 : vector<16x128xf32>
    %137 = arith.select %32, %40, %136 : vector<16x128xi1>, vector<16x128xf32>
    %c2_i32 = arith.constant 2 : i32
    %138 = vector.extract_strided_slice %137 {offsets = [0, 0], sizes = [16, 123], strides = [1, 1]} : vector<16x128xf32> to vector<16x123xf32>
    %139 = tpu.concatenate %44, %138 in 1 : vector<16x5xf32>, vector<16x123xf32> -> vector<16x128xf32>
    %140 = vector.broadcast %46 : vector<1x128xf32> to vector<16x128xf32>
    %141 = arith.addf %139, %140 : vector<16x128xf32>
    %142 = vector.extract_strided_slice %137 {offsets = [0, 0], sizes = [16, 124], strides = [1, 1]} : vector<16x128xf32> to vector<16x124xf32>
    %143 = tpu.concatenate %43, %142 in 1 : vector<16x4xf32>, vector<16x124xf32> -> vector<16x128xf32>
    %144 = vector.broadcast %47 : vector<1x128xf32> to vector<16x128xf32>
    %145 = arith.addf %143, %144 : vector<16x128xf32>
    %146 = arith.minimumf %141, %145 : vector<16x128xf32>
    %147 = vector.extract_strided_slice %137 {offsets = [0, 0], sizes = [16, 125], strides = [1, 1]} : vector<16x128xf32> to vector<16x125xf32>
    %148 = tpu.concatenate %42, %147 in 1 : vector<16x3xf32>, vector<16x125xf32> -> vector<16x128xf32>
    %149 = vector.broadcast %48 : vector<1x128xf32> to vector<16x128xf32>
    %150 = arith.addf %148, %149 : vector<16x128xf32>
    %151 = arith.minimumf %146, %150 : vector<16x128xf32>
    %152 = vector.extract_strided_slice %137 {offsets = [0, 0], sizes = [16, 127], strides = [1, 1]} : vector<16x128xf32> to vector<16x127xf32>
    %153 = tpu.concatenate %41, %152 in 1 : vector<16x1xf32>, vector<16x127xf32> -> vector<16x128xf32>
    %154 = vector.broadcast %49 : vector<1x128xf32> to vector<16x128xf32>
    %155 = arith.addf %153, %154 : vector<16x128xf32>
    %156 = arith.minimumf %151, %155 : vector<16x128xf32>
    %157 = vector.extract_strided_slice %137 {offsets = [0, 1], sizes = [16, 127], strides = [1, 1]} : vector<16x128xf32> to vector<16x127xf32>
    %158 = tpu.concatenate %157, %41 in 1 : vector<16x127xf32>, vector<16x1xf32> -> vector<16x128xf32>
    %159 = vector.broadcast %50 : vector<1x128xf32> to vector<16x128xf32>
    %160 = arith.addf %158, %159 : vector<16x128xf32>
    %161 = arith.minimumf %156, %160 : vector<16x128xf32>
    %162 = vector.extract_strided_slice %137 {offsets = [0, 3], sizes = [16, 125], strides = [1, 1]} : vector<16x128xf32> to vector<16x125xf32>
    %163 = tpu.concatenate %162, %42 in 1 : vector<16x125xf32>, vector<16x3xf32> -> vector<16x128xf32>
    %164 = vector.broadcast %51 : vector<1x128xf32> to vector<16x128xf32>
    %165 = arith.addf %163, %164 : vector<16x128xf32>
    %166 = arith.minimumf %161, %165 : vector<16x128xf32>
    %167 = vector.extract_strided_slice %137 {offsets = [0, 4], sizes = [16, 124], strides = [1, 1]} : vector<16x128xf32> to vector<16x124xf32>
    %168 = tpu.concatenate %167, %43 in 1 : vector<16x124xf32>, vector<16x4xf32> -> vector<16x128xf32>
    %169 = vector.broadcast %52 : vector<1x128xf32> to vector<16x128xf32>
    %170 = arith.addf %168, %169 : vector<16x128xf32>
    %171 = arith.minimumf %166, %170 : vector<16x128xf32>
    %172 = vector.extract_strided_slice %137 {offsets = [0, 5], sizes = [16, 123], strides = [1, 1]} : vector<16x128xf32> to vector<16x123xf32>
    %173 = tpu.concatenate %172, %44 in 1 : vector<16x123xf32>, vector<16x5xf32> -> vector<16x128xf32>
    %174 = vector.broadcast %53 : vector<1x128xf32> to vector<16x128xf32>
    %175 = arith.addf %173, %174 : vector<16x128xf32>
    %176 = arith.minimumf %171, %175 : vector<16x128xf32>
    %177 = arith.addf %20, %176 : vector<16x128xf32>
    %178 = arith.minimumf %137, %177 : vector<16x128xf32>
    %179 = arith.select %32, %40, %178 : vector<16x128xi1>, vector<16x128xf32>
    %c3_i32 = arith.constant 3 : i32
    %180 = vector.extract_strided_slice %179 {offsets = [0, 0], sizes = [16, 123], strides = [1, 1]} : vector<16x128xf32> to vector<16x123xf32>
    %181 = tpu.concatenate %44, %180 in 1 : vector<16x5xf32>, vector<16x123xf32> -> vector<16x128xf32>
    %182 = vector.broadcast %46 : vector<1x128xf32> to vector<16x128xf32>
    %183 = arith.addf %181, %182 : vector<16x128xf32>
    %184 = vector.extract_strided_slice %179 {offsets = [0, 0], sizes = [16, 124], strides = [1, 1]} : vector<16x128xf32> to vector<16x124xf32>
    %185 = tpu.concatenate %43, %184 in 1 : vector<16x4xf32>, vector<16x124xf32> -> vector<16x128xf32>
    %186 = vector.broadcast %47 : vector<1x128xf32> to vector<16x128xf32>
    %187 = arith.addf %185, %186 : vector<16x128xf32>
    %188 = arith.minimumf %183, %187 : vector<16x128xf32>
    %189 = vector.extract_strided_slice %179 {offsets = [0, 0], sizes = [16, 125], strides = [1, 1]} : vector<16x128xf32> to vector<16x125xf32>
    %190 = tpu.concatenate %42, %189 in 1 : vector<16x3xf32>, vector<16x125xf32> -> vector<16x128xf32>
    %191 = vector.broadcast %48 : vector<1x128xf32> to vector<16x128xf32>
    %192 = arith.addf %190, %191 : vector<16x128xf32>
    %193 = arith.minimumf %188, %192 : vector<16x128xf32>
    %194 = vector.extract_strided_slice %179 {offsets = [0, 0], sizes = [16, 127], strides = [1, 1]} : vector<16x128xf32> to vector<16x127xf32>
    %195 = tpu.concatenate %41, %194 in 1 : vector<16x1xf32>, vector<16x127xf32> -> vector<16x128xf32>
    %196 = vector.broadcast %49 : vector<1x128xf32> to vector<16x128xf32>
    %197 = arith.addf %195, %196 : vector<16x128xf32>
    %198 = arith.minimumf %193, %197 : vector<16x128xf32>
    %199 = vector.extract_strided_slice %179 {offsets = [0, 1], sizes = [16, 127], strides = [1, 1]} : vector<16x128xf32> to vector<16x127xf32>
    %200 = tpu.concatenate %199, %41 in 1 : vector<16x127xf32>, vector<16x1xf32> -> vector<16x128xf32>
    %201 = vector.broadcast %50 : vector<1x128xf32> to vector<16x128xf32>
    %202 = arith.addf %200, %201 : vector<16x128xf32>
    %203 = arith.minimumf %198, %202 : vector<16x128xf32>
    %204 = vector.extract_strided_slice %179 {offsets = [0, 3], sizes = [16, 125], strides = [1, 1]} : vector<16x128xf32> to vector<16x125xf32>
    %205 = tpu.concatenate %204, %42 in 1 : vector<16x125xf32>, vector<16x3xf32> -> vector<16x128xf32>
    %206 = vector.broadcast %51 : vector<1x128xf32> to vector<16x128xf32>
    %207 = arith.addf %205, %206 : vector<16x128xf32>
    %208 = arith.minimumf %203, %207 : vector<16x128xf32>
    %209 = vector.extract_strided_slice %179 {offsets = [0, 4], sizes = [16, 124], strides = [1, 1]} : vector<16x128xf32> to vector<16x124xf32>
    %210 = tpu.concatenate %209, %43 in 1 : vector<16x124xf32>, vector<16x4xf32> -> vector<16x128xf32>
    %211 = vector.broadcast %52 : vector<1x128xf32> to vector<16x128xf32>
    %212 = arith.addf %210, %211 : vector<16x128xf32>
    %213 = arith.minimumf %208, %212 : vector<16x128xf32>
    %214 = vector.extract_strided_slice %179 {offsets = [0, 5], sizes = [16, 123], strides = [1, 1]} : vector<16x128xf32> to vector<16x123xf32>
    %215 = tpu.concatenate %214, %44 in 1 : vector<16x123xf32>, vector<16x5xf32> -> vector<16x128xf32>
    %216 = vector.broadcast %53 : vector<1x128xf32> to vector<16x128xf32>
    %217 = arith.addf %215, %216 : vector<16x128xf32>
    %218 = arith.minimumf %213, %217 : vector<16x128xf32>
    %219 = arith.addf %20, %218 : vector<16x128xf32>
    %220 = arith.minimumf %179, %219 : vector<16x128xf32>
    %221 = arith.select %32, %40, %220 : vector<16x128xi1>, vector<16x128xf32>
    %c4_i32 = arith.constant 4 : i32
    %222 = vector.extract_strided_slice %221 {offsets = [0, 0], sizes = [16, 123], strides = [1, 1]} : vector<16x128xf32> to vector<16x123xf32>
    %223 = tpu.concatenate %44, %222 in 1 : vector<16x5xf32>, vector<16x123xf32> -> vector<16x128xf32>
    %224 = vector.broadcast %46 : vector<1x128xf32> to vector<16x128xf32>
    %225 = arith.addf %223, %224 : vector<16x128xf32>
    %226 = vector.extract_strided_slice %221 {offsets = [0, 0], sizes = [16, 124], strides = [1, 1]} : vector<16x128xf32> to vector<16x124xf32>
    %227 = tpu.concatenate %43, %226 in 1 : vector<16x4xf32>, vector<16x124xf32> -> vector<16x128xf32>
    %228 = vector.broadcast %47 : vector<1x128xf32> to vector<16x128xf32>
    %229 = arith.addf %227, %228 : vector<16x128xf32>
    %230 = arith.minimumf %225, %229 : vector<16x128xf32>
    %231 = vector.extract_strided_slice %221 {offsets = [0, 0], sizes = [16, 125], strides = [1, 1]} : vector<16x128xf32> to vector<16x125xf32>
    %232 = tpu.concatenate %42, %231 in 1 : vector<16x3xf32>, vector<16x125xf32> -> vector<16x128xf32>
    %233 = vector.broadcast %48 : vector<1x128xf32> to vector<16x128xf32>
    %234 = arith.addf %232, %233 : vector<16x128xf32>
    %235 = arith.minimumf %230, %234 : vector<16x128xf32>
    %236 = vector.extract_strided_slice %221 {offsets = [0, 0], sizes = [16, 127], strides = [1, 1]} : vector<16x128xf32> to vector<16x127xf32>
    %237 = tpu.concatenate %41, %236 in 1 : vector<16x1xf32>, vector<16x127xf32> -> vector<16x128xf32>
    %238 = vector.broadcast %49 : vector<1x128xf32> to vector<16x128xf32>
    %239 = arith.addf %237, %238 : vector<16x128xf32>
    %240 = arith.minimumf %235, %239 : vector<16x128xf32>
    %241 = vector.extract_strided_slice %221 {offsets = [0, 1], sizes = [16, 127], strides = [1, 1]} : vector<16x128xf32> to vector<16x127xf32>
    %242 = tpu.concatenate %241, %41 in 1 : vector<16x127xf32>, vector<16x1xf32> -> vector<16x128xf32>
    %243 = vector.broadcast %50 : vector<1x128xf32> to vector<16x128xf32>
    %244 = arith.addf %242, %243 : vector<16x128xf32>
    %245 = arith.minimumf %240, %244 : vector<16x128xf32>
    %246 = vector.extract_strided_slice %221 {offsets = [0, 3], sizes = [16, 125], strides = [1, 1]} : vector<16x128xf32> to vector<16x125xf32>
    %247 = tpu.concatenate %246, %42 in 1 : vector<16x125xf32>, vector<16x3xf32> -> vector<16x128xf32>
    %248 = vector.broadcast %51 : vector<1x128xf32> to vector<16x128xf32>
    %249 = arith.addf %247, %248 : vector<16x128xf32>
    %250 = arith.minimumf %245, %249 : vector<16x128xf32>
    %251 = vector.extract_strided_slice %221 {offsets = [0, 4], sizes = [16, 124], strides = [1, 1]} : vector<16x128xf32> to vector<16x124xf32>
    %252 = tpu.concatenate %251, %43 in 1 : vector<16x124xf32>, vector<16x4xf32> -> vector<16x128xf32>
    %253 = vector.broadcast %52 : vector<1x128xf32> to vector<16x128xf32>
    %254 = arith.addf %252, %253 : vector<16x128xf32>
    %255 = arith.minimumf %250, %254 : vector<16x128xf32>
    %256 = vector.extract_strided_slice %221 {offsets = [0, 5], sizes = [16, 123], strides = [1, 1]} : vector<16x128xf32> to vector<16x123xf32>
    %257 = tpu.concatenate %256, %44 in 1 : vector<16x123xf32>, vector<16x5xf32> -> vector<16x128xf32>
    %258 = vector.broadcast %53 : vector<1x128xf32> to vector<16x128xf32>
    %259 = arith.addf %257, %258 : vector<16x128xf32>
    %260 = arith.minimumf %255, %259 : vector<16x128xf32>
    %261 = arith.addf %20, %260 : vector<16x128xf32>
    %262 = arith.minimumf %221, %261 : vector<16x128xf32>
    %263 = arith.select %32, %40, %262 : vector<16x128xi1>, vector<16x128xf32>
    %c5_i32 = arith.constant 5 : i32
    %264 = vector.extract_strided_slice %263 {offsets = [0, 0], sizes = [16, 123], strides = [1, 1]} : vector<16x128xf32> to vector<16x123xf32>
    %265 = tpu.concatenate %44, %264 in 1 : vector<16x5xf32>, vector<16x123xf32> -> vector<16x128xf32>
    %266 = vector.broadcast %46 : vector<1x128xf32> to vector<16x128xf32>
    %267 = arith.addf %265, %266 : vector<16x128xf32>
    %268 = vector.extract_strided_slice %263 {offsets = [0, 0], sizes = [16, 124], strides = [1, 1]} : vector<16x128xf32> to vector<16x124xf32>
    %269 = tpu.concatenate %43, %268 in 1 : vector<16x4xf32>, vector<16x124xf32> -> vector<16x128xf32>
    %270 = vector.broadcast %47 : vector<1x128xf32> to vector<16x128xf32>
    %271 = arith.addf %269, %270 : vector<16x128xf32>
    %272 = arith.minimumf %267, %271 : vector<16x128xf32>
    %273 = vector.extract_strided_slice %263 {offsets = [0, 0], sizes = [16, 125], strides = [1, 1]} : vector<16x128xf32> to vector<16x125xf32>
    %274 = tpu.concatenate %42, %273 in 1 : vector<16x3xf32>, vector<16x125xf32> -> vector<16x128xf32>
    %275 = vector.broadcast %48 : vector<1x128xf32> to vector<16x128xf32>
    %276 = arith.addf %274, %275 : vector<16x128xf32>
    %277 = arith.minimumf %272, %276 : vector<16x128xf32>
    %278 = vector.extract_strided_slice %263 {offsets = [0, 0], sizes = [16, 127], strides = [1, 1]} : vector<16x128xf32> to vector<16x127xf32>
    %279 = tpu.concatenate %41, %278 in 1 : vector<16x1xf32>, vector<16x127xf32> -> vector<16x128xf32>
    %280 = vector.broadcast %49 : vector<1x128xf32> to vector<16x128xf32>
    %281 = arith.addf %279, %280 : vector<16x128xf32>
    %282 = arith.minimumf %277, %281 : vector<16x128xf32>
    %283 = vector.extract_strided_slice %263 {offsets = [0, 1], sizes = [16, 127], strides = [1, 1]} : vector<16x128xf32> to vector<16x127xf32>
    %284 = tpu.concatenate %283, %41 in 1 : vector<16x127xf32>, vector<16x1xf32> -> vector<16x128xf32>
    %285 = vector.broadcast %50 : vector<1x128xf32> to vector<16x128xf32>
    %286 = arith.addf %284, %285 : vector<16x128xf32>
    %287 = arith.minimumf %282, %286 : vector<16x128xf32>
    %288 = vector.extract_strided_slice %263 {offsets = [0, 3], sizes = [16, 125], strides = [1, 1]} : vector<16x128xf32> to vector<16x125xf32>
    %289 = tpu.concatenate %288, %42 in 1 : vector<16x125xf32>, vector<16x3xf32> -> vector<16x128xf32>
    %290 = vector.broadcast %51 : vector<1x128xf32> to vector<16x128xf32>
    %291 = arith.addf %289, %290 : vector<16x128xf32>
    %292 = arith.minimumf %287, %291 : vector<16x128xf32>
    %293 = vector.extract_strided_slice %263 {offsets = [0, 4], sizes = [16, 124], strides = [1, 1]} : vector<16x128xf32> to vector<16x124xf32>
    %294 = tpu.concatenate %293, %43 in 1 : vector<16x124xf32>, vector<16x4xf32> -> vector<16x128xf32>
    %295 = vector.broadcast %52 : vector<1x128xf32> to vector<16x128xf32>
    %296 = arith.addf %294, %295 : vector<16x128xf32>
    %297 = arith.minimumf %292, %296 : vector<16x128xf32>
    %298 = vector.extract_strided_slice %263 {offsets = [0, 5], sizes = [16, 123], strides = [1, 1]} : vector<16x128xf32> to vector<16x123xf32>
    %299 = tpu.concatenate %298, %44 in 1 : vector<16x123xf32>, vector<16x5xf32> -> vector<16x128xf32>
    %300 = vector.broadcast %53 : vector<1x128xf32> to vector<16x128xf32>
    %301 = arith.addf %299, %300 : vector<16x128xf32>
    %302 = arith.minimumf %297, %301 : vector<16x128xf32>
    %303 = arith.addf %20, %302 : vector<16x128xf32>
    %304 = arith.minimumf %263, %303 : vector<16x128xf32>
    %305 = arith.select %32, %40, %304 : vector<16x128xi1>, vector<16x128xf32>
    %c6_i32 = arith.constant 6 : i32
    %306 = vector.extract_strided_slice %305 {offsets = [0, 0], sizes = [16, 123], strides = [1, 1]} : vector<16x128xf32> to vector<16x123xf32>
    %307 = tpu.concatenate %44, %306 in 1 : vector<16x5xf32>, vector<16x123xf32> -> vector<16x128xf32>
    %308 = vector.broadcast %46 : vector<1x128xf32> to vector<16x128xf32>
    %309 = arith.addf %307, %308 : vector<16x128xf32>
    %310 = vector.extract_strided_slice %305 {offsets = [0, 0], sizes = [16, 124], strides = [1, 1]} : vector<16x128xf32> to vector<16x124xf32>
    %311 = tpu.concatenate %43, %310 in 1 : vector<16x4xf32>, vector<16x124xf32> -> vector<16x128xf32>
    %312 = vector.broadcast %47 : vector<1x128xf32> to vector<16x128xf32>
    %313 = arith.addf %311, %312 : vector<16x128xf32>
    %314 = arith.minimumf %309, %313 : vector<16x128xf32>
    %315 = vector.extract_strided_slice %305 {offsets = [0, 0], sizes = [16, 125], strides = [1, 1]} : vector<16x128xf32> to vector<16x125xf32>
    %316 = tpu.concatenate %42, %315 in 1 : vector<16x3xf32>, vector<16x125xf32> -> vector<16x128xf32>
    %317 = vector.broadcast %48 : vector<1x128xf32> to vector<16x128xf32>
    %318 = arith.addf %316, %317 : vector<16x128xf32>
    %319 = arith.minimumf %314, %318 : vector<16x128xf32>
    %320 = vector.extract_strided_slice %305 {offsets = [0, 0], sizes = [16, 127], strides = [1, 1]} : vector<16x128xf32> to vector<16x127xf32>
    %321 = tpu.concatenate %41, %320 in 1 : vector<16x1xf32>, vector<16x127xf32> -> vector<16x128xf32>
    %322 = vector.broadcast %49 : vector<1x128xf32> to vector<16x128xf32>
    %323 = arith.addf %321, %322 : vector<16x128xf32>
    %324 = arith.minimumf %319, %323 : vector<16x128xf32>
    %325 = vector.extract_strided_slice %305 {offsets = [0, 1], sizes = [16, 127], strides = [1, 1]} : vector<16x128xf32> to vector<16x127xf32>
    %326 = tpu.concatenate %325, %41 in 1 : vector<16x127xf32>, vector<16x1xf32> -> vector<16x128xf32>
    %327 = vector.broadcast %50 : vector<1x128xf32> to vector<16x128xf32>
    %328 = arith.addf %326, %327 : vector<16x128xf32>
    %329 = arith.minimumf %324, %328 : vector<16x128xf32>
    %330 = vector.extract_strided_slice %305 {offsets = [0, 3], sizes = [16, 125], strides = [1, 1]} : vector<16x128xf32> to vector<16x125xf32>
    %331 = tpu.concatenate %330, %42 in 1 : vector<16x125xf32>, vector<16x3xf32> -> vector<16x128xf32>
    %332 = vector.broadcast %51 : vector<1x128xf32> to vector<16x128xf32>
    %333 = arith.addf %331, %332 : vector<16x128xf32>
    %334 = arith.minimumf %329, %333 : vector<16x128xf32>
    %335 = vector.extract_strided_slice %305 {offsets = [0, 4], sizes = [16, 124], strides = [1, 1]} : vector<16x128xf32> to vector<16x124xf32>
    %336 = tpu.concatenate %335, %43 in 1 : vector<16x124xf32>, vector<16x4xf32> -> vector<16x128xf32>
    %337 = vector.broadcast %52 : vector<1x128xf32> to vector<16x128xf32>
    %338 = arith.addf %336, %337 : vector<16x128xf32>
    %339 = arith.minimumf %334, %338 : vector<16x128xf32>
    %340 = vector.extract_strided_slice %305 {offsets = [0, 5], sizes = [16, 123], strides = [1, 1]} : vector<16x128xf32> to vector<16x123xf32>
    %341 = tpu.concatenate %340, %44 in 1 : vector<16x123xf32>, vector<16x5xf32> -> vector<16x128xf32>
    %342 = vector.broadcast %53 : vector<1x128xf32> to vector<16x128xf32>
    %343 = arith.addf %341, %342 : vector<16x128xf32>
    %344 = arith.minimumf %339, %343 : vector<16x128xf32>
    %345 = arith.addf %20, %344 : vector<16x128xf32>
    %346 = arith.minimumf %305, %345 : vector<16x128xf32>
    %347 = arith.select %32, %40, %346 : vector<16x128xi1>, vector<16x128xf32>
    %c7_i32 = arith.constant 7 : i32
    %348 = vector.extract_strided_slice %347 {offsets = [0, 0], sizes = [16, 123], strides = [1, 1]} : vector<16x128xf32> to vector<16x123xf32>
    %349 = tpu.concatenate %44, %348 in 1 : vector<16x5xf32>, vector<16x123xf32> -> vector<16x128xf32>
    %350 = vector.broadcast %46 : vector<1x128xf32> to vector<16x128xf32>
    %351 = arith.addf %349, %350 : vector<16x128xf32>
    %352 = vector.extract_strided_slice %347 {offsets = [0, 0], sizes = [16, 124], strides = [1, 1]} : vector<16x128xf32> to vector<16x124xf32>
    %353 = tpu.concatenate %43, %352 in 1 : vector<16x4xf32>, vector<16x124xf32> -> vector<16x128xf32>
    %354 = vector.broadcast %47 : vector<1x128xf32> to vector<16x128xf32>
    %355 = arith.addf %353, %354 : vector<16x128xf32>
    %356 = arith.minimumf %351, %355 : vector<16x128xf32>
    %357 = vector.extract_strided_slice %347 {offsets = [0, 0], sizes = [16, 125], strides = [1, 1]} : vector<16x128xf32> to vector<16x125xf32>
    %358 = tpu.concatenate %42, %357 in 1 : vector<16x3xf32>, vector<16x125xf32> -> vector<16x128xf32>
    %359 = vector.broadcast %48 : vector<1x128xf32> to vector<16x128xf32>
    %360 = arith.addf %358, %359 : vector<16x128xf32>
    %361 = arith.minimumf %356, %360 : vector<16x128xf32>
    %362 = vector.extract_strided_slice %347 {offsets = [0, 0], sizes = [16, 127], strides = [1, 1]} : vector<16x128xf32> to vector<16x127xf32>
    %363 = tpu.concatenate %41, %362 in 1 : vector<16x1xf32>, vector<16x127xf32> -> vector<16x128xf32>
    %364 = vector.broadcast %49 : vector<1x128xf32> to vector<16x128xf32>
    %365 = arith.addf %363, %364 : vector<16x128xf32>
    %366 = arith.minimumf %361, %365 : vector<16x128xf32>
    %367 = vector.extract_strided_slice %347 {offsets = [0, 1], sizes = [16, 127], strides = [1, 1]} : vector<16x128xf32> to vector<16x127xf32>
    %368 = tpu.concatenate %367, %41 in 1 : vector<16x127xf32>, vector<16x1xf32> -> vector<16x128xf32>
    %369 = vector.broadcast %50 : vector<1x128xf32> to vector<16x128xf32>
    %370 = arith.addf %368, %369 : vector<16x128xf32>
    %371 = arith.minimumf %366, %370 : vector<16x128xf32>
    %372 = vector.extract_strided_slice %347 {offsets = [0, 3], sizes = [16, 125], strides = [1, 1]} : vector<16x128xf32> to vector<16x125xf32>
    %373 = tpu.concatenate %372, %42 in 1 : vector<16x125xf32>, vector<16x3xf32> -> vector<16x128xf32>
    %374 = vector.broadcast %51 : vector<1x128xf32> to vector<16x128xf32>
    %375 = arith.addf %373, %374 : vector<16x128xf32>
    %376 = arith.minimumf %371, %375 : vector<16x128xf32>
    %377 = vector.extract_strided_slice %347 {offsets = [0, 4], sizes = [16, 124], strides = [1, 1]} : vector<16x128xf32> to vector<16x124xf32>
    %378 = tpu.concatenate %377, %43 in 1 : vector<16x124xf32>, vector<16x4xf32> -> vector<16x128xf32>
    %379 = vector.broadcast %52 : vector<1x128xf32> to vector<16x128xf32>
    %380 = arith.addf %378, %379 : vector<16x128xf32>
    %381 = arith.minimumf %376, %380 : vector<16x128xf32>
    %382 = vector.extract_strided_slice %347 {offsets = [0, 5], sizes = [16, 123], strides = [1, 1]} : vector<16x128xf32> to vector<16x123xf32>
    %383 = tpu.concatenate %382, %44 in 1 : vector<16x123xf32>, vector<16x5xf32> -> vector<16x128xf32>
    %384 = vector.broadcast %53 : vector<1x128xf32> to vector<16x128xf32>
    %385 = arith.addf %383, %384 : vector<16x128xf32>
    %386 = arith.minimumf %381, %385 : vector<16x128xf32>
    %387 = arith.addf %20, %386 : vector<16x128xf32>
    %388 = arith.minimumf %347, %387 : vector<16x128xf32>
    %389 = arith.select %32, %40, %388 : vector<16x128xi1>, vector<16x128xf32>
    %c8_i32_23 = arith.constant 8 : i32
    %390 = vector.extract_strided_slice %389 {offsets = [0, 0], sizes = [16, 123], strides = [1, 1]} : vector<16x128xf32> to vector<16x123xf32>
    %391 = tpu.concatenate %44, %390 in 1 : vector<16x5xf32>, vector<16x123xf32> -> vector<16x128xf32>
    %392 = vector.broadcast %46 : vector<1x128xf32> to vector<16x128xf32>
    %393 = arith.addf %391, %392 : vector<16x128xf32>
    %394 = vector.extract_strided_slice %389 {offsets = [0, 0], sizes = [16, 124], strides = [1, 1]} : vector<16x128xf32> to vector<16x124xf32>
    %395 = tpu.concatenate %43, %394 in 1 : vector<16x4xf32>, vector<16x124xf32> -> vector<16x128xf32>
    %396 = vector.broadcast %47 : vector<1x128xf32> to vector<16x128xf32>
    %397 = arith.addf %395, %396 : vector<16x128xf32>
    %398 = arith.minimumf %393, %397 : vector<16x128xf32>
    %399 = vector.extract_strided_slice %389 {offsets = [0, 0], sizes = [16, 125], strides = [1, 1]} : vector<16x128xf32> to vector<16x125xf32>
    %400 = tpu.concatenate %42, %399 in 1 : vector<16x3xf32>, vector<16x125xf32> -> vector<16x128xf32>
    %401 = vector.broadcast %48 : vector<1x128xf32> to vector<16x128xf32>
    %402 = arith.addf %400, %401 : vector<16x128xf32>
    %403 = arith.minimumf %398, %402 : vector<16x128xf32>
    %404 = vector.extract_strided_slice %389 {offsets = [0, 0], sizes = [16, 127], strides = [1, 1]} : vector<16x128xf32> to vector<16x127xf32>
    %405 = tpu.concatenate %41, %404 in 1 : vector<16x1xf32>, vector<16x127xf32> -> vector<16x128xf32>
    %406 = vector.broadcast %49 : vector<1x128xf32> to vector<16x128xf32>
    %407 = arith.addf %405, %406 : vector<16x128xf32>
    %408 = arith.minimumf %403, %407 : vector<16x128xf32>
    %409 = vector.extract_strided_slice %389 {offsets = [0, 1], sizes = [16, 127], strides = [1, 1]} : vector<16x128xf32> to vector<16x127xf32>
    %410 = tpu.concatenate %409, %41 in 1 : vector<16x127xf32>, vector<16x1xf32> -> vector<16x128xf32>
    %411 = vector.broadcast %50 : vector<1x128xf32> to vector<16x128xf32>
    %412 = arith.addf %410, %411 : vector<16x128xf32>
    %413 = arith.minimumf %408, %412 : vector<16x128xf32>
    %414 = vector.extract_strided_slice %389 {offsets = [0, 3], sizes = [16, 125], strides = [1, 1]} : vector<16x128xf32> to vector<16x125xf32>
    %415 = tpu.concatenate %414, %42 in 1 : vector<16x125xf32>, vector<16x3xf32> -> vector<16x128xf32>
    %416 = vector.broadcast %51 : vector<1x128xf32> to vector<16x128xf32>
    %417 = arith.addf %415, %416 : vector<16x128xf32>
    %418 = arith.minimumf %413, %417 : vector<16x128xf32>
    %419 = vector.extract_strided_slice %389 {offsets = [0, 4], sizes = [16, 124], strides = [1, 1]} : vector<16x128xf32> to vector<16x124xf32>
    %420 = tpu.concatenate %419, %43 in 1 : vector<16x124xf32>, vector<16x4xf32> -> vector<16x128xf32>
    %421 = vector.broadcast %52 : vector<1x128xf32> to vector<16x128xf32>
    %422 = arith.addf %420, %421 : vector<16x128xf32>
    %423 = arith.minimumf %418, %422 : vector<16x128xf32>
    %424 = vector.extract_strided_slice %389 {offsets = [0, 5], sizes = [16, 123], strides = [1, 1]} : vector<16x128xf32> to vector<16x123xf32>
    %425 = tpu.concatenate %424, %44 in 1 : vector<16x123xf32>, vector<16x5xf32> -> vector<16x128xf32>
    %426 = vector.broadcast %53 : vector<1x128xf32> to vector<16x128xf32>
    %427 = arith.addf %425, %426 : vector<16x128xf32>
    %428 = arith.minimumf %423, %427 : vector<16x128xf32>
    %429 = arith.addf %20, %428 : vector<16x128xf32>
    %430 = arith.minimumf %389, %429 : vector<16x128xf32>
    %431 = arith.select %32, %40, %430 : vector<16x128xi1>, vector<16x128xf32>
    %c9_i32 = arith.constant 9 : i32
    %432 = vector.extract_strided_slice %431 {offsets = [0, 0], sizes = [16, 123], strides = [1, 1]} : vector<16x128xf32> to vector<16x123xf32>
    %433 = tpu.concatenate %44, %432 in 1 : vector<16x5xf32>, vector<16x123xf32> -> vector<16x128xf32>
    %434 = vector.broadcast %46 : vector<1x128xf32> to vector<16x128xf32>
    %435 = arith.addf %433, %434 : vector<16x128xf32>
    %436 = vector.extract_strided_slice %431 {offsets = [0, 0], sizes = [16, 124], strides = [1, 1]} : vector<16x128xf32> to vector<16x124xf32>
    %437 = tpu.concatenate %43, %436 in 1 : vector<16x4xf32>, vector<16x124xf32> -> vector<16x128xf32>
    %438 = vector.broadcast %47 : vector<1x128xf32> to vector<16x128xf32>
    %439 = arith.addf %437, %438 : vector<16x128xf32>
    %440 = arith.minimumf %435, %439 : vector<16x128xf32>
    %441 = vector.extract_strided_slice %431 {offsets = [0, 0], sizes = [16, 125], strides = [1, 1]} : vector<16x128xf32> to vector<16x125xf32>
    %442 = tpu.concatenate %42, %441 in 1 : vector<16x3xf32>, vector<16x125xf32> -> vector<16x128xf32>
    %443 = vector.broadcast %48 : vector<1x128xf32> to vector<16x128xf32>
    %444 = arith.addf %442, %443 : vector<16x128xf32>
    %445 = arith.minimumf %440, %444 : vector<16x128xf32>
    %446 = vector.extract_strided_slice %431 {offsets = [0, 0], sizes = [16, 127], strides = [1, 1]} : vector<16x128xf32> to vector<16x127xf32>
    %447 = tpu.concatenate %41, %446 in 1 : vector<16x1xf32>, vector<16x127xf32> -> vector<16x128xf32>
    %448 = vector.broadcast %49 : vector<1x128xf32> to vector<16x128xf32>
    %449 = arith.addf %447, %448 : vector<16x128xf32>
    %450 = arith.minimumf %445, %449 : vector<16x128xf32>
    %451 = vector.extract_strided_slice %431 {offsets = [0, 1], sizes = [16, 127], strides = [1, 1]} : vector<16x128xf32> to vector<16x127xf32>
    %452 = tpu.concatenate %451, %41 in 1 : vector<16x127xf32>, vector<16x1xf32> -> vector<16x128xf32>
    %453 = vector.broadcast %50 : vector<1x128xf32> to vector<16x128xf32>
    %454 = arith.addf %452, %453 : vector<16x128xf32>
    %455 = arith.minimumf %450, %454 : vector<16x128xf32>
    %456 = vector.extract_strided_slice %431 {offsets = [0, 3], sizes = [16, 125], strides = [1, 1]} : vector<16x128xf32> to vector<16x125xf32>
    %457 = tpu.concatenate %456, %42 in 1 : vector<16x125xf32>, vector<16x3xf32> -> vector<16x128xf32>
    %458 = vector.broadcast %51 : vector<1x128xf32> to vector<16x128xf32>
    %459 = arith.addf %457, %458 : vector<16x128xf32>
    %460 = arith.minimumf %455, %459 : vector<16x128xf32>
    %461 = vector.extract_strided_slice %431 {offsets = [0, 4], sizes = [16, 124], strides = [1, 1]} : vector<16x128xf32> to vector<16x124xf32>
    %462 = tpu.concatenate %461, %43 in 1 : vector<16x124xf32>, vector<16x4xf32> -> vector<16x128xf32>
    %463 = vector.broadcast %52 : vector<1x128xf32> to vector<16x128xf32>
    %464 = arith.addf %462, %463 : vector<16x128xf32>
    %465 = arith.minimumf %460, %464 : vector<16x128xf32>
    %466 = vector.extract_strided_slice %431 {offsets = [0, 5], sizes = [16, 123], strides = [1, 1]} : vector<16x128xf32> to vector<16x123xf32>
    %467 = tpu.concatenate %466, %44 in 1 : vector<16x123xf32>, vector<16x5xf32> -> vector<16x128xf32>
    %468 = vector.broadcast %53 : vector<1x128xf32> to vector<16x128xf32>
    %469 = arith.addf %467, %468 : vector<16x128xf32>
    %470 = arith.minimumf %465, %469 : vector<16x128xf32>
    %471 = arith.addf %20, %470 : vector<16x128xf32>
    %472 = arith.minimumf %431, %471 : vector<16x128xf32>
    %473 = arith.select %32, %40, %472 : vector<16x128xi1>, vector<16x128xf32>
    %c10_i32 = arith.constant 10 : i32
    %474 = vector.extract_strided_slice %473 {offsets = [0, 0], sizes = [16, 123], strides = [1, 1]} : vector<16x128xf32> to vector<16x123xf32>
    %475 = tpu.concatenate %44, %474 in 1 : vector<16x5xf32>, vector<16x123xf32> -> vector<16x128xf32>
    %476 = vector.broadcast %46 : vector<1x128xf32> to vector<16x128xf32>
    %477 = arith.addf %475, %476 : vector<16x128xf32>
    %478 = vector.extract_strided_slice %473 {offsets = [0, 0], sizes = [16, 124], strides = [1, 1]} : vector<16x128xf32> to vector<16x124xf32>
    %479 = tpu.concatenate %43, %478 in 1 : vector<16x4xf32>, vector<16x124xf32> -> vector<16x128xf32>
    %480 = vector.broadcast %47 : vector<1x128xf32> to vector<16x128xf32>
    %481 = arith.addf %479, %480 : vector<16x128xf32>
    %482 = arith.minimumf %477, %481 : vector<16x128xf32>
    %483 = vector.extract_strided_slice %473 {offsets = [0, 0], sizes = [16, 125], strides = [1, 1]} : vector<16x128xf32> to vector<16x125xf32>
    %484 = tpu.concatenate %42, %483 in 1 : vector<16x3xf32>, vector<16x125xf32> -> vector<16x128xf32>
    %485 = vector.broadcast %48 : vector<1x128xf32> to vector<16x128xf32>
    %486 = arith.addf %484, %485 : vector<16x128xf32>
    %487 = arith.minimumf %482, %486 : vector<16x128xf32>
    %488 = vector.extract_strided_slice %473 {offsets = [0, 0], sizes = [16, 127], strides = [1, 1]} : vector<16x128xf32> to vector<16x127xf32>
    %489 = tpu.concatenate %41, %488 in 1 : vector<16x1xf32>, vector<16x127xf32> -> vector<16x128xf32>
    %490 = vector.broadcast %49 : vector<1x128xf32> to vector<16x128xf32>
    %491 = arith.addf %489, %490 : vector<16x128xf32>
    %492 = arith.minimumf %487, %491 : vector<16x128xf32>
    %493 = vector.extract_strided_slice %473 {offsets = [0, 1], sizes = [16, 127], strides = [1, 1]} : vector<16x128xf32> to vector<16x127xf32>
    %494 = tpu.concatenate %493, %41 in 1 : vector<16x127xf32>, vector<16x1xf32> -> vector<16x128xf32>
    %495 = vector.broadcast %50 : vector<1x128xf32> to vector<16x128xf32>
    %496 = arith.addf %494, %495 : vector<16x128xf32>
    %497 = arith.minimumf %492, %496 : vector<16x128xf32>
    %498 = vector.extract_strided_slice %473 {offsets = [0, 3], sizes = [16, 125], strides = [1, 1]} : vector<16x128xf32> to vector<16x125xf32>
    %499 = tpu.concatenate %498, %42 in 1 : vector<16x125xf32>, vector<16x3xf32> -> vector<16x128xf32>
    %500 = vector.broadcast %51 : vector<1x128xf32> to vector<16x128xf32>
    %501 = arith.addf %499, %500 : vector<16x128xf32>
    %502 = arith.minimumf %497, %501 : vector<16x128xf32>
    %503 = vector.extract_strided_slice %473 {offsets = [0, 4], sizes = [16, 124], strides = [1, 1]} : vector<16x128xf32> to vector<16x124xf32>
    %504 = tpu.concatenate %503, %43 in 1 : vector<16x124xf32>, vector<16x4xf32> -> vector<16x128xf32>
    %505 = vector.broadcast %52 : vector<1x128xf32> to vector<16x128xf32>
    %506 = arith.addf %504, %505 : vector<16x128xf32>
    %507 = arith.minimumf %502, %506 : vector<16x128xf32>
    %508 = vector.extract_strided_slice %473 {offsets = [0, 5], sizes = [16, 123], strides = [1, 1]} : vector<16x128xf32> to vector<16x123xf32>
    %509 = tpu.concatenate %508, %44 in 1 : vector<16x123xf32>, vector<16x5xf32> -> vector<16x128xf32>
    %510 = vector.broadcast %53 : vector<1x128xf32> to vector<16x128xf32>
    %511 = arith.addf %509, %510 : vector<16x128xf32>
    %512 = arith.minimumf %507, %511 : vector<16x128xf32>
    %513 = arith.addf %20, %512 : vector<16x128xf32>
    %514 = arith.minimumf %473, %513 : vector<16x128xf32>
    %515 = arith.select %32, %40, %514 : vector<16x128xi1>, vector<16x128xf32>
    %c11_i32 = arith.constant 11 : i32
    %516 = vector.extract_strided_slice %515 {offsets = [0, 0], sizes = [16, 123], strides = [1, 1]} : vector<16x128xf32> to vector<16x123xf32>
    %517 = tpu.concatenate %44, %516 in 1 : vector<16x5xf32>, vector<16x123xf32> -> vector<16x128xf32>
    %518 = vector.broadcast %46 : vector<1x128xf32> to vector<16x128xf32>
    %519 = arith.addf %517, %518 : vector<16x128xf32>
    %520 = vector.extract_strided_slice %515 {offsets = [0, 0], sizes = [16, 124], strides = [1, 1]} : vector<16x128xf32> to vector<16x124xf32>
    %521 = tpu.concatenate %43, %520 in 1 : vector<16x4xf32>, vector<16x124xf32> -> vector<16x128xf32>
    %522 = vector.broadcast %47 : vector<1x128xf32> to vector<16x128xf32>
    %523 = arith.addf %521, %522 : vector<16x128xf32>
    %524 = arith.minimumf %519, %523 : vector<16x128xf32>
    %525 = vector.extract_strided_slice %515 {offsets = [0, 0], sizes = [16, 125], strides = [1, 1]} : vector<16x128xf32> to vector<16x125xf32>
    %526 = tpu.concatenate %42, %525 in 1 : vector<16x3xf32>, vector<16x125xf32> -> vector<16x128xf32>
    %527 = vector.broadcast %48 : vector<1x128xf32> to vector<16x128xf32>
    %528 = arith.addf %526, %527 : vector<16x128xf32>
    %529 = arith.minimumf %524, %528 : vector<16x128xf32>
    %530 = vector.extract_strided_slice %515 {offsets = [0, 0], sizes = [16, 127], strides = [1, 1]} : vector<16x128xf32> to vector<16x127xf32>
    %531 = tpu.concatenate %41, %530 in 1 : vector<16x1xf32>, vector<16x127xf32> -> vector<16x128xf32>
    %532 = vector.broadcast %49 : vector<1x128xf32> to vector<16x128xf32>
    %533 = arith.addf %531, %532 : vector<16x128xf32>
    %534 = arith.minimumf %529, %533 : vector<16x128xf32>
    %535 = vector.extract_strided_slice %515 {offsets = [0, 1], sizes = [16, 127], strides = [1, 1]} : vector<16x128xf32> to vector<16x127xf32>
    %536 = tpu.concatenate %535, %41 in 1 : vector<16x127xf32>, vector<16x1xf32> -> vector<16x128xf32>
    %537 = vector.broadcast %50 : vector<1x128xf32> to vector<16x128xf32>
    %538 = arith.addf %536, %537 : vector<16x128xf32>
    %539 = arith.minimumf %534, %538 : vector<16x128xf32>
    %540 = vector.extract_strided_slice %515 {offsets = [0, 3], sizes = [16, 125], strides = [1, 1]} : vector<16x128xf32> to vector<16x125xf32>
    %541 = tpu.concatenate %540, %42 in 1 : vector<16x125xf32>, vector<16x3xf32> -> vector<16x128xf32>
    %542 = vector.broadcast %51 : vector<1x128xf32> to vector<16x128xf32>
    %543 = arith.addf %541, %542 : vector<16x128xf32>
    %544 = arith.minimumf %539, %543 : vector<16x128xf32>
    %545 = vector.extract_strided_slice %515 {offsets = [0, 4], sizes = [16, 124], strides = [1, 1]} : vector<16x128xf32> to vector<16x124xf32>
    %546 = tpu.concatenate %545, %43 in 1 : vector<16x124xf32>, vector<16x4xf32> -> vector<16x128xf32>
    %547 = vector.broadcast %52 : vector<1x128xf32> to vector<16x128xf32>
    %548 = arith.addf %546, %547 : vector<16x128xf32>
    %549 = arith.minimumf %544, %548 : vector<16x128xf32>
    %550 = vector.extract_strided_slice %515 {offsets = [0, 5], sizes = [16, 123], strides = [1, 1]} : vector<16x128xf32> to vector<16x123xf32>
    %551 = tpu.concatenate %550, %44 in 1 : vector<16x123xf32>, vector<16x5xf32> -> vector<16x128xf32>
    %552 = vector.broadcast %53 : vector<1x128xf32> to vector<16x128xf32>
    %553 = arith.addf %551, %552 : vector<16x128xf32>
    %554 = arith.minimumf %549, %553 : vector<16x128xf32>
    %555 = arith.addf %20, %554 : vector<16x128xf32>
    %556 = arith.minimumf %515, %555 : vector<16x128xf32>
    %557 = arith.select %32, %40, %556 : vector<16x128xi1>, vector<16x128xf32>
    %c12_i32 = arith.constant 12 : i32
    %558 = vector.extract_strided_slice %557 {offsets = [0, 0], sizes = [16, 123], strides = [1, 1]} : vector<16x128xf32> to vector<16x123xf32>
    %559 = tpu.concatenate %44, %558 in 1 : vector<16x5xf32>, vector<16x123xf32> -> vector<16x128xf32>
    %560 = vector.broadcast %46 : vector<1x128xf32> to vector<16x128xf32>
    %561 = arith.addf %559, %560 : vector<16x128xf32>
    %562 = vector.extract_strided_slice %557 {offsets = [0, 0], sizes = [16, 124], strides = [1, 1]} : vector<16x128xf32> to vector<16x124xf32>
    %563 = tpu.concatenate %43, %562 in 1 : vector<16x4xf32>, vector<16x124xf32> -> vector<16x128xf32>
    %564 = vector.broadcast %47 : vector<1x128xf32> to vector<16x128xf32>
    %565 = arith.addf %563, %564 : vector<16x128xf32>
    %566 = arith.minimumf %561, %565 : vector<16x128xf32>
    %567 = vector.extract_strided_slice %557 {offsets = [0, 0], sizes = [16, 125], strides = [1, 1]} : vector<16x128xf32> to vector<16x125xf32>
    %568 = tpu.concatenate %42, %567 in 1 : vector<16x3xf32>, vector<16x125xf32> -> vector<16x128xf32>
    %569 = vector.broadcast %48 : vector<1x128xf32> to vector<16x128xf32>
    %570 = arith.addf %568, %569 : vector<16x128xf32>
    %571 = arith.minimumf %566, %570 : vector<16x128xf32>
    %572 = vector.extract_strided_slice %557 {offsets = [0, 0], sizes = [16, 127], strides = [1, 1]} : vector<16x128xf32> to vector<16x127xf32>
    %573 = tpu.concatenate %41, %572 in 1 : vector<16x1xf32>, vector<16x127xf32> -> vector<16x128xf32>
    %574 = vector.broadcast %49 : vector<1x128xf32> to vector<16x128xf32>
    %575 = arith.addf %573, %574 : vector<16x128xf32>
    %576 = arith.minimumf %571, %575 : vector<16x128xf32>
    %577 = vector.extract_strided_slice %557 {offsets = [0, 1], sizes = [16, 127], strides = [1, 1]} : vector<16x128xf32> to vector<16x127xf32>
    %578 = tpu.concatenate %577, %41 in 1 : vector<16x127xf32>, vector<16x1xf32> -> vector<16x128xf32>
    %579 = vector.broadcast %50 : vector<1x128xf32> to vector<16x128xf32>
    %580 = arith.addf %578, %579 : vector<16x128xf32>
    %581 = arith.minimumf %576, %580 : vector<16x128xf32>
    %582 = vector.extract_strided_slice %557 {offsets = [0, 3], sizes = [16, 125], strides = [1, 1]} : vector<16x128xf32> to vector<16x125xf32>
    %583 = tpu.concatenate %582, %42 in 1 : vector<16x125xf32>, vector<16x3xf32> -> vector<16x128xf32>
    %584 = vector.broadcast %51 : vector<1x128xf32> to vector<16x128xf32>
    %585 = arith.addf %583, %584 : vector<16x128xf32>
    %586 = arith.minimumf %581, %585 : vector<16x128xf32>
    %587 = vector.extract_strided_slice %557 {offsets = [0, 4], sizes = [16, 124], strides = [1, 1]} : vector<16x128xf32> to vector<16x124xf32>
    %588 = tpu.concatenate %587, %43 in 1 : vector<16x124xf32>, vector<16x4xf32> -> vector<16x128xf32>
    %589 = vector.broadcast %52 : vector<1x128xf32> to vector<16x128xf32>
    %590 = arith.addf %588, %589 : vector<16x128xf32>
    %591 = arith.minimumf %586, %590 : vector<16x128xf32>
    %592 = vector.extract_strided_slice %557 {offsets = [0, 5], sizes = [16, 123], strides = [1, 1]} : vector<16x128xf32> to vector<16x123xf32>
    %593 = tpu.concatenate %592, %44 in 1 : vector<16x123xf32>, vector<16x5xf32> -> vector<16x128xf32>
    %594 = vector.broadcast %53 : vector<1x128xf32> to vector<16x128xf32>
    %595 = arith.addf %593, %594 : vector<16x128xf32>
    %596 = arith.minimumf %591, %595 : vector<16x128xf32>
    %597 = arith.addf %20, %596 : vector<16x128xf32>
    %598 = arith.minimumf %557, %597 : vector<16x128xf32>
    %599 = arith.select %32, %40, %598 : vector<16x128xi1>, vector<16x128xf32>
    %c13_i32 = arith.constant 13 : i32
    %600 = vector.extract_strided_slice %599 {offsets = [0, 0], sizes = [16, 123], strides = [1, 1]} : vector<16x128xf32> to vector<16x123xf32>
    %601 = tpu.concatenate %44, %600 in 1 : vector<16x5xf32>, vector<16x123xf32> -> vector<16x128xf32>
    %602 = vector.broadcast %46 : vector<1x128xf32> to vector<16x128xf32>
    %603 = arith.addf %601, %602 : vector<16x128xf32>
    %604 = vector.extract_strided_slice %599 {offsets = [0, 0], sizes = [16, 124], strides = [1, 1]} : vector<16x128xf32> to vector<16x124xf32>
    %605 = tpu.concatenate %43, %604 in 1 : vector<16x4xf32>, vector<16x124xf32> -> vector<16x128xf32>
    %606 = vector.broadcast %47 : vector<1x128xf32> to vector<16x128xf32>
    %607 = arith.addf %605, %606 : vector<16x128xf32>
    %608 = arith.minimumf %603, %607 : vector<16x128xf32>
    %609 = vector.extract_strided_slice %599 {offsets = [0, 0], sizes = [16, 125], strides = [1, 1]} : vector<16x128xf32> to vector<16x125xf32>
    %610 = tpu.concatenate %42, %609 in 1 : vector<16x3xf32>, vector<16x125xf32> -> vector<16x128xf32>
    %611 = vector.broadcast %48 : vector<1x128xf32> to vector<16x128xf32>
    %612 = arith.addf %610, %611 : vector<16x128xf32>
    %613 = arith.minimumf %608, %612 : vector<16x128xf32>
    %614 = vector.extract_strided_slice %599 {offsets = [0, 0], sizes = [16, 127], strides = [1, 1]} : vector<16x128xf32> to vector<16x127xf32>
    %615 = tpu.concatenate %41, %614 in 1 : vector<16x1xf32>, vector<16x127xf32> -> vector<16x128xf32>
    %616 = vector.broadcast %49 : vector<1x128xf32> to vector<16x128xf32>
    %617 = arith.addf %615, %616 : vector<16x128xf32>
    %618 = arith.minimumf %613, %617 : vector<16x128xf32>
    %619 = vector.extract_strided_slice %599 {offsets = [0, 1], sizes = [16, 127], strides = [1, 1]} : vector<16x128xf32> to vector<16x127xf32>
    %620 = tpu.concatenate %619, %41 in 1 : vector<16x127xf32>, vector<16x1xf32> -> vector<16x128xf32>
    %621 = vector.broadcast %50 : vector<1x128xf32> to vector<16x128xf32>
    %622 = arith.addf %620, %621 : vector<16x128xf32>
    %623 = arith.minimumf %618, %622 : vector<16x128xf32>
    %624 = vector.extract_strided_slice %599 {offsets = [0, 3], sizes = [16, 125], strides = [1, 1]} : vector<16x128xf32> to vector<16x125xf32>
    %625 = tpu.concatenate %624, %42 in 1 : vector<16x125xf32>, vector<16x3xf32> -> vector<16x128xf32>
    %626 = vector.broadcast %51 : vector<1x128xf32> to vector<16x128xf32>
    %627 = arith.addf %625, %626 : vector<16x128xf32>
    %628 = arith.minimumf %623, %627 : vector<16x128xf32>
    %629 = vector.extract_strided_slice %599 {offsets = [0, 4], sizes = [16, 124], strides = [1, 1]} : vector<16x128xf32> to vector<16x124xf32>
    %630 = tpu.concatenate %629, %43 in 1 : vector<16x124xf32>, vector<16x4xf32> -> vector<16x128xf32>
    %631 = vector.broadcast %52 : vector<1x128xf32> to vector<16x128xf32>
    %632 = arith.addf %630, %631 : vector<16x128xf32>
    %633 = arith.minimumf %628, %632 : vector<16x128xf32>
    %634 = vector.extract_strided_slice %599 {offsets = [0, 5], sizes = [16, 123], strides = [1, 1]} : vector<16x128xf32> to vector<16x123xf32>
    %635 = tpu.concatenate %634, %44 in 1 : vector<16x123xf32>, vector<16x5xf32> -> vector<16x128xf32>
    %636 = vector.broadcast %53 : vector<1x128xf32> to vector<16x128xf32>
    %637 = arith.addf %635, %636 : vector<16x128xf32>
    %638 = arith.minimumf %633, %637 : vector<16x128xf32>
    %639 = arith.addf %20, %638 : vector<16x128xf32>
    %640 = arith.minimumf %599, %639 : vector<16x128xf32>
    %641 = arith.select %32, %40, %640 : vector<16x128xi1>, vector<16x128xf32>
    %c14_i32 = arith.constant 14 : i32
    %642 = vector.extract_strided_slice %641 {offsets = [0, 0], sizes = [16, 123], strides = [1, 1]} : vector<16x128xf32> to vector<16x123xf32>
    %643 = tpu.concatenate %44, %642 in 1 : vector<16x5xf32>, vector<16x123xf32> -> vector<16x128xf32>
    %644 = vector.broadcast %46 : vector<1x128xf32> to vector<16x128xf32>
    %645 = arith.addf %643, %644 : vector<16x128xf32>
    %646 = vector.extract_strided_slice %641 {offsets = [0, 0], sizes = [16, 124], strides = [1, 1]} : vector<16x128xf32> to vector<16x124xf32>
    %647 = tpu.concatenate %43, %646 in 1 : vector<16x4xf32>, vector<16x124xf32> -> vector<16x128xf32>
    %648 = vector.broadcast %47 : vector<1x128xf32> to vector<16x128xf32>
    %649 = arith.addf %647, %648 : vector<16x128xf32>
    %650 = arith.minimumf %645, %649 : vector<16x128xf32>
    %651 = vector.extract_strided_slice %641 {offsets = [0, 0], sizes = [16, 125], strides = [1, 1]} : vector<16x128xf32> to vector<16x125xf32>
    %652 = tpu.concatenate %42, %651 in 1 : vector<16x3xf32>, vector<16x125xf32> -> vector<16x128xf32>
    %653 = vector.broadcast %48 : vector<1x128xf32> to vector<16x128xf32>
    %654 = arith.addf %652, %653 : vector<16x128xf32>
    %655 = arith.minimumf %650, %654 : vector<16x128xf32>
    %656 = vector.extract_strided_slice %641 {offsets = [0, 0], sizes = [16, 127], strides = [1, 1]} : vector<16x128xf32> to vector<16x127xf32>
    %657 = tpu.concatenate %41, %656 in 1 : vector<16x1xf32>, vector<16x127xf32> -> vector<16x128xf32>
    %658 = vector.broadcast %49 : vector<1x128xf32> to vector<16x128xf32>
    %659 = arith.addf %657, %658 : vector<16x128xf32>
    %660 = arith.minimumf %655, %659 : vector<16x128xf32>
    %661 = vector.extract_strided_slice %641 {offsets = [0, 1], sizes = [16, 127], strides = [1, 1]} : vector<16x128xf32> to vector<16x127xf32>
    %662 = tpu.concatenate %661, %41 in 1 : vector<16x127xf32>, vector<16x1xf32> -> vector<16x128xf32>
    %663 = vector.broadcast %50 : vector<1x128xf32> to vector<16x128xf32>
    %664 = arith.addf %662, %663 : vector<16x128xf32>
    %665 = arith.minimumf %660, %664 : vector<16x128xf32>
    %666 = vector.extract_strided_slice %641 {offsets = [0, 3], sizes = [16, 125], strides = [1, 1]} : vector<16x128xf32> to vector<16x125xf32>
    %667 = tpu.concatenate %666, %42 in 1 : vector<16x125xf32>, vector<16x3xf32> -> vector<16x128xf32>
    %668 = vector.broadcast %51 : vector<1x128xf32> to vector<16x128xf32>
    %669 = arith.addf %667, %668 : vector<16x128xf32>
    %670 = arith.minimumf %665, %669 : vector<16x128xf32>
    %671 = vector.extract_strided_slice %641 {offsets = [0, 4], sizes = [16, 124], strides = [1, 1]} : vector<16x128xf32> to vector<16x124xf32>
    %672 = tpu.concatenate %671, %43 in 1 : vector<16x124xf32>, vector<16x4xf32> -> vector<16x128xf32>
    %673 = vector.broadcast %52 : vector<1x128xf32> to vector<16x128xf32>
    %674 = arith.addf %672, %673 : vector<16x128xf32>
    %675 = arith.minimumf %670, %674 : vector<16x128xf32>
    %676 = vector.extract_strided_slice %641 {offsets = [0, 5], sizes = [16, 123], strides = [1, 1]} : vector<16x128xf32> to vector<16x123xf32>
    %677 = tpu.concatenate %676, %44 in 1 : vector<16x123xf32>, vector<16x5xf32> -> vector<16x128xf32>
    %678 = vector.broadcast %53 : vector<1x128xf32> to vector<16x128xf32>
    %679 = arith.addf %677, %678 : vector<16x128xf32>
    %680 = arith.minimumf %675, %679 : vector<16x128xf32>
    %681 = arith.addf %20, %680 : vector<16x128xf32>
    %682 = arith.minimumf %641, %681 : vector<16x128xf32>
    %683 = arith.select %32, %40, %682 : vector<16x128xi1>, vector<16x128xf32>
    %c15_i32_24 = arith.constant 15 : i32
    %684 = vector.extract_strided_slice %683 {offsets = [0, 0], sizes = [16, 123], strides = [1, 1]} : vector<16x128xf32> to vector<16x123xf32>
    %685 = tpu.concatenate %44, %684 in 1 : vector<16x5xf32>, vector<16x123xf32> -> vector<16x128xf32>
    %686 = vector.broadcast %46 : vector<1x128xf32> to vector<16x128xf32>
    %687 = arith.addf %685, %686 : vector<16x128xf32>
    %688 = vector.extract_strided_slice %683 {offsets = [0, 0], sizes = [16, 124], strides = [1, 1]} : vector<16x128xf32> to vector<16x124xf32>
    %689 = tpu.concatenate %43, %688 in 1 : vector<16x4xf32>, vector<16x124xf32> -> vector<16x128xf32>
    %690 = vector.broadcast %47 : vector<1x128xf32> to vector<16x128xf32>
    %691 = arith.addf %689, %690 : vector<16x128xf32>
    %692 = arith.minimumf %687, %691 : vector<16x128xf32>
    %693 = vector.extract_strided_slice %683 {offsets = [0, 0], sizes = [16, 125], strides = [1, 1]} : vector<16x128xf32> to vector<16x125xf32>
    %694 = tpu.concatenate %42, %693 in 1 : vector<16x3xf32>, vector<16x125xf32> -> vector<16x128xf32>
    %695 = vector.broadcast %48 : vector<1x128xf32> to vector<16x128xf32>
    %696 = arith.addf %694, %695 : vector<16x128xf32>
    %697 = arith.minimumf %692, %696 : vector<16x128xf32>
    %698 = vector.extract_strided_slice %683 {offsets = [0, 0], sizes = [16, 127], strides = [1, 1]} : vector<16x128xf32> to vector<16x127xf32>
    %699 = tpu.concatenate %41, %698 in 1 : vector<16x1xf32>, vector<16x127xf32> -> vector<16x128xf32>
    %700 = vector.broadcast %49 : vector<1x128xf32> to vector<16x128xf32>
    %701 = arith.addf %699, %700 : vector<16x128xf32>
    %702 = arith.minimumf %697, %701 : vector<16x128xf32>
    %703 = vector.extract_strided_slice %683 {offsets = [0, 1], sizes = [16, 127], strides = [1, 1]} : vector<16x128xf32> to vector<16x127xf32>
    %704 = tpu.concatenate %703, %41 in 1 : vector<16x127xf32>, vector<16x1xf32> -> vector<16x128xf32>
    %705 = vector.broadcast %50 : vector<1x128xf32> to vector<16x128xf32>
    %706 = arith.addf %704, %705 : vector<16x128xf32>
    %707 = arith.minimumf %702, %706 : vector<16x128xf32>
    %708 = vector.extract_strided_slice %683 {offsets = [0, 3], sizes = [16, 125], strides = [1, 1]} : vector<16x128xf32> to vector<16x125xf32>
    %709 = tpu.concatenate %708, %42 in 1 : vector<16x125xf32>, vector<16x3xf32> -> vector<16x128xf32>
    %710 = vector.broadcast %51 : vector<1x128xf32> to vector<16x128xf32>
    %711 = arith.addf %709, %710 : vector<16x128xf32>
    %712 = arith.minimumf %707, %711 : vector<16x128xf32>
    %713 = vector.extract_strided_slice %683 {offsets = [0, 4], sizes = [16, 124], strides = [1, 1]} : vector<16x128xf32> to vector<16x124xf32>
    %714 = tpu.concatenate %713, %43 in 1 : vector<16x124xf32>, vector<16x4xf32> -> vector<16x128xf32>
    %715 = vector.broadcast %52 : vector<1x128xf32> to vector<16x128xf32>
    %716 = arith.addf %714, %715 : vector<16x128xf32>
    %717 = arith.minimumf %712, %716 : vector<16x128xf32>
    %718 = vector.extract_strided_slice %683 {offsets = [0, 5], sizes = [16, 123], strides = [1, 1]} : vector<16x128xf32> to vector<16x123xf32>
    %719 = tpu.concatenate %718, %44 in 1 : vector<16x123xf32>, vector<16x5xf32> -> vector<16x128xf32>
    %720 = vector.broadcast %53 : vector<1x128xf32> to vector<16x128xf32>
    %721 = arith.addf %719, %720 : vector<16x128xf32>
    %722 = arith.minimumf %717, %721 : vector<16x128xf32>
    %723 = arith.addf %20, %722 : vector<16x128xf32>
    %724 = arith.minimumf %683, %723 : vector<16x128xf32>
    %725 = arith.select %32, %40, %724 : vector<16x128xi1>, vector<16x128xf32>
    %726 = vector.extract_strided_slice %725 {offsets = [0, 0], sizes = [8, 128], strides = [1, 1]} : vector<16x128xf32> to vector<8x128xf32>
    %727 = vector.extract_strided_slice %725 {offsets = [8, 0], sizes = [8, 128], strides = [1, 1]} : vector<16x128xf32> to vector<8x128xf32>
    %728 = tpu.iota {dimensions = array<i32: 1>} : vector<8x128xi32>
    %c15_i32_25 = arith.constant 15 : i32
    %729 = vector.broadcast %c15_i32_25 : i32 to vector<8x128xi32>
    %730 = arith.cmpi eq, %728, %729 : vector<8x128xi32>
    %cst_26 = arith.constant 0.000000e+00 : f32
    %731 = vector.broadcast %cst_26 : f32 to vector<8x128xf32>
    %732 = arith.select %730, %726, %731 : vector<8x128xi1>, vector<8x128xf32>
    %cst_27 = arith.constant dense<0.000000e+00> : vector<8xf32>
    %733 = vector.multi_reduction <add>, %732, %cst_27 [1] : vector<8x128xf32> to vector<8xf32>
    %734 = vector.shape_cast %733 : vector<8xf32> to vector<8x1xf32>
    %735 = arith.addf %726, %727 : vector<8x128xf32>
    %736 = arith.subf %735, %19 : vector<8x128xf32>
    %cst_28 = arith.constant 1.000000e-03 : f32
    %737 = vector.broadcast %cst_28 : f32 to vector<8x1xf32>
    %738 = arith.addf %734, %737 : vector<8x1xf32>
    %739 = vector.broadcast %738 : vector<8x1xf32> to vector<8x128xf32>
    %740 = arith.cmpf ole, %736, %739 : vector<8x128xf32>
    %741 = arith.extui %740 : vector<8x128xi1> to vector<8x128xi32>
    %742 = arith.sitofp %741 : vector<8x128xi32> to vector<8x128xf32>
    %c0_29 = arith.constant 0 : index
    %c0_30 = arith.constant 0 : index
    %743 = vector.load %arg7[%c0_29, %c0_30] : memref<8x128xf32, #tpu.memory_space<vmem>>, vector<8x128xf32>
    tpu.vector_store %arg7[%c0_29, %c0_30], %742 {strides = array<i32>} : memref<8x128xf32, #tpu.memory_space<vmem>>, vector<8x128xf32>,
    return
  }
  func.func @transform_0(%arg0: i32) -> (i32, i32) {
    %c0_i32 = arith.constant 0 : i32
    %c0_i32_0 = arith.constant 0 : i32
    return %arg0, %c0_i32 : i32, i32
  }
  func.func @transform_1(%arg0: i32) -> (i32, i32) {
    %c0_i32 = arith.constant 0 : i32
    %c0_i32_0 = arith.constant 0 : i32
    %c0_i32_1 = arith.constant 0 : i32
    return %c0_i32, %c0_i32_0 : i32, i32
  }
  func.func @transform_2(%arg0: i32) -> (i32, i32) {
    %c0_i32 = arith.constant 0 : i32
    %c0_i32_0 = arith.constant 0 : i32
    %c0_i32_1 = arith.constant 0 : i32
    return %c0_i32, %c0_i32_0 : i32, i32
  }
  func.func @transform_3(%arg0: i32) -> (i32, i32) {
    %c0_i32 = arith.constant 0 : i32
    %c0_i32_0 = arith.constant 0 : i32
    %c0_i32_1 = arith.constant 0 : i32
    return %c0_i32, %c0_i32_0 : i32, i32
  }
  func.func @transform_4(%arg0: i32) -> (i32, i32) {
    %c0_i32 = arith.constant 0 : i32
    %c0_i32_0 = arith.constant 0 : i32
    %c0_i32_1 = arith.constant 0 : i32
    return %c0_i32, %c0_i32_0 : i32, i32
  }
  func.func @transform_5(%arg0: i32) -> (i32, i32) {
    %c0_i32 = arith.constant 0 : i32
    %c0_i32_0 = arith.constant 0 : i32
    %c0_i32_1 = arith.constant 0 : i32
    return %c0_i32, %c0_i32_0 : i32, i32
  }
  func.func @transform_6(%arg0: i32) -> (i32, i32) {
    %c0_i32 = arith.constant 0 : i32
    %c0_i32_0 = arith.constant 0 : i32
    return %arg0, %c0_i32 : i32, i32
  }
}

</mosaic_0001>

<bundles_post_ra>
// kernel: tpu_custom_call.1
= control target key start
LH: loop header
LB: loop body
LE: loop exit
PB: predicated region body
PF: predicated region fallthrough
CT: control target
= control target key end

     0   :  { %11 = vsyncpa [#allocation3], 0  ;;  %s3352_s0 = inlined_call_operand.hbm [shape: f32[8,8], index: 0, kind: input, shape index: {}]   ;;  %s3353_s1 = inlined_call_operand.hbm [shape: f32[8,16], index: 1, kind: input, shape index: {}]   ;;  %s3354_s2 = inlined_call_operand.vmem [shape: f32[1,16], index: 2, kind: input, shape index: {}]   ;;  %s3355_s3 = inlined_call_operand.hbm [shape: f32[16,128], index: 3, kind: input, shape index: {}]   ;;  %s3356_s4 = inlined_call_operand.vmem [shape: f32[1,128], index: 4, kind: input, shape index: {}]   ;;  %s3357_s5 = inlined_call_operand.hbm [shape: f32[8,128], index: 5, kind: input, shape index: {}]   ;;  %s3358_s6 = inlined_call_operand.hbm [shape: f32[8,128], index: 6, kind: output, shape index: {}]  }
   0x1   :  { %12 = vsyncpa [#allocation6], 0 }
   0x2   :  { %13 = vsyncpa [#allocation9], 0  ;;  %s31_s23 = sshll.u32 %s3353_s1, 4  ;;  %s32_s23 = int_to_ptr.hbm [resolvable:$true] %s31_s23 }
   0x3   :  { %14 = vsyncpa [#allocation4], 0  ;;  %s1991_s24 = smov [#allocation5]   ;;  %s20_s28 = sshll.u32 %s3352_s0, 4  ;;  %s21_s28 = int_to_ptr.hbm [resolvable:$true] %s20_s28 }
   0x4   :  { %s33_s25 = sshll.u32 %s1991_s24, 4  ;;  %s1992_s29 = smov [#allocation2]   ;;  %s34_s25 = int_to_ptr.vmem [resolvable:$true] %s33_s25 }
   0x5   :  { %36 = dma.hbm_to_vmem [thread:$0]  %s32_s23, 128, %s34_s25, [#allocation6]  }
   0x6   :  { %s22_s30 = sshll.u32 %s1992_s29, 4  ;;  %s43_s9 = sshll.u32 %s3355_s3, 4  ;;  %s23_s30 = int_to_ptr.vmem [resolvable:$true] %s22_s30  ;;  %s44_s9 = int_to_ptr.hbm [resolvable:$true] %s43_s9 }
   0x7   :  { %25 = dma.hbm_to_vmem [thread:$0]  %s21_s28, 128, %s23_s30, [#allocation3]  }
   0x8   :  { %s1993_s1 = smov [#allocation7]   ;;  %s59_s13 = sshll.u32 %s3357_s5, 4  ;;  %s60_s13 = int_to_ptr.hbm [resolvable:$true] %s59_s13 }
   0x9   :  { %s45_s10 = sshll.u32 %s1993_s1, 4  ;;  %s1994_s14 = smov 128   ;;  %s46_s10 = int_to_ptr.vmem [resolvable:$true] %s45_s10 }
   0xa   :  { %s1995_s0 = smov 8   ;;  %s1996_s15 = smov [#allocation8]  }
   0xb   :  { %51 = dma.hbm_to_vmem [thread:$0]  %s44_s9, 256, %s46_s10, [#allocation6], %s1994_s14, %s1994_s14, %s1995_s0  }
   0xc   :  { %s61_s16 = sshll.u32 %s1996_s15, 4  ;;  %s62_s16 = int_to_ptr.vmem [resolvable:$true] %s61_s16 }
   0xd   :  { %64 = dma.hbm_to_vmem [thread:$0]  %s60_s13, 128, %s62_s16, [#allocation9]  }
   0xe   :  { %1983 = dma.done.wait [#allocation3], 128  }
   0xf   :  { %1984 = vsyncadd [#allocation3], 4294967168 }
  0x10   :  { %1985 = dma.done.wait [#allocation6], 384  }
  0x11   :  { %1986 = vsyncadd [#allocation6], 4294966912 }
  0x12   :  { %1987 = dma.done.wait [#allocation9], 128  }
  0x13   :  { %1988 = vsyncadd [#allocation9], 4294967168  ;;  %v84_v0 = vld [vmem:[#allocation5] sm:$0xff]  ;;  %vm94_vm0 = vcmask 1043456   ;;  %v82_v1 = vld [vmem:[#allocation2] sm:$0xff]  ;;  %vm90_vm1 = vcmask 64512   ;;  %v142_v15 = vlaneseq }
  0x14   :  { %v85_v2 = vpack.c.bf16 %v84_v0, %v84_v0  ;;  %v83_v4 = vpack.c.bf16 %v82_v1, %v82_v1  ;;  %v115_v5 = vld [vmem:[#allocation7] sm:$0xff]  ;;  %v116_v6 = vld [vmem:[#allocation7 + $0x8] sm:$0xff]  ;;  %v1862_v8 = vld [vmem:[%s3354_s2] ss:$0 sm:$0xff]  ;;  %vm122_vm3 = vcmask 130048   ;;  %s1997_s2 = smov 127  }
  0x15   :  { %v117_v7 = vpack.c.bf16 %v116_v6, %v115_v5  ;;  %v2057_v16 = vand.u32 127, %v142_v15  ;;  %v1861_v17 = vld [vmem:[%s3356_s4] ss:$0 sm:$0xff]  ;;  %s1998_s4 = smov 3   ;;  %s1999_s19 = smov 5   ;;  %vm173_vm6 = vcmask 39936  }
  0x16   :  { %v96_v3 = vsel %vm94_vm0, %v85_v2, 0  ;;  %s2000_s20 = smov 1   ;;  %s2001_s21 = smov 4   ;;  %v164_v30 = vld [vmem:[#allocation8] sm:$0xff]  ;;  %vm199_vm7 = vcmask 23552   ;;  %vm185_vm8 = vcmask 31744  }
  0x17   :  { %105 = vmatpush.bf16.msra.mxu0 %v96_v3  ;;  %133 = vmatpush.bf16.msra.mxu1 %v117_v7  ;;  %vm146_vm4 = vcmp.eq.s32.totalorder %v2057_v16, 0  ;;  %vm151_vm5 = vcmp.eq.s32.totalorder %v2057_v16, 15  ;;  %s2002_s22 = smov 124   ;;  %s2003_s23 = smov 125   ;;  %v2118_v31 = vperm.slane %v164_v30, 0  ;;  %v2120_v32 = vperm.slane %v164_v30, 1 }
  0x18   :  { %s2004_s24 = smov 123   ;;  %v2123_v34 = vperm.slane %v164_v30, 2  ;;  %vm213_vm9 = vcmask 7168   ;;  %v2127_v39 = vperm.slane %v164_v30, 3  ;;  %vm227_vm10 = vcmask 1039360   ;;  %s2005_s25 = smov [#allocation10]  }
  0x19   :  { %v2132_v44 = vperm.slane %v164_v30, 4  ;;  %v2136_v48 = vperm.slane %v164_v30, 5  ;;  %vm241_vm11 = vcmask 1022976   ;;  %vm255_vm12 = vcmask 1014784   ;;  %s1828_s26 = sshll.u32 %s2005_s25, 4  ;;  %s1830_s29 = sshll.u32 %s3358_s6, 4  ;;  %s1829_s26 = int_to_ptr.vmem [resolvable:$true] %s1828_s26  ;;  %s1831_s29 = int_to_ptr.hbm [resolvable:$true] %s1830_s29 }
  0x1a   :  { %1842 = vmatmul.msk.bf16.vlgmr.msra.gmra.mxu0 %vm90_vm1, %v83_v4  ;;  %v2142_v58 = vperm.slane %v164_v30, 6  ;;  %v2145_v60 = vperm.slane %v164_v30, 7  ;;  %vm269_vm13 = vcmask 1006592  }
  0x97   :  { %v107_v9 = vpop.f32.mrf.mxu0 }
  0x98   :  { %v108_v10 = vadd.f32 %v1862_v8, %v107_v9 }
  0x9a   :  { %vm111_vm2 = vcmp.ge.f32.partialorder %v108_v10, 0.0  ;;  %v112_v11 = vmul.f32 0.1, %v108_v10 }
  0x9c   :  { %v113_v12 = vsel %vm111_vm2, %v108_v10, %v112_v11 }
  0x9d   :  { %v114_v13 = vpack.c.bf16 %v113_v12, %v113_v12 }
  0x9f   :  { %v109_v14 = vpop.f32.mrf.mxu0  ;;  %1843 = vmatmul.msk.bf16.vlgmr.msra.gmra.mxu1 %vm122_vm3, %v114_v13 }
 0x11c   :  { %v135_v18 = vpop.f32.mrf.mxu1 }
 0x11d   :  { %v2063_v19 = vadd.f32 %v1861_v17, %v135_v18 }
 0x11f   :  { %v156_v20 = vsel %vm146_vm4, %v2063_v19, 0.0  ;;  %v157_v22 = vsel %vm151_vm5, %v2063_v19, 0.0 }
 0x120   :  { %158 = vadd.xlane.f32.xlu0 %v156_v20 }
 0x124   :  { %v137_v21 = vpop.f32.mrf.mxu1 }
 0x128   :  { %160 = vadd.xlane.f32.xlu0 %v157_v22 }
 0x193   :  { %v2072_v23 = vpop.xlane.xlu0 %158 }
 0x194   :  { %v2077_v24 = vsel %vm146_vm4, %v2072_v23, 1e+09 }
 0x195   :  { %221 = vrot.lane.b32.xlu0 %v2077_v24, %s1997_s2  ;;  %193 = vrot.lane.b32.xlu2 %v2077_v24, %s1998_s4 }
 0x196   :  { %167 = vrot.lane.b32.xlu1 %v2077_v24, %s1999_s19 }
 0x19b   :  { %v2085_v25 = vpop.xlane.xlu0 %160 }
 0x19c   :  { %v2090_v26 = vsel %vm151_vm5, %v2085_v25, 1e+09 }
 0x19d   :  { %207 = vrot.lane.b32.xlu2 %v2077_v24, %s2000_s20  ;;  %209 = vrot.lane.b32.xlu0 %v2090_v26, %s2000_s20 }
 0x19e   :  { %179 = vrot.lane.b32.xlu1 %v2077_v24, %s2001_s21 }
 0x1a5   :  { %249 = vrot.lane.b32.xlu2 %v2077_v24, %s2002_s22  ;;  %251 = vrot.lane.b32.xlu0 %v2090_v26, %s2002_s22 }
 0x1a6   :  { %235 = vrot.lane.b32.xlu1 %v2077_v24, %s2003_s23 }
 0x1ad   :  { %169 = vrot.lane.b32.xlu2 %v2090_v26, %s1999_s19 }
 0x1ae   :  { %263 = vrot.lane.b32.xlu1 %v2077_v24, %s2004_s24 }
 0x1b5   :  { %195 = vrot.lane.b32.xlu2 %v2090_v26, %s1998_s4 }
 0x1b6   :  { %181 = vrot.lane.b32.xlu1 %v2090_v26, %s2001_s21 }
 0x1bd   :  { %237 = vrot.lane.b32.xlu2 %v2090_v26, %s2003_s23 }
 0x1be   :  { %223 = vrot.lane.b32.xlu1 %v2090_v26, %s1997_s2 }
 0x1c6   :  { %265 = vrot.lane.b32.xlu1 %v2090_v26, %s2004_s24 }
 0x1ef   :  { %v194_v27 = vpop.permute.xlu2 %193 }
 0x1f0   :  { %v200_v37 = vsel %vm199_vm7, 1e+09, %v194_v27 }
 0x1f1   :  { %v203_v45 = vadd.f32 %v2123_v34, %v200_v37 }
 0x1f7   :  { %v208_v28 = vpop.permute.xlu2 %207 }
 0x1f8   :  { %v214_v43 = vsel %vm213_vm9, 1e+09, %v208_v28 }
 0x1f9   :  { %v217_v49 = vadd.f32 %v2127_v39, %v214_v43 }
 0x1ff   :  { %v250_v35 = vpop.permute.xlu2 %249 }
 0x200   :  { %v256_v59 = vsel %vm255_vm12, %v250_v35, 1e+09 }
 0x201   :  { %v259_v62 = vadd.f32 %v2142_v58, %v256_v59 }
 0x207   :  { %v222_v41 = vpop.permute.xlu0 %221  ;;  %v170_v55 = vpop.permute.xlu2 %169 }
 0x208   :  { %v168_v29 = vpop.permute.xlu1 %167  ;;  %v228_v47 = vsel %vm227_vm10, %v222_v41, 1e+09  ;;  %v175_v6 = vsel %vm173_vm6, 1e+09, %v170_v55 }
 0x209   :  { %v174_v33 = vsel %vm173_vm6, 1e+09, %v168_v29  ;;  %v231_v51 = vadd.f32 %v2132_v44, %v228_v47  ;;  %v178_v12 = vadd.f32 %v2118_v31, %v175_v6 }
 0x20a   :  { %v177_v40 = vadd.f32 %v2118_v31, %v174_v33 }
 0x20f   :  { %v196_v3 = vpop.permute.xlu2 %195  ;;  %v210_v7 = vpop.permute.xlu0 %209 }
 0x210   :  { %v180_v36 = vpop.permute.xlu1 %179  ;;  %v201_v10 = vsel %vm199_vm7, 1e+09, %v196_v3  ;;  %v215_v18 = vsel %vm213_vm9, 1e+09, %v210_v7 }
 0x211   :  { %v186_v38 = vsel %vm185_vm8, 1e+09, %v180_v36  ;;  %v204_v15 = vadd.f32 %v2123_v34, %v201_v10  ;;  %v218_v22 = vadd.f32 %v2127_v39, %v215_v18 }
 0x212   :  { %v189_v42 = vadd.f32 %v2120_v32, %v186_v38 }
 0x214   :  { %v191_v46 = vmin.f32 %v177_v40, %v189_v42 }
 0x216   :  { %v205_v50 = vmin.f32 %v191_v46, %v203_v45 }
 0x217   :  { %v238_v20 = vpop.permute.xlu2 %237  ;;  %v252_v29 = vpop.permute.xlu0 %251 }
 0x218   :  { %v219_v52 = vmin.f32 %v205_v50, %v217_v49  ;;  %v236_v53 = vpop.permute.xlu1 %235  ;;  %v243_v27 = vsel %vm241_vm11, %v238_v20, 1e+09  ;;  %v257_v37 = vsel %vm255_vm12, %v252_v29, 1e+09 }
 0x219   :  { %v242_v54 = vsel %vm241_vm11, %v236_v53, 1e+09  ;;  %v246_v35 = vadd.f32 %v2136_v48, %v243_v27  ;;  %v260_v40 = vadd.f32 %v2142_v58, %v257_v37 }
 0x21a   :  { %v233_v56 = vmin.f32 %v219_v52, %v231_v51  ;;  %v245_v57 = vadd.f32 %v2136_v48, %v242_v54 }
 0x21c   :  { %v247_v61 = vmin.f32 %v233_v56, %v245_v57 }
 0x21e   :  { %v261_v1 = vmin.f32 %v247_v61, %v259_v62 }
 0x220   :  { %v264_v63 = vpop.permute.xlu1 %263 }
 0x221   :  { %v270_v0 = vsel %vm269_vm13, %v264_v63, 1e+09 }
 0x222   :  { %v273_v2 = vadd.f32 %v2145_v60, %v270_v0 }
 0x224   :  { %v275_v4 = vmin.f32 %v261_v1, %v273_v2 }
 0x226   :  { %v277_v5 = vadd.f32 %v275_v4, %v2063_v19 }
 0x228   :  { %v279_v8 = vmin.f32 %v2077_v24, %v277_v5  ;;  %v182_v9 = vpop.permute.xlu1 %181 }
 0x229   :  { %v187_v11 = vsel %vm185_vm8, 1e+09, %v182_v9 }
 0x22a   :  { %v2159_v13 = vsel %vm146_vm4, %v2072_v23, %v279_v8  ;;  %v190_v14 = vadd.f32 %v2120_v32, %v187_v11 }
 0x22b   :  { %307 = vrot.lane.b32.xlu1 %v2159_v13, %s1998_s4  ;;  %295 = vrot.lane.b32.xlu0 %v2159_v13, %s2001_s21 }
 0x22c   :  { %v192_v17 = vmin.f32 %v178_v12, %v190_v14  ;;  %285 = vrot.lane.b32.xlu2 %v2159_v13, %s1999_s19 }
 0x22e   :  { %v206_v21 = vmin.f32 %v192_v17, %v204_v15 }
 0x230   :  { %v224_v24 = vpop.permute.xlu1 %223  ;;  %v220_v30 = vmin.f32 %v206_v21, %v218_v22 }
 0x231   :  { %v229_v28 = vsel %vm227_vm10, %v224_v24, 1e+09 }
 0x232   :  { %v232_v33 = vadd.f32 %v2132_v44, %v229_v28 }
 0x233   :  { %343 = vrot.lane.b32.xlu1 %v2159_v13, %s2003_s23  ;;  %331 = vrot.lane.b32.xlu0 %v2159_v13, %s1997_s2 }
 0x234   :  { %v234_v36 = vmin.f32 %v220_v30, %v232_v33  ;;  %319 = vrot.lane.b32.xlu2 %v2159_v13, %s2000_s20 }
 0x236   :  { %v248_v38 = vmin.f32 %v234_v36, %v246_v35 }
 0x238   :  { %v266_v41 = vpop.permute.xlu1 %265  ;;  %v262_v43 = vmin.f32 %v248_v38, %v260_v40 }
 0x239   :  { %v271_v42 = vsel %vm269_vm13, %v266_v41, 1e+09 }
 0x23a   :  { %v274_v45 = vadd.f32 %v2145_v60, %v271_v42 }
 0x23b   :  { %367 = vrot.lane.b32.xlu0 %v2159_v13, %s2004_s24 }
 0x23c   :  { %v276_v46 = vmin.f32 %v262_v43, %v274_v45  ;;  %355 = vrot.lane.b32.xlu2 %v2159_v13, %s2002_s22 }
 0x23e   :  { %v278_v47 = vadd.f32 %v276_v46, %v2063_v19 }
 0x240   :  { %v280_v49 = vmin.f32 %v2090_v26, %v278_v47 }
 0x242   :  { %v2194_v50 = vsel %vm151_vm5, %v2085_v25, %v280_v49 }
 0x243   :  { %309 = vrot.lane.b32.xlu0 %v2194_v50, %s1998_s4  ;;  %287 = vrot.lane.b32.xlu1 %v2194_v50, %s1999_s19 }
 0x244   :  { %297 = vrot.lane.b32.xlu2 %v2194_v50, %s2001_s21 }
 0x24b   :  { %345 = vrot.lane.b32.xlu0 %v2194_v50, %s2003_s23  ;;  %321 = vrot.lane.b32.xlu1 %v2194_v50, %s2000_s20 }
 0x24c   :  { %333 = vrot.lane.b32.xlu2 %v2194_v50, %s1997_s2 }
 0x253   :  { %357 = vrot.lane.b32.xlu1 %v2194_v50, %s2002_s22 }
 0x254   :  { %369 = vrot.lane.b32.xlu2 %v2194_v50, %s2004_s24 }
 0x286   :  { %v286_v26 = vpop.permute.xlu2 %285 }
 0x287   :  { %v291_v52 = vsel %vm173_vm6, 1e+09, %v286_v26 }
 0x288   :  { %v293_v57 = vadd.f32 %v291_v52, %v2118_v31 }
 0x28e   :  { %v320_v51 = vpop.permute.xlu2 %319 }
 0x28f   :  { %v325_v63 = vsel %vm213_vm9, 1e+09, %v320_v51 }
 0x290   :  { %v327_v2 = vadd.f32 %v325_v63, %v2127_v39 }
 0x296   :  { %v356_v1 = vpop.permute.xlu2 %355 }
 0x297   :  { %v361_v11 = vsel %vm255_vm12, %v356_v1, 1e+09 }
 0x298   :  { %v363_v14 = vadd.f32 %v361_v11, %v2142_v58 }
 0x29d   :  { %v308_v53 = vpop.permute.xlu1 %307  ;;  %v296_v54 = vpop.permute.xlu0 %295 }
 0x29e   :  { %v313_v55 = vsel %vm199_vm7, 1e+09, %v308_v53  ;;  %v301_v56 = vsel %vm185_vm8, 1e+09, %v296_v54  ;;  %v298_v18 = vpop.permute.xlu2 %297 }
 0x29f   :  { %v303_v59 = vadd.f32 %v301_v56, %v2120_v32  ;;  %v315_v61 = vadd.f32 %v313_v55, %v2123_v34  ;;  %v302_v30 = vsel %vm185_vm8, 1e+09, %v298_v18 }
 0x2a1   :  { %v305_v62 = vmin.f32 %v293_v57, %v303_v59 }
 0x2a3   :  { %v317_v0 = vmin.f32 %v305_v62, %v315_v61 }
 0x2a5   :  { %v344_v3 = vpop.permute.xlu1 %343  ;;  %v332_v4 = vpop.permute.xlu0 %331  ;;  %v329_v7 = vmin.f32 %v317_v0, %v327_v2 }
 0x2a6   :  { %v349_v5 = vsel %vm241_vm11, %v344_v3, 1e+09  ;;  %v337_v6 = vsel %vm227_vm10, %v332_v4, 1e+09  ;;  %v334_v37 = vpop.permute.xlu2 %333 }
 0x2a7   :  { %v339_v8 = vadd.f32 %v337_v6, %v2132_v44  ;;  %v351_v9 = vadd.f32 %v349_v5, %v2136_v48  ;;  %v338_v43 = vsel %vm227_vm10, %v334_v37, 1e+09 }
 0x2a8   :  { %v340_v26 = vadd.f32 %v338_v43, %v2132_v44 }
 0x2a9   :  { %v341_v10 = vmin.f32 %v329_v7, %v339_v8 }
 0x2ab   :  { %v353_v12 = vmin.f32 %v341_v10, %v351_v9 }
 0x2ad   :  { %v368_v15 = vpop.permute.xlu0 %367  ;;  %v365_v20 = vmin.f32 %v353_v12, %v363_v14 }
 0x2ae   :  { %v373_v17 = vsel %vm269_vm13, %v368_v15, 1e+09  ;;  %v370_v53 = vpop.permute.xlu2 %369 }
 0x2af   :  { %v375_v21 = vadd.f32 %v373_v17, %v2145_v60  ;;  %v374_v57 = vsel %vm269_vm13, %v370_v53, 1e+09 }
 0x2b0   :  { %v376_v63 = vadd.f32 %v374_v57, %v2145_v60 }
 0x2b1   :  { %v377_v22 = vmin.f32 %v365_v20, %v375_v21 }
 0x2b3   :  { %v379_v24 = vadd.f32 %v377_v22, %v2063_v19 }
 0x2b5   :  { %v381_v27 = vmin.f32 %v2159_v13, %v379_v24  ;;  %v288_v28 = vpop.permute.xlu1 %287  ;;  %v310_v29 = vpop.permute.xlu0 %309  ;;  %v304_v13 = vadd.f32 %v302_v30, %v2120_v32 }
 0x2b6   :  { %v292_v33 = vsel %vm173_vm6, 1e+09, %v288_v28  ;;  %v314_v38 = vsel %vm199_vm7, 1e+09, %v310_v29 }
 0x2b7   :  { %v2235_v35 = vsel %vm146_vm4, %v2072_v23, %v381_v27  ;;  %v294_v36 = vadd.f32 %v292_v33, %v2118_v31  ;;  %v316_v41 = vadd.f32 %v314_v38, %v2123_v34 }
 0x2b8   :  { %409 = vrot.lane.b32.xlu2 %v2235_v35, %s1998_s4  ;;  %397 = vrot.lane.b32.xlu1 %v2235_v35, %s2001_s21 }
 0x2b9   :  { %387 = vrot.lane.b32.xlu0 %v2235_v35, %s1999_s19  ;;  %v306_v40 = vmin.f32 %v294_v36, %v304_v13 }
 0x2bb   :  { %v318_v46 = vmin.f32 %v306_v40, %v316_v41 }
 0x2bd   :  { %v322_v42 = vpop.permute.xlu1 %321  ;;  %v346_v49 = vpop.permute.xlu0 %345 }
 0x2be   :  { %v326_v45 = vsel %vm213_vm9, 1e+09, %v322_v42  ;;  %v350_v52 = vsel %vm241_vm11, %v346_v49, 1e+09 }
 0x2bf   :  { %v328_v47 = vadd.f32 %v326_v45, %v2127_v39  ;;  %v352_v55 = vadd.f32 %v350_v52, %v2136_v48 }
 0x2c0   :  { %445 = vrot.lane.b32.xlu2 %v2235_v35, %s2003_s23  ;;  %433 = vrot.lane.b32.xlu1 %v2235_v35, %s1997_s2 }
 0x2c1   :  { %v330_v51 = vmin.f32 %v318_v46, %v328_v47  ;;  %421 = vrot.lane.b32.xlu0 %v2235_v35, %s2000_s20 }
 0x2c3   :  { %v342_v54 = vmin.f32 %v330_v51, %v340_v26 }
 0x2c5   :  { %v358_v56 = vpop.permute.xlu1 %357  ;;  %v354_v61 = vmin.f32 %v342_v54, %v352_v55 }
 0x2c6   :  { %v362_v59 = vsel %vm255_vm12, %v358_v56, 1e+09 }
 0x2c7   :  { %v364_v62 = vadd.f32 %v362_v59, %v2142_v58 }
 0x2c8   :  { %469 = vrot.lane.b32.xlu1 %v2235_v35, %s2004_s24 }
 0x2c9   :  { %v366_v0 = vmin.f32 %v354_v61, %v364_v62  ;;  %457 = vrot.lane.b32.xlu0 %v2235_v35, %s2002_s22 }
 0x2cb   :  { %v378_v1 = vmin.f32 %v366_v0, %v376_v63 }
 0x2cd   :  { %v380_v2 = vadd.f32 %v378_v1, %v2063_v19 }
 0x2cf   :  { %v382_v3 = vmin.f32 %v2194_v50, %v380_v2 }
 0x2d1   :  { %v2272_v4 = vsel %vm151_vm5, %v2085_v25, %v382_v3 }
 0x2d2   :  { %411 = vrot.lane.b32.xlu1 %v2272_v4, %s1998_s4  ;;  %399 = vrot.lane.b32.xlu0 %v2272_v4, %s2001_s21 }
 0x2d3   :  { %389 = vrot.lane.b32.xlu2 %v2272_v4, %s1999_s19 }
 0x2da   :  { %447 = vrot.lane.b32.xlu1 %v2272_v4, %s2003_s23  ;;  %435 = vrot.lane.b32.xlu0 %v2272_v4, %s1997_s2 }
 0x2db   :  { %423 = vrot.lane.b32.xlu2 %v2272_v4, %s2000_s20 }
 0x2e2   :  { %471 = vrot.lane.b32.xlu0 %v2272_v4, %s2004_s24 }
 0x2e3   :  { %459 = vrot.lane.b32.xlu2 %v2272_v4, %s2002_s22 }
 0x312   :  { %v410_v50 = vpop.permute.xlu2 %409 }
 0x313   :  { %v415_v11 = vsel %vm199_vm7, 1e+09, %v410_v50 }
 0x314   :  { %v417_v17 = vadd.f32 %v415_v11, %v2123_v34 }
 0x31a   :  { %v446_v12 = vpop.permute.xlu2 %445 }
 0x31b   :  { %v451_v29 = vsel %vm241_vm11, %v446_v12, 1e+09 }
 0x31c   :  { %v453_v13 = vadd.f32 %v451_v29, %v2136_v48 }
 0x32a   :  { %v398_v5 = vpop.permute.xlu1 %397 }
 0x32b   :  { %v403_v6 = vsel %vm185_vm8, 1e+09, %v398_v5  ;;  %v388_v7 = vpop.permute.xlu0 %387 }
 0x32c   :  { %v393_v8 = vsel %vm173_vm6, 1e+09, %v388_v7  ;;  %v405_v9 = vadd.f32 %v403_v6, %v2120_v32 }
 0x32d   :  { %v395_v10 = vadd.f32 %v393_v8, %v2118_v31  ;;  %v390_v30 = vpop.permute.xlu2 %389 }
 0x32e   :  { %v394_v47 = vsel %vm173_vm6, 1e+09, %v390_v30 }
 0x32f   :  { %v407_v14 = vmin.f32 %v395_v10, %v405_v9  ;;  %v396_v56 = vadd.f32 %v394_v47, %v2118_v31 }
 0x331   :  { %v419_v22 = vmin.f32 %v407_v14, %v417_v17 }
 0x332   :  { %v434_v15 = vpop.permute.xlu1 %433 }
 0x333   :  { %v422_v18 = vpop.permute.xlu0 %421  ;;  %v439_v20 = vsel %vm227_vm10, %v434_v15, 1e+09 }
 0x334   :  { %v427_v21 = vsel %vm213_vm9, 1e+09, %v422_v18  ;;  %v441_v27 = vadd.f32 %v439_v20, %v2132_v44 }
 0x335   :  { %v429_v24 = vadd.f32 %v427_v21, %v2127_v39  ;;  %v424_v49 = vpop.permute.xlu2 %423 }
 0x337   :  { %v431_v28 = vmin.f32 %v419_v22, %v429_v24 }
 0x339   :  { %v443_v33 = vmin.f32 %v431_v28, %v441_v27 }
 0x33a   :  { %v470_v36 = vpop.permute.xlu1 %469 }
 0x33b   :  { %v458_v37 = vpop.permute.xlu0 %457  ;;  %v475_v38 = vsel %vm269_vm13, %v470_v36, 1e+09  ;;  %v455_v41 = vmin.f32 %v443_v33, %v453_v13 }
 0x33c   :  { %v463_v40 = vsel %vm255_vm12, %v458_v37, 1e+09  ;;  %v477_v43 = vadd.f32 %v475_v38, %v2145_v60 }
 0x33d   :  { %v465_v42 = vadd.f32 %v463_v40, %v2142_v58  ;;  %v460_v5 = vpop.permute.xlu2 %459 }
 0x33e   :  { %v464_v10 = vsel %vm255_vm12, %v460_v5, 1e+09 }
 0x33f   :  { %v467_v45 = vmin.f32 %v455_v41, %v465_v42  ;;  %v466_v12 = vadd.f32 %v464_v10, %v2142_v58 }
 0x341   :  { %v479_v46 = vmin.f32 %v467_v45, %v477_v43 }
 0x343   :  { %v481_v26 = vadd.f32 %v479_v46, %v2063_v19 }
 0x344   :  { %v412_v51 = vpop.permute.xlu1 %411  ;;  %v400_v52 = vpop.permute.xlu0 %399 }
 0x345   :  { %v483_v53 = vmin.f32 %v2235_v35, %v481_v26  ;;  %v416_v54 = vsel %vm199_vm7, 1e+09, %v412_v51  ;;  %v404_v55 = vsel %vm185_vm8, 1e+09, %v400_v52  ;;  %v428_v35 = vsel %vm213_vm9, 1e+09, %v424_v49 }
 0x346   :  { %v406_v57 = vadd.f32 %v404_v55, %v2120_v32  ;;  %v418_v61 = vadd.f32 %v416_v54, %v2123_v34  ;;  %v430_v0 = vadd.f32 %v428_v35, %v2127_v39 }
 0x347   :  { %v2316_v59 = vsel %vm146_vm4, %v2072_v23, %v483_v53 }
 0x348   :  { %v408_v62 = vmin.f32 %v396_v56, %v406_v57  ;;  %511 = vrot.lane.b32.xlu0 %v2316_v59, %s1998_s4  ;;  %499 = vrot.lane.b32.xlu2 %v2316_v59, %s2001_s21 }
 0x349   :  { %489 = vrot.lane.b32.xlu1 %v2316_v59, %s1999_s19 }
 0x34a   :  { %v420_v63 = vmin.f32 %v408_v62, %v418_v61 }
 0x34c   :  { %v448_v1 = vpop.permute.xlu1 %447  ;;  %v436_v2 = vpop.permute.xlu0 %435  ;;  %v432_v6 = vmin.f32 %v420_v63, %v430_v0 }
 0x34d   :  { %v452_v3 = vsel %vm241_vm11, %v448_v1, 1e+09  ;;  %v440_v50 = vsel %vm227_vm10, %v436_v2, 1e+09 }
 0x34e   :  { %v442_v7 = vadd.f32 %v440_v50, %v2132_v44  ;;  %v454_v8 = vadd.f32 %v452_v3, %v2136_v48 }
 0x350   :  { %v444_v9 = vmin.f32 %v432_v6, %v442_v7  ;;  %547 = vrot.lane.b32.xlu0 %v2316_v59, %s2003_s23  ;;  %535 = vrot.lane.b32.xlu2 %v2316_v59, %s1997_s2 }
 0x351   :  { %523 = vrot.lane.b32.xlu1 %v2316_v59, %s2000_s20 }
 0x352   :  { %v456_v11 = vmin.f32 %v444_v9, %v454_v8 }
 0x354   :  { %v472_v14 = vpop.permute.xlu0 %471  ;;  %v468_v17 = vmin.f32 %v456_v11, %v466_v12 }
 0x355   :  { %v476_v15 = vsel %vm269_vm13, %v472_v14, 1e+09 }
 0x356   :  { %v478_v18 = vadd.f32 %v476_v15, %v2145_v60 }
 0x358   :  { %v480_v20 = vmin.f32 %v468_v17, %v478_v18  ;;  %571 = vrot.lane.b32.xlu2 %v2316_v59, %s2004_s24 }
 0x359   :  { %559 = vrot.lane.b32.xlu1 %v2316_v59, %s2002_s22 }
 0x35a   :  { %v482_v21 = vadd.f32 %v480_v20, %v2063_v19 }
 0x35c   :  { %v484_v22 = vmin.f32 %v2272_v4, %v482_v21 }
 0x35e   :  { %v2350_v24 = vsel %vm151_vm5, %v2085_v25, %v484_v22 }
 0x35f   :  { %491 = vrot.lane.b32.xlu0 %v2350_v24, %s1999_s19 }
 0x360   :  { %513 = vrot.lane.b32.xlu2 %v2350_v24, %s1998_s4 }
 0x361   :  { %501 = vrot.lane.b32.xlu1 %v2350_v24, %s2001_s21 }
 0x367   :  { %525 = vrot.lane.b32.xlu0 %v2350_v24, %s2000_s20 }
 0x368   :  { %549 = vrot.lane.b32.xlu2 %v2350_v24, %s2003_s23 }
 0x369   :  { %537 = vrot.lane.b32.xlu1 %v2350_v24, %s1997_s2 }
 0x36f   :  { %561 = vrot.lane.b32.xlu0 %v2350_v24, %s2002_s22 }
 0x371   :  { %573 = vrot.lane.b32.xlu1 %v2350_v24, %s2004_s24 }
 0x3a2   :  { %v500_v4 = vpop.permute.xlu2 %499 }
 0x3a3   :  { %v505_v29 = vsel %vm185_vm8, 1e+09, %v500_v4 }
 0x3a4   :  { %v507_v13 = vadd.f32 %v505_v29, %v2120_v32 }
 0x3aa   :  { %v536_v33 = vpop.permute.xlu2 %535 }
 0x3ab   :  { %v541_v42 = vsel %vm227_vm10, %v536_v33, 1e+09 }
 0x3ac   :  { %v543_v49 = vadd.f32 %v541_v42, %v2132_v44 }
 0x3b2   :  { %v572_v26 = vpop.permute.xlu2 %571 }
 0x3b3   :  { %v577_v56 = vsel %vm269_vm13, %v572_v26, 1e+09 }
 0x3b4   :  { %v579_v35 = vadd.f32 %v577_v56, %v2145_v60 }
 0x3ba   :  { %v512_v28 = vpop.permute.xlu0 %511  ;;  %v514_v0 = vpop.permute.xlu2 %513 }
 0x3bb   :  { %v490_v27 = vpop.permute.xlu1 %489  ;;  %v517_v37 = vsel %vm199_vm7, 1e+09, %v512_v28  ;;  %v518_v10 = vsel %vm199_vm7, 1e+09, %v514_v0 }
 0x3bc   :  { %v495_v30 = vsel %vm173_vm6, 1e+09, %v490_v27  ;;  %v519_v40 = vadd.f32 %v517_v37, %v2123_v34  ;;  %v520_v14 = vadd.f32 %v518_v10, %v2123_v34 }
 0x3bd   :  { %v497_v36 = vadd.f32 %v495_v30, %v2118_v31 }
 0x3bf   :  { %v509_v38 = vmin.f32 %v497_v36, %v507_v13 }
 0x3c1   :  { %v521_v45 = vmin.f32 %v509_v38, %v519_v40 }
 0x3c2   :  { %v548_v47 = vpop.permute.xlu0 %547  ;;  %v550_v17 = vpop.permute.xlu2 %549 }
 0x3c3   :  { %v524_v41 = vpop.permute.xlu1 %523  ;;  %v553_v52 = vsel %vm241_vm11, %v548_v47, 1e+09  ;;  %v554_v28 = vsel %vm241_vm11, %v550_v17, 1e+09 }
 0x3c4   :  { %v529_v43 = vsel %vm213_vm9, 1e+09, %v524_v41  ;;  %v555_v54 = vadd.f32 %v553_v52, %v2136_v48  ;;  %v556_v30 = vadd.f32 %v554_v28, %v2136_v48 }
 0x3c5   :  { %v531_v46 = vadd.f32 %v529_v43, %v2127_v39 }
 0x3c7   :  { %v533_v51 = vmin.f32 %v521_v45, %v531_v46 }
 0x3c9   :  { %v545_v53 = vmin.f32 %v533_v51, %v543_v49 }
 0x3cb   :  { %v560_v55 = vpop.permute.xlu1 %559  ;;  %v557_v61 = vmin.f32 %v545_v53, %v555_v54 }
 0x3cc   :  { %v565_v57 = vsel %vm255_vm12, %v560_v55, 1e+09 }
 0x3cd   :  { %v567_v62 = vadd.f32 %v565_v57, %v2142_v58 }
 0x3cf   :  { %v569_v63 = vmin.f32 %v557_v61, %v567_v62 }
 0x3d1   :  { %v581_v1 = vmin.f32 %v569_v63, %v579_v35  ;;  %v492_v2 = vpop.permute.xlu0 %491 }
 0x3d2   :  { %v496_v3 = vsel %vm173_vm6, 1e+09, %v492_v2 }
 0x3d3   :  { %v583_v50 = vadd.f32 %v581_v1, %v2063_v19  ;;  %v502_v5 = vpop.permute.xlu1 %501  ;;  %v498_v6 = vadd.f32 %v496_v3, %v2118_v31 }
 0x3d4   :  { %v506_v7 = vsel %vm185_vm8, 1e+09, %v502_v5 }
 0x3d5   :  { %v585_v8 = vmin.f32 %v2316_v59, %v583_v50  ;;  %v508_v9 = vadd.f32 %v506_v7, %v2120_v32 }
 0x3d7   :  { %v2394_v11 = vsel %vm146_vm4, %v2072_v23, %v585_v8  ;;  %v510_v12 = vmin.f32 %v498_v6, %v508_v9 }
 0x3d8   :  { %613 = vrot.lane.b32.xlu1 %v2394_v11, %s1998_s4  ;;  %601 = vrot.lane.b32.xlu0 %v2394_v11, %s2001_s21 }
 0x3d9   :  { %591 = vrot.lane.b32.xlu2 %v2394_v11, %s1999_s19  ;;  %v526_v59 = vpop.permute.xlu0 %525  ;;  %v522_v20 = vmin.f32 %v510_v12, %v520_v14 }
 0x3da   :  { %v530_v15 = vsel %vm213_vm9, 1e+09, %v526_v59 }
 0x3db   :  { %v538_v18 = vpop.permute.xlu1 %537  ;;  %v532_v21 = vadd.f32 %v530_v15, %v2127_v39 }
 0x3dc   :  { %v542_v22 = vsel %vm227_vm10, %v538_v18, 1e+09 }
 0x3dd   :  { %v544_v4 = vadd.f32 %v542_v22, %v2132_v44  ;;  %v534_v27 = vmin.f32 %v522_v20, %v532_v21 }
 0x3df   :  { %v546_v29 = vmin.f32 %v534_v27, %v544_v4 }
 0x3e0   :  { %649 = vrot.lane.b32.xlu1 %v2394_v11, %s2003_s23  ;;  %637 = vrot.lane.b32.xlu0 %v2394_v11, %s1997_s2 }
 0x3e1   :  { %625 = vrot.lane.b32.xlu2 %v2394_v11, %s2000_s20  ;;  %v562_v33 = vpop.permute.xlu0 %561  ;;  %v558_v37 = vmin.f32 %v546_v29, %v556_v30 }
 0x3e2   :  { %v566_v36 = vsel %vm255_vm12, %v562_v33, 1e+09 }
 0x3e3   :  { %v574_v13 = vpop.permute.xlu1 %573  ;;  %v568_v38 = vadd.f32 %v566_v36, %v2142_v58 }
 0x3e4   :  { %v578_v40 = vsel %vm269_vm13, %v574_v13, 1e+09 }
 0x3e5   :  { %v580_v41 = vadd.f32 %v578_v40, %v2145_v60  ;;  %v570_v42 = vmin.f32 %v558_v37, %v568_v38 }
 0x3e7   :  { %v582_v43 = vmin.f32 %v570_v42, %v580_v41 }
 0x3e8   :  { %673 = vrot.lane.b32.xlu0 %v2394_v11, %s2004_s24 }
 0x3e9   :  { %v584_v45 = vadd.f32 %v582_v43, %v2063_v19  ;;  %661 = vrot.lane.b32.xlu2 %v2394_v11, %s2002_s22 }
 0x3eb   :  { %v586_v46 = vmin.f32 %v2350_v24, %v584_v45 }
 0x3ed   :  { %v2428_v47 = vsel %vm151_vm5, %v2085_v25, %v586_v46 }
 0x3ee   :  { %593 = vrot.lane.b32.xlu1 %v2428_v47, %s1999_s19 }
 0x3f0   :  { %615 = vrot.lane.b32.xlu0 %v2428_v47, %s1998_s4 }
 0x3f1   :  { %603 = vrot.lane.b32.xlu2 %v2428_v47, %s2001_s21 }
 0x3f6   :  { %627 = vrot.lane.b32.xlu1 %v2428_v47, %s2000_s20 }
 0x3f8   :  { %651 = vrot.lane.b32.xlu0 %v2428_v47, %s2003_s23 }
 0x3f9   :  { %639 = vrot.lane.b32.xlu2 %v2428_v47, %s1997_s2 }
 0x3fe   :  { %663 = vrot.lane.b32.xlu1 %v2428_v47, %s2002_s22 }
 0x401   :  { %675 = vrot.lane.b32.xlu2 %v2428_v47, %s2004_s24 }
 0x433   :  { %v592_v24 = vpop.permute.xlu2 %591 }
 0x434   :  { %v597_v26 = vsel %vm173_vm6, 1e+09, %v592_v24 }
 0x435   :  { %v599_v55 = vadd.f32 %v597_v26, %v2118_v31 }
 0x43b   :  { %v626_v49 = vpop.permute.xlu2 %625 }
 0x43c   :  { %v631_v62 = vsel %vm213_vm9, 1e+09, %v626_v49 }
 0x43d   :  { %v633_v0 = vadd.f32 %v631_v62, %v2127_v39 }
 0x443   :  { %v662_v35 = vpop.permute.xlu2 %661 }
 0x444   :  { %v667_v9 = vsel %vm255_vm12, %v662_v35, 1e+09 }
 0x445   :  { %v669_v12 = vadd.f32 %v667_v9, %v2142_v58 }
 0x44a   :  { %v614_v51 = vpop.permute.xlu1 %613  ;;  %v602_v52 = vpop.permute.xlu0 %601 }
 0x44b   :  { %v619_v53 = vsel %vm199_vm7, 1e+09, %v614_v51  ;;  %v607_v54 = vsel %vm185_vm8, 1e+09, %v602_v52  ;;  %v604_v14 = vpop.permute.xlu2 %603 }
 0x44c   :  { %v609_v56 = vadd.f32 %v607_v54, %v2120_v32  ;;  %v621_v57 = vadd.f32 %v619_v53, %v2123_v34  ;;  %v608_v4 = vsel %vm185_vm8, 1e+09, %v604_v14 }
 0x44d   :  { %v610_v33 = vadd.f32 %v608_v4, %v2120_v32 }
 0x44e   :  { %v611_v61 = vmin.f32 %v599_v55, %v609_v56 }
 0x450   :  { %v623_v63 = vmin.f32 %v611_v61, %v621_v57 }
 0x452   :  { %v650_v1 = vpop.permute.xlu1 %649  ;;  %v638_v2 = vpop.permute.xlu0 %637  ;;  %v635_v5 = vmin.f32 %v623_v63, %v633_v0 }
 0x453   :  { %v655_v3 = vsel %vm241_vm11, %v650_v1, 1e+09  ;;  %v643_v50 = vsel %vm227_vm10, %v638_v2, 1e+09  ;;  %v640_v36 = vpop.permute.xlu2 %639 }
 0x454   :  { %v645_v6 = vadd.f32 %v643_v50, %v2132_v44  ;;  %v657_v7 = vadd.f32 %v655_v3, %v2136_v48  ;;  %v644_v41 = vsel %vm227_vm10, %v640_v36, 1e+09 }
 0x455   :  { %v646_v24 = vadd.f32 %v644_v41, %v2132_v44 }
 0x456   :  { %v647_v8 = vmin.f32 %v635_v5, %v645_v6 }
 0x458   :  { %v659_v10 = vmin.f32 %v647_v8, %v657_v7 }
 0x45a   :  { %v674_v59 = vpop.permute.xlu0 %673  ;;  %v671_v17 = vmin.f32 %v659_v10, %v669_v12 }
 0x45b   :  { %v679_v15 = vsel %vm269_vm13, %v674_v59, 1e+09  ;;  %v676_v51 = vpop.permute.xlu2 %675 }
 0x45c   :  { %v681_v18 = vadd.f32 %v679_v15, %v2145_v60  ;;  %v680_v55 = vsel %vm269_vm13, %v676_v51, 1e+09 }
 0x45d   :  { %v682_v62 = vadd.f32 %v680_v55, %v2145_v60 }
 0x45e   :  { %v683_v20 = vmin.f32 %v671_v17, %v681_v18 }
 0x460   :  { %v685_v21 = vadd.f32 %v683_v20, %v2063_v19  ;;  %v594_v22 = vpop.permute.xlu1 %593 }
 0x461   :  { %v598_v27 = vsel %vm173_vm6, 1e+09, %v594_v22 }
 0x462   :  { %v687_v28 = vmin.f32 %v2394_v11, %v685_v21  ;;  %v600_v29 = vadd.f32 %v598_v27, %v2118_v31  ;;  %v616_v30 = vpop.permute.xlu0 %615 }
 0x463   :  { %v620_v37 = vsel %vm199_vm7, 1e+09, %v616_v30 }
 0x464   :  { %v2471_v13 = vsel %vm146_vm4, %v2072_v23, %v687_v28  ;;  %v612_v11 = vmin.f32 %v600_v29, %v610_v33  ;;  %v622_v38 = vadd.f32 %v620_v37, %v2123_v34 }
 0x465   :  { %715 = vrot.lane.b32.xlu2 %v2471_v13, %s1998_s4  ;;  %703 = vrot.lane.b32.xlu1 %v2471_v13, %s2001_s21 }
 0x466   :  { %693 = vrot.lane.b32.xlu0 %v2471_v13, %s1999_s19  ;;  %v624_v43 = vmin.f32 %v612_v11, %v622_v38 }
 0x468   :  { %v628_v40 = vpop.permute.xlu1 %627 }
 0x469   :  { %v632_v42 = vsel %vm213_vm9, 1e+09, %v628_v40 }
 0x46a   :  { %v634_v45 = vadd.f32 %v632_v42, %v2127_v39  ;;  %v652_v46 = vpop.permute.xlu0 %651 }
 0x46b   :  { %v656_v26 = vsel %vm241_vm11, %v652_v46, 1e+09 }
 0x46c   :  { %v636_v49 = vmin.f32 %v624_v43, %v634_v45  ;;  %v658_v53 = vadd.f32 %v656_v26, %v2136_v48 }
 0x46d   :  { %751 = vrot.lane.b32.xlu2 %v2471_v13, %s2003_s23  ;;  %739 = vrot.lane.b32.xlu1 %v2471_v13, %s1997_s2 }
 0x46e   :  { %v648_v52 = vmin.f32 %v636_v49, %v646_v24  ;;  %727 = vrot.lane.b32.xlu0 %v2471_v13, %s2000_s20 }
 0x470   :  { %v664_v54 = vpop.permute.xlu1 %663  ;;  %v660_v57 = vmin.f32 %v648_v52, %v658_v53 }
 0x471   :  { %v668_v56 = vsel %vm255_vm12, %v664_v54, 1e+09 }
 0x472   :  { %v670_v61 = vadd.f32 %v668_v56, %v2142_v58 }
 0x474   :  { %v672_v35 = vmin.f32 %v660_v57, %v670_v61 }
 0x475   :  { %775 = vrot.lane.b32.xlu1 %v2471_v13, %s2004_s24 }
 0x476   :  { %v684_v63 = vmin.f32 %v672_v35, %v682_v62  ;;  %763 = vrot.lane.b32.xlu0 %v2471_v13, %s2002_s22 }
 0x478   :  { %v686_v0 = vadd.f32 %v684_v63, %v2063_v19 }
 0x47a   :  { %v688_v1 = vmin.f32 %v2428_v47, %v686_v0 }
 0x47c   :  { %v2506_v2 = vsel %vm151_vm5, %v2085_v25, %v688_v1 }
 0x47d   :  { %717 = vrot.lane.b32.xlu1 %v2506_v2, %s1998_s4  ;;  %695 = vrot.lane.b32.xlu2 %v2506_v2, %s1999_s19 }
 0x47e   :  { %705 = vrot.lane.b32.xlu0 %v2506_v2, %s2001_s21 }
 0x485   :  { %753 = vrot.lane.b32.xlu1 %v2506_v2, %s2003_s23  ;;  %729 = vrot.lane.b32.xlu2 %v2506_v2, %s2000_s20 }
 0x486   :  { %741 = vrot.lane.b32.xlu0 %v2506_v2, %s1997_s2 }
 0x48d   :  { %765 = vrot.lane.b32.xlu2 %v2506_v2, %s2002_s22 }
 0x48e   :  { %777 = vrot.lane.b32.xlu0 %v2506_v2, %s2004_s24 }
 0x4bf   :  { %v716_v47 = vpop.permute.xlu2 %715 }
 0x4c0   :  { %v721_v9 = vsel %vm199_vm7, 1e+09, %v716_v47 }
 0x4c1   :  { %v723_v59 = vadd.f32 %v721_v9, %v2123_v34 }
 0x4c7   :  { %v752_v10 = vpop.permute.xlu2 %751 }
 0x4c8   :  { %v757_v27 = vsel %vm241_vm11, %v752_v10, 1e+09 }
 0x4c9   :  { %v759_v33 = vadd.f32 %v757_v27, %v2136_v48 }
 0x4d7   :  { %v704_v3 = vpop.permute.xlu1 %703  ;;  %v696_v28 = vpop.permute.xlu2 %695 }
 0x4d8   :  { %v709_v50 = vsel %vm185_vm8, 1e+09, %v704_v3  ;;  %v694_v5 = vpop.permute.xlu0 %693  ;;  %v700_v45 = vsel %vm173_vm6, 1e+09, %v696_v28 }
 0x4d9   :  { %v699_v6 = vsel %vm173_vm6, 1e+09, %v694_v5  ;;  %v711_v7 = vadd.f32 %v709_v50, %v2120_v32  ;;  %v702_v53 = vadd.f32 %v700_v45, %v2118_v31 }
 0x4da   :  { %v701_v8 = vadd.f32 %v699_v6, %v2118_v31 }
 0x4dc   :  { %v713_v12 = vmin.f32 %v701_v8, %v711_v7 }
 0x4de   :  { %v725_v20 = vmin.f32 %v713_v12, %v723_v59 }
 0x4df   :  { %v740_v14 = vpop.permute.xlu1 %739  ;;  %v730_v24 = vpop.permute.xlu2 %729 }
 0x4e0   :  { %v728_v15 = vpop.permute.xlu0 %727  ;;  %v745_v17 = vsel %vm227_vm10, %v740_v14, 1e+09  ;;  %v734_v62 = vsel %vm213_vm9, 1e+09, %v730_v24 }
 0x4e1   :  { %v733_v18 = vsel %vm213_vm9, 1e+09, %v728_v15  ;;  %v747_v22 = vadd.f32 %v745_v17, %v2132_v44  ;;  %v736_v63 = vadd.f32 %v734_v62, %v2127_v39 }
 0x4e2   :  { %v735_v21 = vadd.f32 %v733_v18, %v2127_v39 }
 0x4e4   :  { %v737_v4 = vmin.f32 %v725_v20, %v735_v21 }
 0x4e6   :  { %v749_v29 = vmin.f32 %v737_v4, %v747_v22 }
 0x4e7   :  { %v776_v30 = vpop.permute.xlu1 %775  ;;  %v766_v3 = vpop.permute.xlu2 %765 }
 0x4e8   :  { %v764_v36 = vpop.permute.xlu0 %763  ;;  %v781_v37 = vsel %vm269_vm13, %v776_v30, 1e+09  ;;  %v761_v38 = vmin.f32 %v749_v29, %v759_v33  ;;  %v770_v8 = vsel %vm255_vm12, %v766_v3, 1e+09 }
 0x4e9   :  { %v769_v11 = vsel %vm255_vm12, %v764_v36, 1e+09  ;;  %v783_v41 = vadd.f32 %v781_v37, %v2145_v60  ;;  %v772_v10 = vadd.f32 %v770_v8, %v2142_v58 }
 0x4ea   :  { %v771_v40 = vadd.f32 %v769_v11, %v2142_v58 }
 0x4ec   :  { %v773_v42 = vmin.f32 %v761_v38, %v771_v40 }
 0x4ee   :  { %v785_v43 = vmin.f32 %v773_v42, %v783_v41 }
 0x4ef   :  { %v718_v46 = vpop.permute.xlu1 %717 }
 0x4f0   :  { %v787_v49 = vadd.f32 %v785_v43, %v2063_v19  ;;  %v706_v26 = vpop.permute.xlu0 %705  ;;  %v722_v51 = vsel %vm199_vm7, 1e+09, %v718_v46 }
 0x4f1   :  { %v710_v52 = vsel %vm185_vm8, 1e+09, %v706_v26  ;;  %v724_v57 = vadd.f32 %v722_v51, %v2123_v34 }
 0x4f2   :  { %v789_v54 = vmin.f32 %v2471_v13, %v787_v49  ;;  %v712_v55 = vadd.f32 %v710_v52, %v2120_v32 }
 0x4f4   :  { %v2550_v56 = vsel %vm146_vm4, %v2072_v23, %v789_v54  ;;  %v714_v61 = vmin.f32 %v702_v53, %v712_v55 }
 0x4f5   :  { %817 = vrot.lane.b32.xlu0 %v2550_v56, %s1998_s4  ;;  %805 = vrot.lane.b32.xlu2 %v2550_v56, %s2001_s21 }
 0x4f6   :  { %v726_v35 = vmin.f32 %v714_v61, %v724_v57  ;;  %795 = vrot.lane.b32.xlu1 %v2550_v56, %s1999_s19 }
 0x4f7   :  { %v754_v13 = vpop.permute.xlu1 %753 }
 0x4f8   :  { %v742_v0 = vpop.permute.xlu0 %741  ;;  %v758_v1 = vsel %vm241_vm11, %v754_v13, 1e+09  ;;  %v738_v50 = vmin.f32 %v726_v35, %v736_v63 }
 0x4f9   :  { %v746_v47 = vsel %vm227_vm10, %v742_v0, 1e+09  ;;  %v760_v6 = vadd.f32 %v758_v1, %v2136_v48 }
 0x4fa   :  { %v748_v5 = vadd.f32 %v746_v47, %v2132_v44 }
 0x4fc   :  { %v750_v7 = vmin.f32 %v738_v50, %v748_v5 }
 0x4fd   :  { %853 = vrot.lane.b32.xlu0 %v2550_v56, %s2003_s23  ;;  %841 = vrot.lane.b32.xlu2 %v2550_v56, %s1997_s2 }
 0x4fe   :  { %v762_v9 = vmin.f32 %v750_v7, %v760_v6  ;;  %829 = vrot.lane.b32.xlu1 %v2550_v56, %s2000_s20 }
 0x500   :  { %v778_v12 = vpop.permute.xlu0 %777  ;;  %v774_v59 = vmin.f32 %v762_v9, %v772_v10 }
 0x501   :  { %v782_v14 = vsel %vm269_vm13, %v778_v12, 1e+09 }
 0x502   :  { %v784_v15 = vadd.f32 %v782_v14, %v2145_v60 }
 0x504   :  { %v786_v17 = vmin.f32 %v774_v59, %v784_v15 }
 0x505   :  { %877 = vrot.lane.b32.xlu2 %v2550_v56, %s2004_s24 }
 0x506   :  { %v788_v18 = vadd.f32 %v786_v17, %v2063_v19  ;;  %865 = vrot.lane.b32.xlu1 %v2550_v56, %s2002_s22 }
 0x508   :  { %v790_v20 = vmin.f32 %v2506_v2, %v788_v18 }
 0x50a   :  { %v2584_v21 = vsel %vm151_vm5, %v2085_v25, %v790_v20 }
 0x50b   :  { %797 = vrot.lane.b32.xlu0 %v2584_v21, %s1999_s19 }
 0x50d   :  { %819 = vrot.lane.b32.xlu2 %v2584_v21, %s1998_s4 }
 0x50e   :  { %807 = vrot.lane.b32.xlu1 %v2584_v21, %s2001_s21 }
 0x513   :  { %831 = vrot.lane.b32.xlu0 %v2584_v21, %s2000_s20 }
 0x515   :  { %855 = vrot.lane.b32.xlu2 %v2584_v21, %s2003_s23 }
 0x516   :  { %843 = vrot.lane.b32.xlu1 %v2584_v21, %s1997_s2 }
 0x51b   :  { %867 = vrot.lane.b32.xlu0 %v2584_v21, %s2002_s22 }
 0x51e   :  { %879 = vrot.lane.b32.xlu1 %v2584_v21, %s2004_s24 }
 0x54f   :  { %v806_v2 = vpop.permute.xlu2 %805 }
 0x550   :  { %v811_v27 = vsel %vm185_vm8, 1e+09, %v806_v2 }
 0x551   :  { %v813_v33 = vadd.f32 %v811_v27, %v2120_v32 }
 0x557   :  { %v842_v28 = vpop.permute.xlu2 %841 }
 0x558   :  { %v847_v40 = vsel %vm227_vm10, %v842_v28, 1e+09 }
 0x559   :  { %v849_v24 = vadd.f32 %v847_v40, %v2132_v44 }
 0x55f   :  { %v878_v46 = vpop.permute.xlu2 %877 }
 0x560   :  { %v883_v54 = vsel %vm269_vm13, %v878_v46, 1e+09 }
 0x561   :  { %v885_v62 = vadd.f32 %v883_v54, %v2145_v60 }
 0x567   :  { %v818_v4 = vpop.permute.xlu0 %817  ;;  %v820_v13 = vpop.permute.xlu2 %819 }
 0x568   :  { %v796_v22 = vpop.permute.xlu1 %795  ;;  %v823_v36 = vsel %vm199_vm7, 1e+09, %v818_v4  ;;  %v824_v6 = vsel %vm199_vm7, 1e+09, %v820_v13 }
 0x569   :  { %v801_v29 = vsel %vm173_vm6, 1e+09, %v796_v22  ;;  %v825_v11 = vadd.f32 %v823_v36, %v2123_v34  ;;  %v826_v12 = vadd.f32 %v824_v6, %v2123_v34 }
 0x56a   :  { %v803_v30 = vadd.f32 %v801_v29, %v2118_v31 }
 0x56c   :  { %v815_v37 = vmin.f32 %v803_v30, %v813_v33 }
 0x56e   :  { %v827_v42 = vmin.f32 %v815_v37, %v825_v11 }
 0x56f   :  { %v854_v45 = vpop.permute.xlu0 %853  ;;  %v856_v59 = vpop.permute.xlu2 %855 }
 0x570   :  { %v830_v38 = vpop.permute.xlu1 %829  ;;  %v859_v26 = vsel %vm241_vm11, %v854_v45, 1e+09  ;;  %v860_v22 = vsel %vm241_vm11, %v856_v59, 1e+09 }
 0x571   :  { %v835_v41 = vsel %vm213_vm9, 1e+09, %v830_v38  ;;  %v861_v52 = vadd.f32 %v859_v26, %v2136_v48  ;;  %v862_v28 = vadd.f32 %v860_v22, %v2136_v48 }
 0x572   :  { %v837_v43 = vadd.f32 %v835_v41, %v2127_v39 }
 0x574   :  { %v839_v49 = vmin.f32 %v827_v42, %v837_v43 }
 0x576   :  { %v851_v51 = vmin.f32 %v839_v49, %v849_v24 }
 0x578   :  { %v866_v53 = vpop.permute.xlu1 %865  ;;  %v863_v57 = vmin.f32 %v851_v51, %v861_v52 }
 0x579   :  { %v871_v55 = vsel %vm255_vm12, %v866_v53, 1e+09 }
 0x57a   :  { %v873_v61 = vadd.f32 %v871_v55, %v2142_v58 }
 0x57c   :  { %v875_v35 = vmin.f32 %v863_v57, %v873_v61 }
 0x57d   :  { %v798_v63 = vpop.permute.xlu0 %797 }
 0x57e   :  { %v887_v0 = vmin.f32 %v875_v35, %v885_v62  ;;  %v802_v1 = vsel %vm173_vm6, 1e+09, %v798_v63 }
 0x57f   :  { %v804_v50 = vadd.f32 %v802_v1, %v2118_v31 }
 0x580   :  { %v889_v47 = vadd.f32 %v887_v0, %v2063_v19  ;;  %v808_v3 = vpop.permute.xlu1 %807 }
 0x581   :  { %v812_v5 = vsel %vm185_vm8, 1e+09, %v808_v3 }
 0x582   :  { %v891_v7 = vmin.f32 %v2550_v56, %v889_v47  ;;  %v814_v8 = vadd.f32 %v812_v5, %v2120_v32 }
 0x584   :  { %v2628_v9 = vsel %vm146_vm4, %v2072_v23, %v891_v7  ;;  %v816_v10 = vmin.f32 %v804_v50, %v814_v8 }
 0x585   :  { %919 = vrot.lane.b32.xlu1 %v2628_v9, %s1998_s4  ;;  %907 = vrot.lane.b32.xlu0 %v2628_v9, %s2001_s21  ;;  %v832_v14 = vpop.permute.xlu0 %831 }
 0x586   :  { %897 = vrot.lane.b32.xlu2 %v2628_v9, %s1999_s19  ;;  %v836_v56 = vsel %vm213_vm9, 1e+09, %v832_v14  ;;  %v828_v15 = vmin.f32 %v816_v10, %v826_v12 }
 0x587   :  { %v838_v17 = vadd.f32 %v836_v56, %v2127_v39 }
 0x588   :  { %v844_v18 = vpop.permute.xlu1 %843 }
 0x589   :  { %v848_v20 = vsel %vm227_vm10, %v844_v18, 1e+09  ;;  %v840_v2 = vmin.f32 %v828_v15, %v838_v17 }
 0x58a   :  { %v850_v4 = vadd.f32 %v848_v20, %v2132_v44 }
 0x58c   :  { %v852_v27 = vmin.f32 %v840_v2, %v850_v4 }
 0x58d   :  { %955 = vrot.lane.b32.xlu1 %v2628_v9, %s2003_s23  ;;  %943 = vrot.lane.b32.xlu0 %v2628_v9, %s1997_s2  ;;  %v868_v29 = vpop.permute.xlu0 %867 }
 0x58e   :  { %931 = vrot.lane.b32.xlu2 %v2628_v9, %s2000_s20  ;;  %v872_v30 = vsel %vm255_vm12, %v868_v29, 1e+09  ;;  %v864_v33 = vmin.f32 %v852_v27, %v862_v28 }
 0x58f   :  { %v874_v36 = vadd.f32 %v872_v30, %v2142_v58 }
 0x590   :  { %v880_v37 = vpop.permute.xlu1 %879 }
 0x591   :  { %v884_v11 = vsel %vm269_vm13, %v880_v37, 1e+09  ;;  %v876_v38 = vmin.f32 %v864_v33, %v874_v36 }
 0x592   :  { %v886_v40 = vadd.f32 %v884_v11, %v2145_v60 }
 0x594   :  { %v888_v41 = vmin.f32 %v876_v38, %v886_v40 }
 0x595   :  { %979 = vrot.lane.b32.xlu0 %v2628_v9, %s2004_s24 }
 0x596   :  { %v890_v42 = vadd.f32 %v888_v41, %v2063_v19  ;;  %967 = vrot.lane.b32.xlu2 %v2628_v9, %s2002_s22 }
 0x598   :  { %v892_v43 = vmin.f32 %v2584_v21, %v890_v42 }
 0x59a   :  { %v2662_v45 = vsel %vm151_vm5, %v2085_v25, %v892_v43 }
 0x59b   :  { %899 = vrot.lane.b32.xlu1 %v2662_v45, %s1999_s19 }
 0x59d   :  { %921 = vrot.lane.b32.xlu0 %v2662_v45, %s1998_s4 }
 0x59e   :  { %909 = vrot.lane.b32.xlu2 %v2662_v45, %s2001_s21 }
 0x5a3   :  { %933 = vrot.lane.b32.xlu1 %v2662_v45, %s2000_s20 }
 0x5a5   :  { %957 = vrot.lane.b32.xlu0 %v2662_v45, %s2003_s23 }
 0x5a6   :  { %945 = vrot.lane.b32.xlu2 %v2662_v45, %s1997_s2 }
 0x5ab   :  { %969 = vrot.lane.b32.xlu1 %v2662_v45, %s2002_s22 }
 0x5ae   :  { %981 = vrot.lane.b32.xlu2 %v2662_v45, %s2004_s24 }
 0x5e0   :  { %v898_v21 = vpop.permute.xlu2 %897 }
 0x5e1   :  { %v903_v24 = vsel %vm173_vm6, 1e+09, %v898_v21 }
 0x5e2   :  { %v905_v53 = vadd.f32 %v903_v24, %v2118_v31 }
 0x5e8   :  { %v932_v46 = vpop.permute.xlu2 %931 }
 0x5e9   :  { %v937_v61 = vsel %vm213_vm9, 1e+09, %v932_v46 }
 0x5ea   :  { %v939_v13 = vadd.f32 %v937_v61, %v2127_v39 }
 0x5f0   :  { %v968_v62 = vpop.permute.xlu2 %967 }
 0x5f1   :  { %v973_v7 = vsel %vm255_vm12, %v968_v62, 1e+09 }
 0x5f2   :  { %v975_v10 = vadd.f32 %v973_v7, %v2142_v58 }
 0x5f7   :  { %v920_v49 = vpop.permute.xlu1 %919  ;;  %v908_v26 = vpop.permute.xlu0 %907 }
 0x5f8   :  { %v925_v51 = vsel %vm199_vm7, 1e+09, %v920_v49  ;;  %v913_v52 = vsel %vm185_vm8, 1e+09, %v908_v26  ;;  %v910_v12 = vpop.permute.xlu2 %909 }
 0x5f9   :  { %v915_v54 = vadd.f32 %v913_v52, %v2120_v32  ;;  %v927_v55 = vadd.f32 %v925_v51, %v2123_v34  ;;  %v914_v2 = vsel %vm185_vm8, 1e+09, %v910_v12 }
 0x5fa   :  { %v916_v29 = vadd.f32 %v914_v2, %v2120_v32 }
 0x5fb   :  { %v917_v57 = vmin.f32 %v905_v53, %v915_v54 }
 0x5fd   :  { %v929_v35 = vmin.f32 %v917_v57, %v927_v55 }
 0x5ff   :  { %v956_v63 = vpop.permute.xlu1 %955  ;;  %v944_v0 = vpop.permute.xlu0 %943  ;;  %v941_v3 = vmin.f32 %v929_v35, %v939_v13 }
 0x600   :  { %v961_v1 = vsel %vm241_vm11, %v956_v63, 1e+09  ;;  %v949_v47 = vsel %vm227_vm10, %v944_v0, 1e+09  ;;  %v946_v30 = vpop.permute.xlu2 %945 }
 0x601   :  { %v951_v50 = vadd.f32 %v949_v47, %v2132_v44  ;;  %v963_v5 = vadd.f32 %v961_v1, %v2136_v48  ;;  %v950_v38 = vsel %vm227_vm10, %v946_v30, 1e+09 }
 0x602   :  { %v952_v21 = vadd.f32 %v950_v38, %v2132_v44 }
 0x603   :  { %v953_v6 = vmin.f32 %v941_v3, %v951_v50 }
 0x605   :  { %v965_v8 = vmin.f32 %v953_v6, %v963_v5 }
 0x607   :  { %v980_v14 = vpop.permute.xlu0 %979  ;;  %v977_v59 = vmin.f32 %v965_v8, %v975_v10 }
 0x608   :  { %v985_v56 = vsel %vm269_vm13, %v980_v14, 1e+09  ;;  %v982_v49 = vpop.permute.xlu2 %981 }
 0x609   :  { %v987_v15 = vadd.f32 %v985_v56, %v2145_v60  ;;  %v986_v53 = vsel %vm269_vm13, %v982_v49, 1e+09 }
 0x60a   :  { %v988_v61 = vadd.f32 %v986_v53, %v2145_v60 }
 0x60b   :  { %v989_v17 = vmin.f32 %v977_v59, %v987_v15 }
 0x60d   :  { %v991_v18 = vadd.f32 %v989_v17, %v2063_v19  ;;  %v900_v20 = vpop.permute.xlu1 %899 }
 0x60e   :  { %v904_v22 = vsel %vm173_vm6, 1e+09, %v900_v20 }
 0x60f   :  { %v993_v4 = vmin.f32 %v2628_v9, %v991_v18  ;;  %v906_v27 = vadd.f32 %v904_v22, %v2118_v31  ;;  %v922_v28 = vpop.permute.xlu0 %921 }
 0x610   :  { %v926_v36 = vsel %vm199_vm7, 1e+09, %v922_v28 }
 0x611   :  { %v2705_v33 = vsel %vm146_vm4, %v2072_v23, %v993_v4  ;;  %v918_v9 = vmin.f32 %v906_v27, %v916_v29  ;;  %v928_v37 = vadd.f32 %v926_v36, %v2123_v34 }
 0x612   :  { %1021 = vrot.lane.b32.xlu2 %v2705_v33, %s1998_s4  ;;  %1009 = vrot.lane.b32.xlu1 %v2705_v33, %s2001_s21 }
 0x613   :  { %999 = vrot.lane.b32.xlu0 %v2705_v33, %s1999_s19  ;;  %v930_v41 = vmin.f32 %v918_v9, %v928_v37 }
 0x615   :  { %v934_v11 = vpop.permute.xlu1 %933 }
 0x616   :  { %v938_v40 = vsel %vm213_vm9, 1e+09, %v934_v11 }
 0x617   :  { %v940_v42 = vadd.f32 %v938_v40, %v2127_v39  ;;  %v958_v43 = vpop.permute.xlu0 %957 }
 0x618   :  { %v962_v24 = vsel %vm241_vm11, %v958_v43, 1e+09 }
 0x619   :  { %v942_v46 = vmin.f32 %v930_v41, %v940_v42  ;;  %v964_v51 = vadd.f32 %v962_v24, %v2136_v48 }
 0x61a   :  { %1057 = vrot.lane.b32.xlu2 %v2705_v33, %s2003_s23  ;;  %1045 = vrot.lane.b32.xlu1 %v2705_v33, %s1997_s2 }
 0x61b   :  { %v954_v26 = vmin.f32 %v942_v46, %v952_v21  ;;  %1033 = vrot.lane.b32.xlu0 %v2705_v33, %s2000_s20 }
 0x61d   :  { %v970_v52 = vpop.permute.xlu1 %969  ;;  %v966_v55 = vmin.f32 %v954_v26, %v964_v51 }
 0x61e   :  { %v974_v54 = vsel %vm255_vm12, %v970_v52, 1e+09 }
 0x61f   :  { %v976_v57 = vadd.f32 %v974_v54, %v2142_v58 }
 0x621   :  { %v978_v62 = vmin.f32 %v966_v55, %v976_v57 }
 0x622   :  { %1081 = vrot.lane.b32.xlu1 %v2705_v33, %s2004_s24 }
 0x623   :  { %v990_v35 = vmin.f32 %v978_v62, %v988_v61  ;;  %1069 = vrot.lane.b32.xlu0 %v2705_v33, %s2002_s22 }
 0x625   :  { %v992_v13 = vadd.f32 %v990_v35, %v2063_v19 }
 0x627   :  { %v994_v63 = vmin.f32 %v2662_v45, %v992_v13 }
 0x629   :  { %v2740_v0 = vsel %vm151_vm5, %v2085_v25, %v994_v63 }
 0x62a   :  { %1023 = vrot.lane.b32.xlu1 %v2740_v0, %s1998_s4  ;;  %1001 = vrot.lane.b32.xlu2 %v2740_v0, %s1999_s19 }
 0x62b   :  { %1011 = vrot.lane.b32.xlu0 %v2740_v0, %s2001_s21 }
 0x632   :  { %1059 = vrot.lane.b32.xlu1 %v2740_v0, %s2003_s23  ;;  %1035 = vrot.lane.b32.xlu2 %v2740_v0, %s2000_s20 }
 0x633   :  { %1047 = vrot.lane.b32.xlu0 %v2740_v0, %s1997_s2 }
 0x63a   :  { %1071 = vrot.lane.b32.xlu2 %v2740_v0, %s2002_s22 }
 0x63b   :  { %1083 = vrot.lane.b32.xlu0 %v2740_v0, %s2004_s24 }
 0x66c   :  { %v1022_v45 = vpop.permute.xlu2 %1021 }
 0x66d   :  { %v1027_v7 = vsel %vm199_vm7, 1e+09, %v1022_v45 }
 0x66e   :  { %v1029_v14 = vadd.f32 %v1027_v7, %v2123_v34 }
 0x674   :  { %v1058_v8 = vpop.permute.xlu2 %1057 }
 0x675   :  { %v1063_v22 = vsel %vm241_vm11, %v1058_v8, 1e+09 }
 0x676   :  { %v1065_v29 = vadd.f32 %v1063_v22, %v2136_v48 }
 0x684   :  { %v1010_v1 = vpop.permute.xlu1 %1009  ;;  %v1002_v4 = vpop.permute.xlu2 %1001 }
 0x685   :  { %v1015_v47 = vsel %vm185_vm8, 1e+09, %v1010_v1  ;;  %v1000_v3 = vpop.permute.xlu0 %999  ;;  %v1006_v42 = vsel %vm173_vm6, 1e+09, %v1002_v4 }
 0x686   :  { %v1005_v50 = vsel %vm173_vm6, 1e+09, %v1000_v3  ;;  %v1017_v5 = vadd.f32 %v1015_v47, %v2120_v32  ;;  %v1008_v51 = vadd.f32 %v1006_v42, %v2118_v31 }
 0x687   :  { %v1007_v6 = vadd.f32 %v1005_v50, %v2118_v31 }
 0x689   :  { %v1019_v10 = vmin.f32 %v1007_v6, %v1017_v5 }
 0x68b   :  { %v1031_v17 = vmin.f32 %v1019_v10, %v1029_v14 }
 0x68c   :  { %v1046_v12 = vpop.permute.xlu1 %1045  ;;  %v1036_v21 = vpop.permute.xlu2 %1035 }
 0x68d   :  { %v1034_v56 = vpop.permute.xlu0 %1033  ;;  %v1051_v59 = vsel %vm227_vm10, %v1046_v12, 1e+09  ;;  %v1040_v61 = vsel %vm213_vm9, 1e+09, %v1036_v21 }
 0x68e   :  { %v1039_v15 = vsel %vm213_vm9, 1e+09, %v1034_v56  ;;  %v1053_v20 = vadd.f32 %v1051_v59, %v2132_v44  ;;  %v1042_v35 = vadd.f32 %v1040_v61, %v2127_v39 }
 0x68f   :  { %v1041_v18 = vadd.f32 %v1039_v15, %v2127_v39 }
 0x691   :  { %v1043_v2 = vmin.f32 %v1031_v17, %v1041_v18 }
 0x693   :  { %v1055_v27 = vmin.f32 %v1043_v2, %v1053_v20 }
 0x694   :  { %v1082_v28 = vpop.permute.xlu1 %1081  ;;  %v1072_v1 = vpop.permute.xlu2 %1071 }
 0x695   :  { %v1070_v30 = vpop.permute.xlu0 %1069  ;;  %v1087_v36 = vsel %vm269_vm13, %v1082_v28, 1e+09  ;;  %v1067_v37 = vmin.f32 %v1055_v27, %v1065_v29  ;;  %v1076_v6 = vsel %vm255_vm12, %v1072_v1, 1e+09 }
 0x696   :  { %v1075_v9 = vsel %vm255_vm12, %v1070_v30, 1e+09  ;;  %v1089_v38 = vadd.f32 %v1087_v36, %v2145_v60  ;;  %v1078_v8 = vadd.f32 %v1076_v6, %v2142_v58 }
 0x697   :  { %v1077_v11 = vadd.f32 %v1075_v9, %v2142_v58 }
 0x699   :  { %v1079_v40 = vmin.f32 %v1067_v37, %v1077_v11 }
 0x69b   :  { %v1091_v41 = vmin.f32 %v1079_v40, %v1089_v38 }
 0x69c   :  { %v1024_v43 = vpop.permute.xlu1 %1023 }
 0x69d   :  { %v1093_v46 = vadd.f32 %v1091_v41, %v2063_v19  ;;  %v1012_v24 = vpop.permute.xlu0 %1011  ;;  %v1028_v49 = vsel %vm199_vm7, 1e+09, %v1024_v43 }
 0x69e   :  { %v1016_v26 = vsel %vm185_vm8, 1e+09, %v1012_v24  ;;  %v1030_v55 = vadd.f32 %v1028_v49, %v2123_v34 }
 0x69f   :  { %v1095_v52 = vmin.f32 %v2705_v33, %v1093_v46  ;;  %v1018_v53 = vadd.f32 %v1016_v26, %v2120_v32 }
 0x6a1   :  { %v2784_v54 = vsel %vm146_vm4, %v2072_v23, %v1095_v52  ;;  %v1020_v57 = vmin.f32 %v1008_v51, %v1018_v53 }
 0x6a2   :  { %1123 = vrot.lane.b32.xlu0 %v2784_v54, %s1998_s4  ;;  %1111 = vrot.lane.b32.xlu2 %v2784_v54, %s2001_s21 }
 0x6a3   :  { %v1032_v62 = vmin.f32 %v1020_v57, %v1030_v55  ;;  %1101 = vrot.lane.b32.xlu1 %v2784_v54, %s1999_s19 }
 0x6a4   :  { %v1060_v33 = vpop.permute.xlu1 %1059 }
 0x6a5   :  { %v1048_v13 = vpop.permute.xlu0 %1047  ;;  %v1064_v63 = vsel %vm241_vm11, %v1060_v33, 1e+09  ;;  %v1044_v47 = vmin.f32 %v1032_v62, %v1042_v35 }
 0x6a6   :  { %v1052_v45 = vsel %vm227_vm10, %v1048_v13, 1e+09  ;;  %v1066_v50 = vadd.f32 %v1064_v63, %v2136_v48 }
 0x6a7   :  { %v1054_v3 = vadd.f32 %v1052_v45, %v2132_v44 }
 0x6a9   :  { %v1056_v5 = vmin.f32 %v1044_v47, %v1054_v3 }
 0x6aa   :  { %1159 = vrot.lane.b32.xlu0 %v2784_v54, %s2003_s23  ;;  %1147 = vrot.lane.b32.xlu2 %v2784_v54, %s1997_s2 }
 0x6ab   :  { %v1068_v7 = vmin.f32 %v1056_v5, %v1066_v50  ;;  %1135 = vrot.lane.b32.xlu1 %v2784_v54, %s2000_s20 }
 0x6ad   :  { %v1084_v10 = vpop.permute.xlu0 %1083  ;;  %v1080_v14 = vmin.f32 %v1068_v7, %v1078_v8 }
 0x6ae   :  { %v1088_v12 = vsel %vm269_vm13, %v1084_v10, 1e+09 }
 0x6af   :  { %v1090_v56 = vadd.f32 %v1088_v12, %v2145_v60 }
 0x6b1   :  { %v1092_v59 = vmin.f32 %v1080_v14, %v1090_v56 }
 0x6b2   :  { %1183 = vrot.lane.b32.xlu2 %v2784_v54, %s2004_s24 }
 0x6b3   :  { %v1094_v15 = vadd.f32 %v1092_v59, %v2063_v19  ;;  %1171 = vrot.lane.b32.xlu1 %v2784_v54, %s2002_s22 }
 0x6b5   :  { %v1096_v17 = vmin.f32 %v2740_v0, %v1094_v15 }
 0x6b7   :  { %v2818_v18 = vsel %vm151_vm5, %v2085_v25, %v1096_v17 }
 0x6b8   :  { %1103 = vrot.lane.b32.xlu0 %v2818_v18, %s1999_s19 }
 0x6ba   :  { %1125 = vrot.lane.b32.xlu2 %v2818_v18, %s1998_s4 }
 0x6bb   :  { %1113 = vrot.lane.b32.xlu1 %v2818_v18, %s2001_s21 }
 0x6c0   :  { %1137 = vrot.lane.b32.xlu0 %v2818_v18, %s2000_s20 }
 0x6c2   :  { %1161 = vrot.lane.b32.xlu2 %v2818_v18, %s2003_s23 }
 0x6c3   :  { %1149 = vrot.lane.b32.xlu1 %v2818_v18, %s1997_s2 }
 0x6c8   :  { %1173 = vrot.lane.b32.xlu0 %v2818_v18, %s2002_s22 }
 0x6cb   :  { %1185 = vrot.lane.b32.xlu1 %v2818_v18, %s2004_s24 }
 0x6fc   :  { %v1112_v0 = vpop.permute.xlu2 %1111 }
 0x6fd   :  { %v1117_v22 = vsel %vm185_vm8, 1e+09, %v1112_v0 }
 0x6fe   :  { %v1119_v29 = vadd.f32 %v1117_v22, %v2120_v32 }
 0x704   :  { %v1148_v4 = vpop.permute.xlu2 %1147 }
 0x705   :  { %v1153_v11 = vsel %vm227_vm10, %v1148_v4, 1e+09 }
 0x706   :  { %v1155_v21 = vadd.f32 %v1153_v11, %v2132_v44 }
 0x70c   :  { %v1184_v43 = vpop.permute.xlu2 %1183 }
 0x70d   :  { %v1189_v52 = vsel %vm269_vm13, %v1184_v43, 1e+09 }
 0x70e   :  { %v1191_v61 = vadd.f32 %v1189_v52, %v2145_v60 }
 0x714   :  { %v1124_v2 = vpop.permute.xlu0 %1123  ;;  %v1126_v33 = vpop.permute.xlu2 %1125 }
 0x715   :  { %v1102_v20 = vpop.permute.xlu1 %1101  ;;  %v1129_v30 = vsel %vm199_vm7, 1e+09, %v1124_v2  ;;  %v1130_v50 = vsel %vm199_vm7, 1e+09, %v1126_v33 }
 0x716   :  { %v1107_v27 = vsel %vm173_vm6, 1e+09, %v1102_v20  ;;  %v1131_v9 = vadd.f32 %v1129_v30, %v2123_v34  ;;  %v1132_v10 = vadd.f32 %v1130_v50, %v2123_v34 }
 0x717   :  { %v1109_v28 = vadd.f32 %v1107_v27, %v2118_v31 }
 0x719   :  { %v1121_v36 = vmin.f32 %v1109_v28, %v1119_v29 }
 0x71b   :  { %v1133_v40 = vmin.f32 %v1121_v36, %v1131_v9 }
 0x71c   :  { %v1160_v42 = vpop.permute.xlu0 %1159  ;;  %v1162_v14 = vpop.permute.xlu2 %1161 }
 0x71d   :  { %v1136_v37 = vpop.permute.xlu1 %1135  ;;  %v1165_v24 = vsel %vm241_vm11, %v1160_v42, 1e+09  ;;  %v1166_v20 = vsel %vm241_vm11, %v1162_v14, 1e+09 }
 0x71e   :  { %v1141_v38 = vsel %vm213_vm9, 1e+09, %v1136_v37  ;;  %v1167_v26 = vadd.f32 %v1165_v24, %v2136_v48  ;;  %v1168_v4 = vadd.f32 %v1166_v20, %v2136_v48 }
 0x71f   :  { %v1143_v41 = vadd.f32 %v1141_v38, %v2127_v39 }
 0x721   :  { %v1145_v46 = vmin.f32 %v1133_v40, %v1143_v41 }
 0x723   :  { %v1157_v49 = vmin.f32 %v1145_v46, %v1155_v21 }
 0x725   :  { %v1172_v51 = vpop.permute.xlu1 %1171  ;;  %v1169_v55 = vmin.f32 %v1157_v49, %v1167_v26 }
 0x726   :  { %v1177_v53 = vsel %vm255_vm12, %v1172_v51, 1e+09 }
 0x727   :  { %v1179_v57 = vadd.f32 %v1177_v53, %v2142_v58 }
 0x729   :  { %v1181_v62 = vmin.f32 %v1169_v55, %v1179_v57 }
 0x72a   :  { %v1104_v35 = vpop.permute.xlu0 %1103 }
 0x72b   :  { %v1193_v13 = vmin.f32 %v1181_v62, %v1191_v61  ;;  %v1108_v63 = vsel %vm173_vm6, 1e+09, %v1104_v35 }
 0x72c   :  { %v1110_v47 = vadd.f32 %v1108_v63, %v2118_v31 }
 0x72d   :  { %v1195_v45 = vadd.f32 %v1193_v13, %v2063_v19  ;;  %v1114_v1 = vpop.permute.xlu1 %1113 }
 0x72e   :  { %v1118_v3 = vsel %vm185_vm8, 1e+09, %v1114_v1 }
 0x72f   :  { %v1197_v5 = vmin.f32 %v2784_v54, %v1195_v45  ;;  %v1120_v6 = vadd.f32 %v1118_v3, %v2120_v32 }
 0x731   :  { %v2862_v7 = vsel %vm146_vm4, %v2072_v23, %v1197_v5  ;;  %v1122_v8 = vmin.f32 %v1110_v47, %v1120_v6 }
 0x732   :  { %1225 = vrot.lane.b32.xlu1 %v2862_v7, %s1998_s4  ;;  %1213 = vrot.lane.b32.xlu0 %v2862_v7, %s2001_s21  ;;  %v1138_v12 = vpop.permute.xlu0 %1137 }
 0x733   :  { %1203 = vrot.lane.b32.xlu2 %v2862_v7, %s1999_s19  ;;  %v1142_v54 = vsel %vm213_vm9, 1e+09, %v1138_v12  ;;  %v1134_v56 = vmin.f32 %v1122_v8, %v1132_v10 }
 0x734   :  { %v1144_v59 = vadd.f32 %v1142_v54, %v2127_v39 }
 0x735   :  { %v1150_v15 = vpop.permute.xlu1 %1149 }
 0x736   :  { %v1154_v17 = vsel %vm227_vm10, %v1150_v15, 1e+09  ;;  %v1146_v0 = vmin.f32 %v1134_v56, %v1144_v59 }
 0x737   :  { %v1156_v2 = vadd.f32 %v1154_v17, %v2132_v44 }
 0x739   :  { %v1158_v22 = vmin.f32 %v1146_v0, %v1156_v2 }
 0x73a   :  { %1261 = vrot.lane.b32.xlu1 %v2862_v7, %s2003_s23  ;;  %1249 = vrot.lane.b32.xlu0 %v2862_v7, %s1997_s2  ;;  %v1174_v27 = vpop.permute.xlu0 %1173 }
 0x73b   :  { %1237 = vrot.lane.b32.xlu2 %v2862_v7, %s2000_s20  ;;  %v1178_v28 = vsel %vm255_vm12, %v1174_v27, 1e+09  ;;  %v1170_v29 = vmin.f32 %v1158_v22, %v1168_v4 }
 0x73c   :  { %v1180_v30 = vadd.f32 %v1178_v28, %v2142_v58 }
 0x73d   :  { %v1186_v36 = vpop.permute.xlu1 %1185 }
 0x73e   :  { %v1190_v9 = vsel %vm269_vm13, %v1186_v36, 1e+09  ;;  %v1182_v37 = vmin.f32 %v1170_v29, %v1180_v30 }
 0x73f   :  { %v1192_v11 = vadd.f32 %v1190_v9, %v2145_v60 }
 0x741   :  { %v1194_v38 = vmin.f32 %v1182_v37, %v1192_v11 }
 0x742   :  { %1285 = vrot.lane.b32.xlu0 %v2862_v7, %s2004_s24 }
 0x743   :  { %v1196_v40 = vadd.f32 %v1194_v38, %v2063_v19  ;;  %1273 = vrot.lane.b32.xlu2 %v2862_v7, %s2002_s22 }
 0x745   :  { %v1198_v41 = vmin.f32 %v2818_v18, %v1196_v40 }
 0x747   :  { %v2896_v42 = vsel %vm151_vm5, %v2085_v25, %v1198_v41 }
 0x748   :  { %1205 = vrot.lane.b32.xlu1 %v2896_v42, %s1999_s19 }
 0x74a   :  { %1227 = vrot.lane.b32.xlu0 %v2896_v42, %s1998_s4 }
 0x74b   :  { %1215 = vrot.lane.b32.xlu2 %v2896_v42, %s2001_s21 }
 0x750   :  { %1239 = vrot.lane.b32.xlu1 %v2896_v42, %s2000_s20 }
 0x752   :  { %1263 = vrot.lane.b32.xlu0 %v2896_v42, %s2003_s23 }
 0x753   :  { %1251 = vrot.lane.b32.xlu2 %v2896_v42, %s1997_s2 }
 0x758   :  { %1275 = vrot.lane.b32.xlu1 %v2896_v42, %s2002_s22 }
 0x75b   :  { %1287 = vrot.lane.b32.xlu2 %v2896_v42, %s2004_s24 }
 0x78d   :  { %v1204_v18 = vpop.permute.xlu2 %1203 }
 0x78e   :  { %v1209_v21 = vsel %vm173_vm6, 1e+09, %v1204_v18 }
 0x78f   :  { %v1211_v51 = vadd.f32 %v1209_v21, %v2118_v31 }
 0x795   :  { %v1238_v43 = vpop.permute.xlu2 %1237 }
 0x796   :  { %v1243_v57 = vsel %vm213_vm9, 1e+09, %v1238_v43 }
 0x797   :  { %v1245_v33 = vadd.f32 %v1243_v57, %v2127_v39 }
 0x79d   :  { %v1274_v61 = vpop.permute.xlu2 %1273 }
 0x79e   :  { %v1279_v5 = vsel %vm255_vm12, %v1274_v61, 1e+09 }
 0x79f   :  { %v1281_v8 = vadd.f32 %v1279_v5, %v2142_v58 }
 0x7a4   :  { %v1226_v46 = vpop.permute.xlu1 %1225  ;;  %v1214_v24 = vpop.permute.xlu0 %1213 }
 0x7a5   :  { %v1231_v49 = vsel %vm199_vm7, 1e+09, %v1226_v46  ;;  %v1219_v26 = vsel %vm185_vm8, 1e+09, %v1214_v24  ;;  %v1216_v10 = vpop.permute.xlu2 %1215 }
 0x7a6   :  { %v1221_v52 = vadd.f32 %v1219_v26, %v2120_v32  ;;  %v1233_v53 = vadd.f32 %v1231_v49, %v2123_v34  ;;  %v1220_v0 = vsel %vm185_vm8, 1e+09, %v1216_v10 }
 0x7a7   :  { %v1222_v27 = vadd.f32 %v1220_v0, %v2120_v32 }
 0x7a8   :  { %v1223_v55 = vmin.f32 %v1211_v51, %v1221_v52 }
 0x7aa   :  { %v1235_v62 = vmin.f32 %v1223_v55, %v1233_v53 }
 0x7ac   :  { %v1262_v35 = vpop.permute.xlu1 %1261  ;;  %v1250_v13 = vpop.permute.xlu0 %1249  ;;  %v1247_v1 = vmin.f32 %v1235_v62, %v1245_v33 }
 0x7ad   :  { %v1267_v63 = vsel %vm241_vm11, %v1262_v35, 1e+09  ;;  %v1255_v45 = vsel %vm227_vm10, %v1250_v13, 1e+09  ;;  %v1252_v28 = vpop.permute.xlu2 %1251 }
 0x7ae   :  { %v1257_v47 = vadd.f32 %v1255_v45, %v2132_v44  ;;  %v1269_v3 = vadd.f32 %v1267_v63, %v2136_v48  ;;  %v1256_v37 = vsel %vm227_vm10, %v1252_v28, 1e+09 }
 0x7af   :  { %v1258_v18 = vadd.f32 %v1256_v37, %v2132_v44 }
 0x7b0   :  { %v1259_v50 = vmin.f32 %v1247_v1, %v1257_v47 }
 0x7b2   :  { %v1271_v6 = vmin.f32 %v1259_v50, %v1269_v3 }
 0x7b4   :  { %v1286_v12 = vpop.permute.xlu0 %1285  ;;  %v1283_v14 = vmin.f32 %v1271_v6, %v1281_v8 }
 0x7b5   :  { %v1291_v54 = vsel %vm269_vm13, %v1286_v12, 1e+09  ;;  %v1288_v46 = vpop.permute.xlu2 %1287 }
 0x7b6   :  { %v1293_v56 = vadd.f32 %v1291_v54, %v2145_v60  ;;  %v1292_v51 = vsel %vm269_vm13, %v1288_v46, 1e+09 }
 0x7b7   :  { %v1294_v57 = vadd.f32 %v1292_v51, %v2145_v60 }
 0x7b8   :  { %v1295_v59 = vmin.f32 %v1283_v14, %v1293_v56 }
 0x7ba   :  { %v1297_v15 = vadd.f32 %v1295_v59, %v2063_v19  ;;  %v1206_v17 = vpop.permute.xlu1 %1205 }
 0x7bb   :  { %v1210_v20 = vsel %vm173_vm6, 1e+09, %v1206_v17 }
 0x7bc   :  { %v1299_v2 = vmin.f32 %v2862_v7, %v1297_v15  ;;  %v1212_v22 = vadd.f32 %v1210_v20, %v2118_v31  ;;  %v1228_v4 = vpop.permute.xlu0 %1227 }
 0x7bd   :  { %v1232_v30 = vsel %vm199_vm7, 1e+09, %v1228_v4 }
 0x7be   :  { %v2939_v29 = vsel %vm146_vm4, %v2072_v23, %v1299_v2  ;;  %v1224_v7 = vmin.f32 %v1212_v22, %v1222_v27  ;;  %v1234_v36 = vadd.f32 %v1232_v30, %v2123_v34 }
 0x7bf   :  { %1327 = vrot.lane.b32.xlu2 %v2939_v29, %s1998_s4  ;;  %1315 = vrot.lane.b32.xlu1 %v2939_v29, %s2001_s21 }
 0x7c0   :  { %1305 = vrot.lane.b32.xlu0 %v2939_v29, %s1999_s19  ;;  %v1236_v38 = vmin.f32 %v1224_v7, %v1234_v36 }
 0x7c2   :  { %v1240_v9 = vpop.permute.xlu1 %1239 }
 0x7c3   :  { %v1244_v11 = vsel %vm213_vm9, 1e+09, %v1240_v9 }
 0x7c4   :  { %v1246_v40 = vadd.f32 %v1244_v11, %v2127_v39  ;;  %v1264_v41 = vpop.permute.xlu0 %1263 }
 0x7c5   :  { %v1268_v21 = vsel %vm241_vm11, %v1264_v41, 1e+09 }
 0x7c6   :  { %v1248_v43 = vmin.f32 %v1236_v38, %v1246_v40  ;;  %v1270_v49 = vadd.f32 %v1268_v21, %v2136_v48 }
 0x7c7   :  { %1363 = vrot.lane.b32.xlu2 %v2939_v29, %s2003_s23  ;;  %1351 = vrot.lane.b32.xlu1 %v2939_v29, %s1997_s2 }
 0x7c8   :  { %v1260_v24 = vmin.f32 %v1248_v43, %v1258_v18  ;;  %1339 = vrot.lane.b32.xlu0 %v2939_v29, %s2000_s20 }
 0x7ca   :  { %v1276_v26 = vpop.permute.xlu1 %1275  ;;  %v1272_v53 = vmin.f32 %v1260_v24, %v1270_v49 }
 0x7cb   :  { %v1280_v52 = vsel %vm255_vm12, %v1276_v26, 1e+09 }
 0x7cc   :  { %v1282_v55 = vadd.f32 %v1280_v52, %v2142_v58 }
 0x7ce   :  { %v1284_v61 = vmin.f32 %v1272_v53, %v1282_v55 }
 0x7cf   :  { %1387 = vrot.lane.b32.xlu1 %v2939_v29, %s2004_s24 }
 0x7d0   :  { %v1296_v62 = vmin.f32 %v1284_v61, %v1294_v57  ;;  %1375 = vrot.lane.b32.xlu0 %v2939_v29, %s2002_s22 }
 0x7d2   :  { %v1298_v33 = vadd.f32 %v1296_v62, %v2063_v19 }
 0x7d4   :  { %v1300_v35 = vmin.f32 %v2896_v42, %v1298_v33 }
 0x7d6   :  { %v2974_v13 = vsel %vm151_vm5, %v2085_v25, %v1300_v35 }
 0x7d7   :  { %1329 = vrot.lane.b32.xlu1 %v2974_v13, %s1998_s4  ;;  %1307 = vrot.lane.b32.xlu2 %v2974_v13, %s1999_s19 }
 0x7d8   :  { %1317 = vrot.lane.b32.xlu0 %v2974_v13, %s2001_s21 }
 0x7df   :  { %1365 = vrot.lane.b32.xlu1 %v2974_v13, %s2003_s23  ;;  %1341 = vrot.lane.b32.xlu2 %v2974_v13, %s2000_s20 }
 0x7e0   :  { %1353 = vrot.lane.b32.xlu0 %v2974_v13, %s1997_s2 }
 0x7e7   :  { %1377 = vrot.lane.b32.xlu2 %v2974_v13, %s2002_s22 }
 0x7e8   :  { %1389 = vrot.lane.b32.xlu0 %v2974_v13, %s2004_s24 }
 0x819   :  { %v1328_v42 = vpop.permute.xlu2 %1327 }
 0x81a   :  { %v1333_v5 = vsel %vm199_vm7, 1e+09, %v1328_v42 }
 0x81b   :  { %v1335_v12 = vadd.f32 %v1333_v5, %v2123_v34 }
 0x821   :  { %v1364_v6 = vpop.permute.xlu2 %1363 }
 0x822   :  { %v1369_v20 = vsel %vm241_vm11, %v1364_v6, 1e+09 }
 0x823   :  { %v1371_v27 = vadd.f32 %v1369_v20, %v2136_v48 }
 0x831   :  { %v1316_v63 = vpop.permute.xlu1 %1315  ;;  %v1308_v2 = vpop.permute.xlu2 %1307 }
 0x832   :  { %v1321_v45 = vsel %vm185_vm8, 1e+09, %v1316_v63  ;;  %v1306_v1 = vpop.permute.xlu0 %1305  ;;  %v1312_v40 = vsel %vm173_vm6, 1e+09, %v1308_v2 }
 0x833   :  { %v1311_v47 = vsel %vm173_vm6, 1e+09, %v1306_v1  ;;  %v1323_v3 = vadd.f32 %v1321_v45, %v2120_v32  ;;  %v1314_v49 = vadd.f32 %v1312_v40, %v2118_v31 }
 0x834   :  { %v1313_v50 = vadd.f32 %v1311_v47, %v2118_v31 }
 0x836   :  { %v1325_v8 = vmin.f32 %v1313_v50, %v1323_v3 }
 0x838   :  { %v1337_v59 = vmin.f32 %v1325_v8, %v1335_v12 }
 0x839   :  { %v1352_v10 = vpop.permute.xlu1 %1351  ;;  %v1342_v18 = vpop.permute.xlu2 %1341 }
 0x83a   :  { %v1340_v54 = vpop.permute.xlu0 %1339  ;;  %v1357_v14 = vsel %vm227_vm10, %v1352_v10, 1e+09  ;;  %v1346_v57 = vsel %vm213_vm9, 1e+09, %v1342_v18 }
 0x83b   :  { %v1345_v56 = vsel %vm213_vm9, 1e+09, %v1340_v54  ;;  %v1359_v17 = vadd.f32 %v1357_v14, %v2132_v44  ;;  %v1348_v62 = vadd.f32 %v1346_v57, %v2127_v39 }
 0x83c   :  { %v1347_v15 = vadd.f32 %v1345_v56, %v2127_v39 }
 0x83e   :  { %v1349_v0 = vmin.f32 %v1337_v59, %v1347_v15 }
 0x840   :  { %v1361_v22 = vmin.f32 %v1349_v0, %v1359_v17 }
 0x841   :  { %v1388_v4 = vpop.permute.xlu1 %1387  ;;  %v1378_v63 = vpop.permute.xlu2 %1377 }
 0x842   :  { %v1376_v28 = vpop.permute.xlu0 %1375  ;;  %v1393_v30 = vsel %vm269_vm13, %v1388_v4, 1e+09  ;;  %v1373_v36 = vmin.f32 %v1361_v22, %v1371_v27  ;;  %v1382_v50 = vsel %vm255_vm12, %v1378_v63, 1e+09 }
 0x843   :  { %v1381_v7 = vsel %vm255_vm12, %v1376_v28, 1e+09  ;;  %v1395_v37 = vadd.f32 %v1393_v30, %v2145_v60  ;;  %v1384_v6 = vadd.f32 %v1382_v50, %v2142_v58 }
 0x844   :  { %v1383_v9 = vadd.f32 %v1381_v7, %v2142_v58 }
 0x846   :  { %v1385_v11 = vmin.f32 %v1373_v36, %v1383_v9 }
 0x848   :  { %v1397_v38 = vmin.f32 %v1385_v11, %v1395_v37 }
 0x849   :  { %v1330_v41 = vpop.permute.xlu1 %1329 }
 0x84a   :  { %v1399_v43 = vadd.f32 %v1397_v38, %v2063_v19  ;;  %v1318_v21 = vpop.permute.xlu0 %1317  ;;  %v1334_v46 = vsel %vm199_vm7, 1e+09, %v1330_v41 }
 0x84b   :  { %v1322_v24 = vsel %vm185_vm8, 1e+09, %v1318_v21  ;;  %v1336_v53 = vadd.f32 %v1334_v46, %v2123_v34 }
 0x84c   :  { %v1401_v26 = vmin.f32 %v2939_v29, %v1399_v43  ;;  %v1324_v51 = vadd.f32 %v1322_v24, %v2120_v32 }
 0x84e   :  { %v3018_v52 = vsel %vm146_vm4, %v2072_v23, %v1401_v26  ;;  %v1326_v55 = vmin.f32 %v1314_v49, %v1324_v51 }
 0x84f   :  { %1429 = vrot.lane.b32.xlu0 %v3018_v52, %s1998_s4  ;;  %1417 = vrot.lane.b32.xlu2 %v3018_v52, %s2001_s21 }
 0x850   :  { %v1338_v61 = vmin.f32 %v1326_v55, %v1336_v53  ;;  %1407 = vrot.lane.b32.xlu1 %v3018_v52, %s1999_s19 }
 0x851   :  { %v1366_v29 = vpop.permute.xlu1 %1365 }
 0x852   :  { %v1354_v33 = vpop.permute.xlu0 %1353  ;;  %v1370_v35 = vsel %vm241_vm11, %v1366_v29, 1e+09  ;;  %v1350_v45 = vmin.f32 %v1338_v61, %v1348_v62 }
 0x853   :  { %v1358_v42 = vsel %vm227_vm10, %v1354_v33, 1e+09  ;;  %v1372_v47 = vadd.f32 %v1370_v35, %v2136_v48 }
 0x854   :  { %v1360_v1 = vadd.f32 %v1358_v42, %v2132_v44 }
 0x856   :  { %v1362_v3 = vmin.f32 %v1350_v45, %v1360_v1 }
 0x857   :  { %1465 = vrot.lane.b32.xlu0 %v3018_v52, %s2003_s23  ;;  %1453 = vrot.lane.b32.xlu2 %v3018_v52, %s1997_s2 }
 0x858   :  { %v1374_v5 = vmin.f32 %v1362_v3, %v1372_v47  ;;  %1441 = vrot.lane.b32.xlu1 %v3018_v52, %s2000_s20 }
 0x85a   :  { %v1390_v8 = vpop.permute.xlu0 %1389  ;;  %v1386_v12 = vmin.f32 %v1374_v5, %v1384_v6 }
 0x85b   :  { %v1394_v10 = vsel %vm269_vm13, %v1390_v8, 1e+09 }
 0x85c   :  { %v1396_v54 = vadd.f32 %v1394_v10, %v2145_v60 }
 0x85e   :  { %v1398_v14 = vmin.f32 %v1386_v12, %v1396_v54 }
 0x85f   :  { %1489 = vrot.lane.b32.xlu2 %v3018_v52, %s2004_s24 }
 0x860   :  { %v1400_v56 = vadd.f32 %v1398_v14, %v2063_v19  ;;  %1477 = vrot.lane.b32.xlu1 %v3018_v52, %s2002_s22 }
 0x862   :  { %v1402_v59 = vmin.f32 %v2974_v13, %v1400_v56 }
 0x864   :  { %v3052_v15 = vsel %vm151_vm5, %v2085_v25, %v1402_v59 }
 0x865   :  { %1409 = vrot.lane.b32.xlu0 %v3052_v15, %s1999_s19 }
 0x867   :  { %1431 = vrot.lane.b32.xlu2 %v3052_v15, %s1998_s4 }
 0x868   :  { %1419 = vrot.lane.b32.xlu1 %v3052_v15, %s2001_s21 }
 0x86d   :  { %1443 = vrot.lane.b32.xlu0 %v3052_v15, %s2000_s20 }
 0x86f   :  { %1467 = vrot.lane.b32.xlu2 %v3052_v15, %s2003_s23 }
 0x870   :  { %1455 = vrot.lane.b32.xlu1 %v3052_v15, %s1997_s2 }
 0x875   :  { %1479 = vrot.lane.b32.xlu0 %v3052_v15, %s2002_s22 }
 0x878   :  { %1491 = vrot.lane.b32.xlu1 %v3052_v15, %s2004_s24 }
 0x8a9   :  { %v1418_v13 = vpop.permute.xlu2 %1417 }
 0x8aa   :  { %v1423_v20 = vsel %vm185_vm8, 1e+09, %v1418_v13 }
 0x8ab   :  { %v1425_v27 = vadd.f32 %v1423_v20, %v2120_v32 }
 0x8b1   :  { %v1454_v2 = vpop.permute.xlu2 %1453 }
 0x8b2   :  { %v1459_v9 = vsel %vm227_vm10, %v1454_v2, 1e+09 }
 0x8b3   :  { %v1461_v18 = vadd.f32 %v1459_v9, %v2132_v44 }
 0x8b9   :  { %v1490_v41 = vpop.permute.xlu2 %1489 }
 0x8ba   :  { %v1495_v26 = vsel %vm269_vm13, %v1490_v41, 1e+09 }
 0x8bb   :  { %v1497_v57 = vadd.f32 %v1495_v26, %v2145_v60 }
 0x8c1   :  { %v1430_v0 = vpop.permute.xlu0 %1429  ;;  %v1432_v29 = vpop.permute.xlu2 %1431 }
 0x8c2   :  { %v1408_v17 = vpop.permute.xlu1 %1407  ;;  %v1435_v28 = vsel %vm199_vm7, 1e+09, %v1430_v0  ;;  %v1436_v47 = vsel %vm199_vm7, 1e+09, %v1432_v29 }
 0x8c3   :  { %v1413_v22 = vsel %vm173_vm6, 1e+09, %v1408_v17  ;;  %v1437_v7 = vadd.f32 %v1435_v28, %v2123_v34  ;;  %v1438_v8 = vadd.f32 %v1436_v47, %v2123_v34 }
 0x8c4   :  { %v1415_v4 = vadd.f32 %v1413_v22, %v2118_v31 }
 0x8c6   :  { %v1427_v30 = vmin.f32 %v1415_v4, %v1425_v27 }
 0x8c8   :  { %v1439_v11 = vmin.f32 %v1427_v30, %v1437_v7 }
 0x8c9   :  { %v1466_v40 = vpop.permute.xlu0 %1465  ;;  %v1468_v12 = vpop.permute.xlu2 %1467 }
 0x8ca   :  { %v1442_v36 = vpop.permute.xlu1 %1441  ;;  %v1471_v21 = vsel %vm241_vm11, %v1466_v40, 1e+09  ;;  %v1472_v17 = vsel %vm241_vm11, %v1468_v12, 1e+09 }
 0x8cb   :  { %v1447_v37 = vsel %vm213_vm9, 1e+09, %v1442_v36  ;;  %v1473_v24 = vadd.f32 %v1471_v21, %v2136_v48  ;;  %v1474_v2 = vadd.f32 %v1472_v17, %v2136_v48 }
 0x8cc   :  { %v1449_v38 = vadd.f32 %v1447_v37, %v2127_v39 }
 0x8ce   :  { %v1451_v43 = vmin.f32 %v1439_v11, %v1449_v38 }
 0x8d0   :  { %v1463_v46 = vmin.f32 %v1451_v43, %v1461_v18 }
 0x8d2   :  { %v1478_v49 = vpop.permute.xlu1 %1477  ;;  %v1475_v53 = vmin.f32 %v1463_v46, %v1473_v24 }
 0x8d3   :  { %v1483_v51 = vsel %vm255_vm12, %v1478_v49, 1e+09 }
 0x8d4   :  { %v1485_v55 = vadd.f32 %v1483_v51, %v2142_v58 }
 0x8d6   :  { %v1487_v61 = vmin.f32 %v1475_v53, %v1485_v55 }
 0x8d7   :  { %v1410_v62 = vpop.permute.xlu0 %1409 }
 0x8d8   :  { %v1499_v33 = vmin.f32 %v1487_v61, %v1497_v57  ;;  %v1414_v35 = vsel %vm173_vm6, 1e+09, %v1410_v62 }
 0x8d9   :  { %v1416_v45 = vadd.f32 %v1414_v35, %v2118_v31 }
 0x8da   :  { %v1501_v42 = vadd.f32 %v1499_v33, %v2063_v19  ;;  %v1420_v63 = vpop.permute.xlu1 %1419 }
 0x8db   :  { %v1424_v1 = vsel %vm185_vm8, 1e+09, %v1420_v63 }
 0x8dc   :  { %v1503_v3 = vmin.f32 %v3018_v52, %v1501_v42  ;;  %v1426_v50 = vadd.f32 %v1424_v1, %v2120_v32 }
 0x8de   :  { %v3096_v5 = vsel %vm146_vm4, %v2072_v23, %v1503_v3  ;;  %v1428_v6 = vmin.f32 %v1416_v45, %v1426_v50 }
 0x8df   :  { %1531 = vrot.lane.b32.xlu1 %v3096_v5, %s1998_s4  ;;  %1519 = vrot.lane.b32.xlu0 %v3096_v5, %s2001_s21  ;;  %v1444_v10 = vpop.permute.xlu0 %1443 }
 0x8e0   :  { %1509 = vrot.lane.b32.xlu2 %v3096_v5, %s1999_s19  ;;  %v1448_v52 = vsel %vm213_vm9, 1e+09, %v1444_v10  ;;  %v1440_v54 = vmin.f32 %v1428_v6, %v1438_v8 }
 0x8e1   :  { %v1450_v14 = vadd.f32 %v1448_v52, %v2127_v39 }
 0x8e2   :  { %v1456_v56 = vpop.permute.xlu1 %1455 }
 0x8e3   :  { %v1460_v59 = vsel %vm227_vm10, %v1456_v56, 1e+09  ;;  %v1452_v13 = vmin.f32 %v1440_v54, %v1450_v14 }
 0x8e4   :  { %v1462_v0 = vadd.f32 %v1460_v59, %v2132_v44 }
 0x8e6   :  { %v1464_v20 = vmin.f32 %v1452_v13, %v1462_v0 }
 0x8e7   :  { %1567 = vrot.lane.b32.xlu1 %v3096_v5, %s2003_s23  ;;  %1555 = vrot.lane.b32.xlu0 %v3096_v5, %s1997_s2  ;;  %v1480_v22 = vpop.permute.xlu0 %1479 }
 0x8e8   :  { %1543 = vrot.lane.b32.xlu2 %v3096_v5, %s2000_s20  ;;  %v1484_v4 = vsel %vm255_vm12, %v1480_v22, 1e+09  ;;  %v1476_v27 = vmin.f32 %v1464_v20, %v1474_v2 }
 0x8e9   :  { %v1486_v28 = vadd.f32 %v1484_v4, %v2142_v58 }
 0x8ea   :  { %v1492_v30 = vpop.permute.xlu1 %1491 }
 0x8eb   :  { %v1496_v7 = vsel %vm269_vm13, %v1492_v30, 1e+09  ;;  %v1488_v36 = vmin.f32 %v1476_v27, %v1486_v28 }
 0x8ec   :  { %v1498_v9 = vadd.f32 %v1496_v7, %v2145_v60 }
 0x8ee   :  { %v1500_v37 = vmin.f32 %v1488_v36, %v1498_v9 }
 0x8ef   :  { %1591 = vrot.lane.b32.xlu0 %v3096_v5, %s2004_s24 }
 0x8f0   :  { %v1502_v11 = vadd.f32 %v1500_v37, %v2063_v19  ;;  %1579 = vrot.lane.b32.xlu2 %v3096_v5, %s2002_s22 }
 0x8f2   :  { %v1504_v38 = vmin.f32 %v3052_v15, %v1502_v11 }
 0x8f4   :  { %v3130_v40 = vsel %vm151_vm5, %v2085_v25, %v1504_v38 }
 0x8f5   :  { %1511 = vrot.lane.b32.xlu1 %v3130_v40, %s1999_s19 }
 0x8f7   :  { %1533 = vrot.lane.b32.xlu0 %v3130_v40, %s1998_s4 }
 0x8f8   :  { %1521 = vrot.lane.b32.xlu2 %v3130_v40, %s2001_s21 }
 0x8fd   :  { %1545 = vrot.lane.b32.xlu1 %v3130_v40, %s2000_s20 }
 0x8ff   :  { %1569 = vrot.lane.b32.xlu0 %v3130_v40, %s2003_s23 }
 0x900   :  { %1557 = vrot.lane.b32.xlu2 %v3130_v40, %s1997_s2 }
 0x905   :  { %1581 = vrot.lane.b32.xlu1 %v3130_v40, %s2002_s22 }
 0x908   :  { %1593 = vrot.lane.b32.xlu2 %v3130_v40, %s2004_s24 }
 0x93a   :  { %v1510_v15 = vpop.permute.xlu2 %1509 }
 0x93b   :  { %v1515_v18 = vsel %vm173_vm6, 1e+09, %v1510_v15 }
 0x93c   :  { %v1517_v49 = vadd.f32 %v1515_v18, %v2118_v31 }
 0x942   :  { %v1544_v41 = vpop.permute.xlu2 %1543 }
 0x943   :  { %v1549_v55 = vsel %vm213_vm9, 1e+09, %v1544_v41 }
 0x944   :  { %v1551_v29 = vadd.f32 %v1549_v55, %v2127_v39 }
 0x94a   :  { %v1580_v57 = vpop.permute.xlu2 %1579 }
 0x94b   :  { %v1585_v3 = vsel %vm255_vm12, %v1580_v57, 1e+09 }
 0x94c   :  { %v1587_v6 = vadd.f32 %v1585_v3, %v2142_v58 }
 0x951   :  { %v1532_v43 = vpop.permute.xlu1 %1531  ;;  %v1520_v21 = vpop.permute.xlu0 %1519 }
 0x952   :  { %v1537_v46 = vsel %vm199_vm7, 1e+09, %v1532_v43  ;;  %v1525_v24 = vsel %vm185_vm8, 1e+09, %v1520_v21  ;;  %v1522_v8 = vpop.permute.xlu2 %1521 }
 0x953   :  { %v1527_v26 = vadd.f32 %v1525_v24, %v2120_v32  ;;  %v1539_v51 = vadd.f32 %v1537_v46, %v2123_v34  ;;  %v1526_v13 = vsel %vm185_vm8, 1e+09, %v1522_v8 }
 0x954   :  { %v1528_v22 = vadd.f32 %v1526_v13, %v2120_v32 }
 0x955   :  { %v1529_v53 = vmin.f32 %v1517_v49, %v1527_v26 }
 0x957   :  { %v1541_v61 = vmin.f32 %v1529_v53, %v1539_v51 }
 0x959   :  { %v1568_v62 = vpop.permute.xlu1 %1567  ;;  %v1556_v33 = vpop.permute.xlu0 %1555  ;;  %v1553_v63 = vmin.f32 %v1541_v61, %v1551_v29 }
 0x95a   :  { %v1573_v35 = vsel %vm241_vm11, %v1568_v62, 1e+09  ;;  %v1561_v42 = vsel %vm227_vm10, %v1556_v33, 1e+09  ;;  %v1558_v4 = vpop.permute.xlu2 %1557 }
 0x95b   :  { %v1563_v45 = vadd.f32 %v1561_v42, %v2132_v44  ;;  %v1575_v1 = vadd.f32 %v1573_v35, %v2136_v48  ;;  %v1562_v36 = vsel %vm227_vm10, %v1558_v4, 1e+09 }
 0x95c   :  { %v1564_v15 = vadd.f32 %v1562_v36, %v2132_v44 }
 0x95d   :  { %v1565_v47 = vmin.f32 %v1553_v63, %v1563_v45 }
 0x95f   :  { %v1577_v50 = vmin.f32 %v1565_v47, %v1575_v1 }
 0x961   :  { %v1592_v10 = vpop.permute.xlu0 %1591  ;;  %v1589_v12 = vmin.f32 %v1577_v50, %v1587_v6 }
 0x962   :  { %v1597_v52 = vsel %vm269_vm13, %v1592_v10, 1e+09  ;;  %v1594_v43 = vpop.permute.xlu2 %1593 }
 0x963   :  { %v1599_v54 = vadd.f32 %v1597_v52, %v2145_v60  ;;  %v1598_v49 = vsel %vm269_vm13, %v1594_v43, 1e+09 }
 0x964   :  { %v1600_v55 = vadd.f32 %v1598_v49, %v2145_v60 }
 0x965   :  { %v1601_v14 = vmin.f32 %v1589_v12, %v1599_v54 }
 0x967   :  { %v1603_v56 = vadd.f32 %v1601_v14, %v2063_v19  ;;  %v1512_v59 = vpop.permute.xlu1 %1511 }
 0x968   :  { %v1516_v17 = vsel %vm173_vm6, 1e+09, %v1512_v59 }
 0x969   :  { %v1605_v0 = vmin.f32 %v3096_v5, %v1603_v56  ;;  %v1518_v20 = vadd.f32 %v1516_v17, %v2118_v31  ;;  %v1534_v2 = vpop.permute.xlu0 %1533 }
 0x96a   :  { %v1538_v28 = vsel %vm199_vm7, 1e+09, %v1534_v2 }
 0x96b   :  { %v3173_v27 = vsel %vm146_vm4, %v2072_v23, %v1605_v0  ;;  %v1530_v5 = vmin.f32 %v1518_v20, %v1528_v22  ;;  %v1540_v30 = vadd.f32 %v1538_v28, %v2123_v34 }
 0x96c   :  { %1633 = vrot.lane.b32.xlu2 %v3173_v27, %s1998_s4  ;;  %1621 = vrot.lane.b32.xlu1 %v3173_v27, %s2001_s21 }
 0x96d   :  { %1611 = vrot.lane.b32.xlu0 %v3173_v27, %s1999_s19  ;;  %v1542_v37 = vmin.f32 %v1530_v5, %v1540_v30 }
 0x96f   :  { %v1546_v7 = vpop.permute.xlu1 %1545 }
 0x970   :  { %v1550_v9 = vsel %vm213_vm9, 1e+09, %v1546_v7 }
 0x971   :  { %v1552_v11 = vadd.f32 %v1550_v9, %v2127_v39  ;;  %v1570_v38 = vpop.permute.xlu0 %1569 }
 0x972   :  { %v1574_v18 = vsel %vm241_vm11, %v1570_v38, 1e+09 }
 0x973   :  { %v1554_v41 = vmin.f32 %v1542_v37, %v1552_v11  ;;  %v1576_v46 = vadd.f32 %v1574_v18, %v2136_v48 }
 0x974   :  { %1669 = vrot.lane.b32.xlu2 %v3173_v27, %s2003_s23  ;;  %1657 = vrot.lane.b32.xlu1 %v3173_v27, %s1997_s2 }
 0x975   :  { %v1566_v21 = vmin.f32 %v1554_v41, %v1564_v15  ;;  %1645 = vrot.lane.b32.xlu0 %v3173_v27, %s2000_s20 }
 0x977   :  { %v1582_v24 = vpop.permute.xlu1 %1581  ;;  %v1578_v51 = vmin.f32 %v1566_v21, %v1576_v46 }
 0x978   :  { %v1586_v26 = vsel %vm255_vm12, %v1582_v24, 1e+09 }
 0x979   :  { %v1588_v53 = vadd.f32 %v1586_v26, %v2142_v58 }
 0x97b   :  { %v1590_v57 = vmin.f32 %v1578_v51, %v1588_v53 }
 0x97c   :  { %1693 = vrot.lane.b32.xlu1 %v3173_v27, %s2004_s24 }
 0x97d   :  { %v1602_v61 = vmin.f32 %v1590_v57, %v1600_v55  ;;  %1681 = vrot.lane.b32.xlu0 %v3173_v27, %s2002_s22 }
 0x97f   :  { %v1604_v29 = vadd.f32 %v1602_v61, %v2063_v19 }
 0x981   :  { %v1606_v62 = vmin.f32 %v3130_v40, %v1604_v29 }
 0x983   :  { %v3208_v33 = vsel %vm151_vm5, %v2085_v25, %v1606_v62 }
 0x984   :  { %1635 = vrot.lane.b32.xlu1 %v3208_v33, %s1998_s4  ;;  %1613 = vrot.lane.b32.xlu2 %v3208_v33, %s1999_s19 }
 0x985   :  { %1623 = vrot.lane.b32.xlu0 %v3208_v33, %s2001_s21 }
 0x98c   :  { %1671 = vrot.lane.b32.xlu1 %v3208_v33, %s2003_s23  ;;  %1647 = vrot.lane.b32.xlu2 %v3208_v33, %s2000_s20 }
 0x98d   :  { %1659 = vrot.lane.b32.xlu0 %v3208_v33, %s1997_s2 }
 0x994   :  { %1683 = vrot.lane.b32.xlu2 %v3208_v33, %s2002_s22 }
 0x995   :  { %1695 = vrot.lane.b32.xlu0 %v3208_v33, %s2004_s24 }
 0x9c6   :  { %v1634_v40 = vpop.permute.xlu2 %1633 }
 0x9c7   :  { %v1639_v3 = vsel %vm199_vm7, 1e+09, %v1634_v40 }
 0x9c8   :  { %v1641_v10 = vadd.f32 %v1639_v3, %v2123_v34 }
 0x9ce   :  { %v1670_v50 = vpop.permute.xlu2 %1669 }
 0x9cf   :  { %v1675_v17 = vsel %vm241_vm11, %v1670_v50, 1e+09 }
 0x9d0   :  { %v1677_v22 = vadd.f32 %v1675_v17, %v2136_v48 }
 0x9de   :  { %v1622_v35 = vpop.permute.xlu1 %1621  ;;  %v1614_v0 = vpop.permute.xlu2 %1613 }
 0x9df   :  { %v1627_v42 = vsel %vm185_vm8, 1e+09, %v1622_v35  ;;  %v1612_v63 = vpop.permute.xlu0 %1611  ;;  %v1618_v11 = vsel %vm173_vm6, 1e+09, %v1614_v0 }
 0x9e0   :  { %v1617_v45 = vsel %vm173_vm6, 1e+09, %v1612_v63  ;;  %v1629_v1 = vadd.f32 %v1627_v42, %v2120_v32  ;;  %v1620_v46 = vadd.f32 %v1618_v11, %v2118_v31 }
 0x9e1   :  { %v1619_v47 = vadd.f32 %v1617_v45, %v2118_v31 }
 0x9e3   :  { %v1631_v6 = vmin.f32 %v1619_v47, %v1629_v1 }
 0x9e5   :  { %v1643_v14 = vmin.f32 %v1631_v6, %v1641_v10 }
 0x9e6   :  { %v1658_v8 = vpop.permute.xlu1 %1657  ;;  %v1648_v15 = vpop.permute.xlu2 %1647 }
 0x9e7   :  { %v1646_v52 = vpop.permute.xlu0 %1645  ;;  %v1663_v12 = vsel %vm227_vm10, %v1658_v8, 1e+09  ;;  %v1652_v55 = vsel %vm213_vm9, 1e+09, %v1648_v15 }
 0x9e8   :  { %v1651_v54 = vsel %vm213_vm9, 1e+09, %v1646_v52  ;;  %v1665_v59 = vadd.f32 %v1663_v12, %v2132_v44  ;;  %v1654_v61 = vadd.f32 %v1652_v55, %v2127_v39 }
 0x9e9   :  { %v1653_v56 = vadd.f32 %v1651_v54, %v2127_v39 }
 0x9eb   :  { %v1655_v13 = vmin.f32 %v1643_v14, %v1653_v56 }
 0x9ed   :  { %v1667_v20 = vmin.f32 %v1655_v13, %v1665_v59 }
 0x9ee   :  { %v1694_v2 = vpop.permute.xlu1 %1693  ;;  %v1684_v35 = vpop.permute.xlu2 %1683 }
 0x9ef   :  { %v1682_v4 = vpop.permute.xlu0 %1681  ;;  %v1699_v28 = vsel %vm269_vm13, %v1694_v2, 1e+09  ;;  %v1679_v30 = vmin.f32 %v1667_v20, %v1677_v22  ;;  %v1688_v47 = vsel %vm255_vm12, %v1684_v35, 1e+09 }
 0x9f0   :  { %v1687_v5 = vsel %vm255_vm12, %v1682_v4, 1e+09  ;;  %v1701_v36 = vadd.f32 %v1699_v28, %v2145_v60  ;;  %v1690_v50 = vadd.f32 %v1688_v47, %v2142_v58 }
 0x9f1   :  { %v1689_v7 = vadd.f32 %v1687_v5, %v2142_v58 }
 0x9f3   :  { %v1691_v9 = vmin.f32 %v1679_v30, %v1689_v7 }
 0x9f5   :  { %v1703_v37 = vmin.f32 %v1691_v9, %v1701_v36 }
 0x9f6   :  { %v1636_v38 = vpop.permute.xlu1 %1635 }
 0x9f7   :  { %v1705_v41 = vadd.f32 %v1703_v37, %v2063_v19  ;;  %v1624_v18 = vpop.permute.xlu0 %1623  ;;  %v1640_v43 = vsel %vm199_vm7, 1e+09, %v1636_v38 }
 0x9f8   :  { %v1628_v21 = vsel %vm185_vm8, 1e+09, %v1624_v18  ;;  %v1642_v51 = vadd.f32 %v1640_v43, %v2123_v34 }
 0x9f9   :  { %v1707_v24 = vmin.f32 %v3173_v27, %v1705_v41  ;;  %v1630_v49 = vadd.f32 %v1628_v21, %v2120_v32 }
 0x9fb   :  { %v3252_v26 = vsel %vm146_vm4, %v2072_v23, %v1707_v24  ;;  %v1632_v53 = vmin.f32 %v1620_v46, %v1630_v49 }
 0x9fc   :  { %1735 = vrot.lane.b32.xlu0 %v3252_v26, %s1998_s4  ;;  %1723 = vrot.lane.b32.xlu2 %v3252_v26, %s2001_s21 }
 0x9fd   :  { %v1644_v57 = vmin.f32 %v1632_v53, %v1642_v51  ;;  %1713 = vrot.lane.b32.xlu1 %v3252_v26, %s1999_s19 }
 0x9fe   :  { %v1672_v27 = vpop.permute.xlu1 %1671 }
 0x9ff   :  { %v1660_v29 = vpop.permute.xlu0 %1659  ;;  %v1676_v62 = vsel %vm241_vm11, %v1672_v27, 1e+09  ;;  %v1656_v42 = vmin.f32 %v1644_v57, %v1654_v61 }
 0xa00   :  { %v1664_v40 = vsel %vm227_vm10, %v1660_v29, 1e+09  ;;  %v1678_v45 = vadd.f32 %v1676_v62, %v2136_v48 }
 0xa01   :  { %v1666_v63 = vadd.f32 %v1664_v40, %v2132_v44 }
 0xa03   :  { %v1668_v1 = vmin.f32 %v1656_v42, %v1666_v63 }
 0xa04   :  { %1771 = vrot.lane.b32.xlu0 %v3252_v26, %s2003_s23  ;;  %1759 = vrot.lane.b32.xlu2 %v3252_v26, %s1997_s2 }
 0xa05   :  { %v1680_v3 = vmin.f32 %v1668_v1, %v1678_v45  ;;  %1747 = vrot.lane.b32.xlu1 %v3252_v26, %s2000_s20 }
 0xa07   :  { %v1696_v6 = vpop.permute.xlu0 %1695  ;;  %v1692_v10 = vmin.f32 %v1680_v3, %v1690_v50 }
 0xa08   :  { %v1700_v8 = vsel %vm269_vm13, %v1696_v6, 1e+09 }
 0xa09   :  { %v1702_v52 = vadd.f32 %v1700_v8, %v2145_v60 }
 0xa0b   :  { %v1704_v12 = vmin.f32 %v1692_v10, %v1702_v52 }
 0xa0c   :  { %1795 = vrot.lane.b32.xlu2 %v3252_v26, %s2004_s24 }
 0xa0d   :  { %v1706_v54 = vadd.f32 %v1704_v12, %v2063_v19  ;;  %1783 = vrot.lane.b32.xlu1 %v3252_v26, %s2002_s22 }
 0xa0f   :  { %v1708_v14 = vmin.f32 %v3208_v33, %v1706_v54 }
 0xa11   :  { %v3286_v56 = vsel %vm151_vm5, %v2085_v25, %v1708_v14 }
 0xa12   :  { %1715 = vrot.lane.b32.xlu0 %v3286_v56, %s1999_s19 }
 0xa14   :  { %1737 = vrot.lane.b32.xlu2 %v3286_v56, %s1998_s4 }
 0xa15   :  { %1725 = vrot.lane.b32.xlu1 %v3286_v56, %s2001_s21 }
 0xa1a   :  { %1749 = vrot.lane.b32.xlu0 %v3286_v56, %s2000_s20 }
 0xa1c   :  { %1773 = vrot.lane.b32.xlu2 %v3286_v56, %s2003_s23 }
 0xa1d   :  { %1761 = vrot.lane.b32.xlu1 %v3286_v56, %s1997_s2 }
 0xa22   :  { %1785 = vrot.lane.b32.xlu0 %v3286_v56, %s2002_s22 }
 0xa25   :  { %1797 = vrot.lane.b32.xlu1 %v3286_v56, %s2004_s24 }
 0xa56   :  { %v1724_v33 = vpop.permute.xlu2 %1723 }
 0xa57   :  { %v1729_v17 = vsel %vm185_vm8, 1e+09, %v1724_v33 }
 0xa58   :  { %v1731_v2 = vadd.f32 %v1729_v17, %v2120_v32 }
 0xa5e   :  { %v1760_v22 = vpop.permute.xlu2 %1759 }
 0xa5f   :  { %v1765_v7 = vsel %vm227_vm10, %v1760_v22, 1e+09 }
 0xa60   :  { %v1767_v38 = vadd.f32 %v1765_v7, %v2132_v44 }
 0xa66   :  { %v1796_v18 = vpop.permute.xlu2 %1795 }
 0xa67   :  { %v1801_v24 = vsel %vm269_vm13, %v1796_v18, 1e+09 }
 0xa68   :  { %v1803_v55 = vadd.f32 %v1801_v24, %v2145_v60 }
 0xa6e   :  { %v1736_v13 = vpop.permute.xlu0 %1735  ;;  %v1738_v1 = vpop.permute.xlu2 %1737 }
 0xa6f   :  { %v1714_v59 = vpop.permute.xlu1 %1713  ;;  %v1741_v4 = vsel %vm199_vm7, 1e+09, %v1736_v13  ;;  %v1742_v50 = vsel %vm199_vm7, 1e+09, %v1738_v1 }
 0xa70   :  { %v1719_v0 = vsel %vm173_vm6, 1e+09, %v1714_v59  ;;  %v1743_v5 = vadd.f32 %v1741_v4, %v2123_v34  ;;  %v1744_v8 = vadd.f32 %v1742_v50, %v2123_v34 }
 0xa71   :  { %v1721_v20 = vadd.f32 %v1719_v0, %v2118_v31 }
 0xa73   :  { %v1733_v28 = vmin.f32 %v1721_v20, %v1731_v2 }
 0xa75   :  { %v1745_v9 = vmin.f32 %v1733_v28, %v1743_v5 }
 0xa76   :  { %v1772_v11 = vpop.permute.xlu0 %1771  ;;  %v1774_v14 = vpop.permute.xlu2 %1773 }
 0xa77   :  { %v1748_v30 = vpop.permute.xlu1 %1747  ;;  %v1777_v41 = vsel %vm241_vm11, %v1772_v11, 1e+09 }
 0xa78   :  { %v1753_v36 = vsel %vm213_vm9, 1e+09, %v1748_v30  ;;  %v1779_v21 = vadd.f32 %v1777_v41, %v2136_v48 }
 0xa79   :  { %v1755_v37 = vadd.f32 %v1753_v36, %v2127_v39  ;;  %v2006_v36 = vmov 0.0  }
 0xa7b   :  { %v1757_v15 = vmin.f32 %v1745_v9, %v1755_v37 }
 0xa7d   :  { %v1769_v43 = vmin.f32 %v1757_v15, %v1767_v38 }
 0xa7f   :  { %v1784_v46 = vpop.permute.xlu1 %1783  ;;  %v1781_v51 = vmin.f32 %v1769_v43, %v1779_v21 }
 0xa80   :  { %v1789_v49 = vsel %vm255_vm12, %v1784_v46, 1e+09 }
 0xa81   :  { %v1791_v53 = vadd.f32 %v1789_v49, %v2142_v58 }
 0xa83   :  { %v1793_v57 = vmin.f32 %v1781_v51, %v1791_v53 }
 0xa84   :  { %v1716_v35 = vpop.permute.xlu0 %1715 }
 0xa85   :  { %v1805_v27 = vmin.f32 %v1793_v57, %v1803_v55  ;;  %v1720_v45 = vsel %vm173_vm6, 1e+09, %v1716_v35 }
 0xa86   :  { %v1722_v3 = vadd.f32 %v1720_v45, %v2118_v31  ;;  %v1778_v31 = vsel %vm241_vm11, %v1774_v14, 1e+09 }
 0xa87   :  { %v1807_v61 = vadd.f32 %v1805_v27, %v2063_v19  ;;  %v1726_v42 = vpop.permute.xlu1 %1725  ;;  %v1780_v0 = vadd.f32 %v1778_v31, %v2136_v48 }
 0xa88   :  { %v1730_v63 = vsel %vm185_vm8, 1e+09, %v1726_v42 }
 0xa89   :  { %v1809_v29 = vmin.f32 %v3252_v26, %v1807_v61  ;;  %v1732_v47 = vadd.f32 %v1730_v63, %v2120_v32 }
 0xa8b   :  { %v1811_v62 = vsel %vm146_vm4, %v2072_v23, %v1809_v29  ;;  %v1734_v6 = vmin.f32 %v1722_v3, %v1732_v47 }
 0xa8c   :  { %v1813_v40 = vsel %vm151_vm5, %v1811_v62, 0.0  ;;  %v1750_v26 = vpop.permute.xlu0 %1749 }
 0xa8d   :  { %1814 = vadd.xlane.f32.xlu2 %v1813_v40  ;;  %v1754_v23 = vsel %vm213_vm9, 1e+09, %v1750_v26  ;;  %v1746_v12 = vmin.f32 %v1734_v6, %v1744_v8 }
 0xa8e   :  { %v1756_v52 = vadd.f32 %v1754_v23, %v2127_v39 }
 0xa8f   :  { %v1762_v10 = vpop.permute.xlu1 %1761 }
 0xa90   :  { %v1766_v54 = vsel %vm227_vm10, %v1762_v10, 1e+09  ;;  %v1758_v33 = vmin.f32 %v1746_v12, %v1756_v52 }
 0xa91   :  { %v1768_v32 = vadd.f32 %v1766_v54, %v2132_v44 }
 0xa93   :  { %v1770_v17 = vmin.f32 %v1758_v33, %v1768_v32 }
 0xa94   :  { %v1786_v59 = vpop.permute.xlu0 %1785 }
 0xa95   :  { %v1790_v13 = vsel %vm255_vm12, %v1786_v59, 1e+09  ;;  %v1782_v2 = vmin.f32 %v1770_v17, %v1780_v0 }
 0xa96   :  { %v1792_v34 = vadd.f32 %v1790_v13, %v2142_v58 }
 0xa97   :  { %v1798_v20 = vpop.permute.xlu1 %1797 }
 0xa98   :  { %v1802_v39 = vsel %vm269_vm13, %v1798_v20, 1e+09  ;;  %v1794_v22 = vmin.f32 %v1782_v2, %v1792_v34 }
 0xa99   :  { %v1804_v4 = vadd.f32 %v1802_v39, %v2145_v60 }
 0xa9b   :  { %v1806_v28 = vmin.f32 %v1794_v22, %v1804_v4 }
 0xa9d   :  { %v1808_v5 = vadd.f32 %v1806_v28, %v2063_v19 }
 0xa9f   :  { %v1810_v44 = vmin.f32 %v3286_v56, %v1808_v5 }
 0xaa1   :  { %v1812_v30 = vsel %vm151_vm5, %v2085_v25, %v1810_v44 }
 0xaa2   :  { %v1816_v7 = vadd.f32 %v1812_v30, %v1811_v62 }
 0xaa4   :  { %v1817_v58 = vsub.f32 %v1816_v7, %v2063_v19 }
 0xb00   :  { %v1815_v48 = vpop.xlane.xlu2 %1814 }
 0xb01   :  { %v1818_v60 = vadd.f32 0.001, %v1815_v48 }
 0xb03   :  { %vm1819_vm14 = vcmp.le.f32.partialorder %v1817_v58, %v1818_v60 }
 0xb04   :  { %v1844_v56 = vsel %vm1819_vm14, 1.0, %v2006_v36 }
 0xb05   :  { %1822 = vst [vmem:[#allocation10] sm:$0xff] %v1844_v56 }
 0xb06   :  { %1833 = dma.vmem_to_hbm [thread:$0]  %s1829_s26, 128, %s1831_s29, [#allocation4]  }
 0xb07   :  { %1989 = dma.done.wait [#allocation4], 128  }
 0xb08   :  { %1990 = vsyncadd [#allocation4], 4294967168 }
 0xb09   :  { %1838 = vsyncpa [#allocation3], 1 }
 0xb0a   :  { %1839 = vsyncpa [#allocation6], 1 }
 0xb0b   :  { %1840 = vsyncpa [#allocation9], 1 }
 0xb0c   :  { %1841 = vsyncpa [#allocation4], 1 }

</bundles_post_ra>
